<compile_context>
chip_gen: v7x
topology: tpu7x:2x2x1
jax: 0.10.0
libtpu: 0.0.40
codegen_flags: <defaults>
</compile_context>

<pallas_src>
import functools
import math

import jax
import jax.numpy as jnp
from jax.experimental import pallas as pl
from jax.experimental.pallas import tpu as pltpu

_MXU_DTYPE = jnp.bfloat16              # matmul operand dtype (f32 accumulation)
_VMEM_LIMIT_BYTES = 32 * 1024 * 1024   # safe on v5e/v6e (128 MiB) and v7x (64 MiB)


# ---------------------------------------------------------------------------
# Small helpers
# ---------------------------------------------------------------------------
def _round_up(x, m):
    return ((x + m - 1) // m) * m


def _largest_tile(n, target, align=8):
    """Largest divisor of n that is <= target and a multiple of `align`, else n."""
    if n <= target:
        return n
    t = (target // align) * align
    while t >= align:
        if n % t == 0:
            return t
        t -= align
    return n


def _compiler_params(n_parallel_axes):
    return pltpu.CompilerParams(
        dimension_semantics=("parallel",) * n_parallel_axes,
        vmem_limit_bytes=_VMEM_LIMIT_BYTES)


# ---------------------------------------------------------------------------
# Pallas kernels
# ---------------------------------------------------------------------------
def _masked_linear_kernel(x_ref, w_ref, b_ref, m_ref, o_ref, *, mxu_dtype):
    """Fuses: x[~nan_mask]=0 -> input_fc -> x[~mask]=0  (mask == nan_mask)."""
    m = m_ref[...]                                       # (rows, 1)
    x = jnp.where(m > 0.0, x_ref[...], 0.0)              # kills NaN rows pre-matmul
    y = jnp.dot(x.astype(mxu_dtype), w_ref[...],
                preferred_element_type=jnp.float32) + b_ref[...]
    o_ref[...] = y * m                                   # zero masked rows post-matmul


def _dilated_taps_matmul(padded, w_ref, b, *, T, K, d, base, mxu_dtype):
    """sum_k padded[base + k*d : base + k*d + T, :] @ w_ref[k] + b (f32 accumulation)."""
    acc = None
    for k in range(K):                                   # K == 3, fully unrolled
        s = base + k * d
        win = padded[s:s + T, :].astype(mxu_dtype)
        part = jnp.dot(win, w_ref[k], preferred_element_type=jnp.float32)
        acc = part if acc is None else acc + part
    return acc + b


def _conv_block_kernel(x_ref, w1_ref, b1_ref, w2_ref, b2_ref, *rest,
                       K, d, off, has_proj, mxu_dtype):
    """Fused CoST/TS2Vec ConvBlock (one batch element per grid step):
       res = proj(x) | x ; y = conv2(gelu(conv1(gelu(x)))) ; out = y + res."""
    if has_proj:
        pw_ref, pb_ref, o_ref, s1_ref, s2_ref = rest
    else:
        o_ref, s1_ref, s2_ref = rest

    x = x_ref[0]                                         # (T, Cin) f32
    T = x.shape[0]

    # Residual branch (fused 1x1 projection or identity).
    if has_proj:
        res = jnp.dot(x.astype(mxu_dtype), pw_ref[...],
                      preferred_element_type=jnp.float32) + pb_ref[...]
    else:
        res = x

    # conv1: GELU -> same-pad dilated conv; zero halo realised in VMEM scratch.
    # gelu(0) == 0, so zero-padding the activated input is exact.
    # TODO(synk): torch F.gelu uses exact erf; tanh-approx used for Mosaic-safe lowering.
    s1_ref[...] = jnp.zeros_like(s1_ref)
    s1_ref[off:off + T, :] = jax.nn.gelu(x, approximate=True)
    h = _dilated_taps_matmul(s1_ref[...], w1_ref, b1_ref[...],
                             T=T, K=K, d=d, base=off - d, mxu_dtype=mxu_dtype)

    # conv2: GELU -> same-pad dilated conv.
    s2_ref[...] = jnp.zeros_like(s2_ref)
    s2_ref[off:off + T, :] = jax.nn.gelu(h, approximate=True)
    h = _dilated_taps_matmul(s2_ref[...], w2_ref, b2_ref[...],
                             T=T, K=K, d=d, base=off - d, mxu_dtype=mxu_dtype)

    o_ref[0] = h + res                                   # fused residual add


def _temporal_block_kernel(x_ref, w1_ref, b1_ref, w2_ref, b2_ref, *rest,
                           K, d, off, has_down, mxu_dtype):
    """Fused locuslab TCN TemporalBlock (eval mode: dropout = identity):
       h = relu(cconv2(relu(cconv1(x)))) ; out = relu(h + downsample(x))."""
    if has_down:
        dw_ref, db_ref, o_ref, s1_ref, s2_ref = rest
    else:
        o_ref, s1_ref, s2_ref = rest

    x = x_ref[0]                                         # (T, Cin) f32
    T = x.shape[0]
    pad = (K - 1) * d                                    # causal left pad (right is chomp'd)

    if has_down:
        res = jnp.dot(x.astype(mxu_dtype), dw_ref[...],
                      preferred_element_type=jnp.float32) + db_ref[...]
    else:
        res = x

    s1_ref[...] = jnp.zeros_like(s1_ref)
    s1_ref[off:off + T, :] = x
    h = _dilated_taps_matmul(s1_ref[...], w1_ref, b1_ref[...],
                             T=T, K=K, d=d, base=off - pad, mxu_dtype=mxu_dtype)
    h = jnp.maximum(h, 0.0)

    s2_ref[...] = jnp.zeros_like(s2_ref)
    s2_ref[off:off + T, :] = h
    h = _dilated_taps_matmul(s2_ref[...], w2_ref, b2_ref[...],
                             T=T, K=K, d=d, base=off - pad, mxu_dtype=mxu_dtype)
    h = jnp.maximum(h, 0.0)

    o_ref[0] = jnp.maximum(h + res, 0.0)                 # fused residual add + relu


def _banded_fourier_kernel(xr_ref, xi_ref, wr_ref, wi_ref, ws_ref, br_ref, bi_ref,
                           or_ref, oi_ref, *, mxu_dtype):
    """Complex matmul for a BLOCK of frequencies (Karatsuba: 3 real matmuls)."""
    xr = xr_ref[...]                                     # (FBLK, B, C) f32
    xi = xi_ref[...]
    xs = (xr + xi).astype(mxu_dtype)
    xr = xr.astype(mxu_dtype)
    xi = xi.astype(mxu_dtype)
    t = jnp.einsum('fbc,fco->fbo', xr, wr_ref[...], preferred_element_type=jnp.float32)
    u = jnp.einsum('fbc,fco->fbo', xi, wi_ref[...], preferred_element_type=jnp.float32)
    v = jnp.einsum('fbc,fco->fbo', xs, ws_ref[...], preferred_element_type=jnp.float32)
    or_ref[...] = (t - u) + br_ref[...]
    oi_ref[...] = (v - t - u) + bi_ref[...]


# ---------------------------------------------------------------------------
# pallas_call wrappers
# ---------------------------------------------------------------------------
def masked_linear(x2d, w, b, m2d, mxu_dtype):
    N, Cin = x2d.shape
    Cout = w.shape[1]
    tile = _largest_tile(N, 1024)                        # row tiling -> pipelined DMA
    kernel = functools.partial(_masked_linear_kernel, mxu_dtype=mxu_dtype)
    return pl.pallas_call(
        kernel,
        grid=(N // tile,),
        in_specs=[pl.BlockSpec((tile, Cin), lambda i: (i, 0)),
                  pl.BlockSpec((Cin, Cout), lambda i: (0, 0)),
                  pl.BlockSpec((1, Cout), lambda i: (0, 0)),
                  pl.BlockSpec((tile, 1), lambda i: (i, 0))],
        out_specs=pl.BlockSpec((tile, Cout), lambda i: (i, 0)),
        out_shape=jax.ShapeDtypeStruct((N, Cout), jnp.float32),
        compiler_params=_compiler_params(1),
    )(x2d, w.astype(mxu_dtype), b.reshape(1, Cout), m2d)


def conv_block(p, x, mxu_dtype):
    """One fused pallas_call per ConvBlock; grid over batch elements."""
    B, T, Cin = x.shape
    K, _, Cout = p['w1'].shape
    d = int(p['dilation'])
    has_proj = p['proj_w'] is not None
    off = _round_up(d, 8)                                # aligned halo offset in scratch

    args = [x,
            p['w1'].astype(mxu_dtype), p['b1'].reshape(1, Cout),
            p['w2'].astype(mxu_dtype), p['b2'].reshape(1, Cout)]
    in_specs = [pl.BlockSpec((1, T, Cin), lambda b: (b, 0, 0)),
                pl.BlockSpec((K, Cin, Cout), lambda b: (0, 0, 0)),
                pl.BlockSpec((1, Cout), lambda b: (0, 0)),
                pl.BlockSpec((K, Cout, Cout), lambda b: (0, 0, 0)),
                pl.BlockSpec((1, Cout), lambda b: (0, 0))]
    if has_proj:
        args += [p['proj_w'].astype(mxu_dtype), p['proj_b'].reshape(1, Cout)]
        in_specs += [pl.BlockSpec((Cin, Cout), lambda b: (0, 0)),
                     pl.BlockSpec((1, Cout), lambda b: (0, 0))]

    kernel = functools.partial(_conv_block_kernel, K=K, d=d, off=off,
                               has_proj=has_proj, mxu_dtype=mxu_dtype)
    return pl.pallas_call(
        kernel,
        grid=(B,),
        in_specs=in_specs,
        out_specs=pl.BlockSpec((1, T, Cout), lambda b: (b, 0, 0)),
        out_shape=jax.ShapeDtypeStruct((B, T, Cout), jnp.float32),
        scratch_shapes=[pltpu.VMEM((off + T + d, Cin), jnp.float32),
                        pltpu.VMEM((off + T + d, Cout), jnp.float32)],
        compiler_params=_compiler_params(1),
    )(*args)


def temporal_block(p, x, mxu_dtype):
    """One fused pallas_call per TemporalBlock; grid over batch elements."""
    B, T, Cin = x.shape
    K, _, Cout = p['w1'].shape
    d = int(p['dilation'])
    has_down = p['down_w'] is not None
    pad = (K - 1) * d
    off = _round_up(pad, 8)

    args = [x,
            p['w1'].astype(mxu_dtype), p['b1'].reshape(1, Cout),
            p['w2'].astype(mxu_dtype), p['b2'].reshape(1, Cout)]
    in_specs = [pl.BlockSpec((1, T, Cin), lambda b: (b, 0, 0)),
                pl.BlockSpec((K, Cin, Cout), lambda b: (0, 0, 0)),
                pl.BlockSpec((1, Cout), lambda b: (0, 0)),
                pl.BlockSpec((K, Cout, Cout), lambda b: (0, 0, 0)),
                pl.BlockSpec((1, Cout), lambda b: (0, 0))]
    if has_down:
        args += [p['down_w'].astype(mxu_dtype), p['down_b'].reshape(1, Cout)]
        in_specs += [pl.BlockSpec((Cin, Cout), lambda b: (0, 0)),
                     pl.BlockSpec((1, Cout), lambda b: (0, 0))]

    kernel = functools.partial(_temporal_block_kernel, K=K, d=d, off=off,
                               has_down=has_down, mxu_dtype=mxu_dtype)
    return pl.pallas_call(
        kernel,
        grid=(B,),
        in_specs=in_specs,
        out_specs=pl.BlockSpec((1, T, Cout), lambda b: (b, 0, 0)),
        out_shape=jax.ShapeDtypeStruct((B, T, Cout), jnp.float32),
        scratch_shapes=[pltpu.VMEM((off + T, Cin), jnp.float32),
                        pltpu.VMEM((off + T, Cout), jnp.float32)],
        compiler_params=_compiler_params(1),
    )(*args)


def banded_fourier(p, x, mxu_dtype):
    """BandedFourierLayer: rfft -> blocked per-frequency complex matmul (Pallas) -> irfft."""
    B, T, C = x.shape
    Cout = p['br'].shape[-1]
    start, end = p['start'], p['end']
    Ftot = T // 2 + 1
    Fb = end - start

    xf = jnp.fft.rfft(x, axis=1)                         # plain-JAX FFT (no Pallas FFT)
    xb = xf[:, start:end, :]                             # (B, Fb, C)
    xr = jnp.real(xb).transpose(1, 0, 2).astype(jnp.float32)   # (Fb, B, C)  freq-major
    xi = jnp.imag(xb).transpose(1, 0, 2).astype(jnp.float32)

    wr = p['wr'].astype(mxu_dtype)
    wi = p['wi'].astype(mxu_dtype)
    ws = (p['wr'] + p['wi']).astype(mxu_dtype)           # precomputed for Karatsuba form
    br = p['br'].reshape(Fb, 1, Cout)
    bi = p['bi'].reshape(Fb, 1, Cout)

    fblk = _largest_tile(Fb, 16, align=1)                # block of frequencies per step
    kernel = functools.partial(_banded_fourier_kernel, mxu_dtype=mxu_dtype)
    or_, oi_ = pl.pallas_call(
        kernel,
        grid=(Fb // fblk,),
        in_specs=[pl.BlockSpec((fblk, B, C), lambda f: (f, 0, 0)),
                  pl.BlockSpec((fblk, B, C), lambda f: (f, 0, 0)),
                  pl.BlockSpec((fblk, C, Cout), lambda f: (f, 0, 0)),
                  pl.BlockSpec((fblk, C, Cout), lambda f: (f, 0, 0)),
                  pl.BlockSpec((fblk, C, Cout), lambda f: (f, 0, 0)),
                  pl.BlockSpec((fblk, 1, Cout), lambda f: (f, 0, 0)),
                  pl.BlockSpec((fblk, 1, Cout), lambda f: (f, 0, 0))],
        out_specs=[pl.BlockSpec((fblk, B, Cout), lambda f: (f, 0, 0)),
                   pl.BlockSpec((fblk, B, Cout), lambda f: (f, 0, 0))],
        out_shape=[jax.ShapeDtypeStruct((Fb, B, Cout), jnp.float32),
                   jax.ShapeDtypeStruct((Fb, B, Cout), jnp.float32)],
        compiler_params=_compiler_params(1),
    )(xr, xi, wr, wi, ws, br, bi)

    ob = (or_ + 1j * oi_).transpose(1, 0, 2)             # (B, Fb, Cout) complex64
    out_fft = jnp.zeros((B, Ftot, Cout), dtype=ob.dtype)
    out_fft = out_fft.at[:, start:end, :].set(ob)
    return jnp.fft.irfft(out_fft, n=T, axis=1)


# ---------------------------------------------------------------------------
# Model forward
# ---------------------------------------------------------------------------
def cost_tcn_encoder_forward(params, x, tcn_output=False, mxu_dtype=_MXU_DTYPE):
    """x: (B, T, input_dims) float32.  mask='all_true', eval mode."""
    B, T, Din = x.shape
    nan_mask = ~jnp.any(jnp.isnan(x), axis=-1)           # (B, T); all_true & nan_mask
    m = nan_mask.astype(jnp.float32).reshape(B * T, 1)

    h = masked_linear(x.reshape(B * T, Din),
                      params['input_fc']['w'], params['input_fc']['b'], m, mxu_dtype)
    h = h.reshape(B, T, -1)                              # (B, T, hidden)
    dados_tcn = h

    z = h
    for blk in params['feature_extractor']:
        z = conv_block(blk, z, mxu_dtype)
    repr_full = z                                        # (B, T, output_dims)
    if tcn_output:
        return repr_full

    t = dados_tcn
    for blk in params['tcn']:
        t = temporal_block(blk, t, mxu_dtype)
    trend = t                                            # mean over a 1-element list == itself

    season = banded_fourier(params['sfd'], repr_full, mxu_dtype)
    # repr_dropout (p=0.1) is identity in eval mode.
    return trend, season


# ---------------------------------------------------------------------------
# Pure-JAX reference (no Pallas) — structural correctness check only
# ---------------------------------------------------------------------------
def _reference_forward(params, x):
    HI = jax.lax.Precision.HIGHEST
    B, T, _ = x.shape

    nan_mask = ~jnp.any(jnp.isnan(x), axis=-1)
    m = nan_mask.astype(jnp.float32)[..., None]
    xz = jnp.where(m > 0.0, x, 0.0)
    h = (jnp.einsum('btc,cd->btd', xz, params['input_fc']['w'], precision=HI)
         + params['input_fc']['b']) * m
    dados_tcn = h

    def conv(v, w, b, d, pad_l, pad_r):
        K = w.shape[0]
        vp = jnp.pad(v, ((0, 0), (pad_l, pad_r), (0, 0)))
        acc = None
        for k in range(K):
            part = jnp.einsum('btc,co->bto',
                              vp[:, k * d:k * d + v.shape[1], :], w[k], precision=HI)
            acc = part if acc is None else acc + part
        return acc + b

    z = h
    for p in params['feature_extractor']:
        d = p['dilation']
        res = z if p['proj_w'] is None else (
            jnp.einsum('btc,co->bto', z, p['proj_w'], precision=HI) + p['proj_b'])
        a = jax.nn.gelu(z, approximate=True)
        a = conv(a, p['w1'], p['b1'], d, d, d)
        a = jax.nn.gelu(a, approximate=True)
        a = conv(a, p['w2'], p['b2'], d, d, d)
        z = a + res
    repr_full = z

    t = dados_tcn
    for p in params['tcn']:
        d = p['dilation']
        a = jnp.maximum(conv(t, p['w1'], p['b1'], d, 2 * d, 0), 0.0)
        a = jnp.maximum(conv(a, p['w2'], p['b2'], d, 2 * d, 0), 0.0)
        res = t if p['down_w'] is None else (
            jnp.einsum('btc,co->bto', t, p['down_w'], precision=HI) + p['down_b'])
        t = jnp.maximum(a + res, 0.0)
    trend = t

    sp = params['sfd']
    Cout = sp['br'].shape[-1]
    xf = jnp.fft.rfft(repr_full, axis=1)[:, sp['start']:sp['end'], :]
    wc = (sp['wr'] + 1j * sp['wi']).astype(jnp.complex64)
    bc = sp['br'] + 1j * sp['bi']
    ob = jnp.einsum('bfc,fco->bfo', xf, wc, precision=HI) + bc
    out_fft = jnp.zeros((B, T // 2 + 1, Cout), jnp.complex64)
    out_fft = out_fft.at[:, sp['start']:sp['end'], :].set(ob)
    season = jnp.fft.irfft(out_fft, n=T, axis=1)
    return trend, season


# ---------------------------------------------------------------------------
# Deterministic parameter initialization
# ---------------------------------------------------------------------------
def init_params(key, *, input_dims, output_dims, hidden_dims, depth, length):
    component_dims = output_dims // 2
    keys = iter(jax.random.split(key, 256))

    def unif(shape, fan_in):
        bound = 1.0 / math.sqrt(fan_in) if fan_in > 0 else 0.0
        return jax.random.uniform(next(keys), shape, jnp.float32, -bound, bound)

    params = {'input_fc': {'w': unif((input_dims, hidden_dims), input_dims),
                           'b': unif((hidden_dims,), input_dims)}}

    # DilatedConvEncoder(hidden, [hidden]*depth + [output_dims], kernel_size=3)
    channels = [hidden_dims] * depth + [output_dims]
    fe = []
    for i, cout in enumerate(channels):
        cin = hidden_dims if i == 0 else channels[i - 1]
        final = (i == len(channels) - 1)
        blk = {'dilation': 2 ** i,
               'w1': unif((3, cin, cout), cin * 3), 'b1': unif((cout,), cin * 3),
               'w2': unif((3, cout, cout), cout * 3), 'b2': unif((cout,), cout * 3),
               'proj_w': None, 'proj_b': None}
        if cin != cout or final:
            blk['proj_w'] = unif((cin, cout), cin)
            blk['proj_b'] = unif((cout,), cin)
        fe.append(blk)
    params['feature_extractor'] = fe

    # TemporalConvNet(hidden, [hidden]*depth + [component_dims], kernel_size=3)
    tch = [hidden_dims] * depth + [component_dims]
    tcn = []
    for i, cout in enumerate(tch):
        cin = hidden_dims if i == 0 else tch[i - 1]
        blk = {'dilation': 2 ** i,
               'w1': unif((3, cin, cout), cin * 3), 'b1': unif((cout,), cin * 3),
               'w2': unif((3, cout, cout), cout * 3), 'b2': unif((cout,), cout * 3),
               'down_w': None, 'down_b': None}
        if cin != cout:
            blk['down_w'] = unif((cin, cout), cin)
            blk['down_b'] = unif((cout,), cin)
        tcn.append(blk)
    params['tcn'] = tcn

    # BandedFourierLayer(output_dims, component_dims, band=0, num_bands=1, length)
    total_freqs = length // 2 + 1
    num_bands, band = 1, 0
    num_freqs = total_freqs // num_bands + (total_freqs % num_bands
                                            if band == num_bands - 1 else 0)
    start = band * (total_freqs // num_bands)
    params['sfd'] = {
        'start': start, 'end': start + num_freqs,
        'wr': unif((num_freqs, output_dims, component_dims), output_dims),
        'wi': unif((num_freqs, output_dims, component_dims), output_dims),
        'br': unif((num_freqs, component_dims), output_dims),
        'bi': unif((num_freqs, component_dims), output_dims),
    }
    return params


# ---------------------------------------------------------------------------
if __name__ == "__main__":
    key = jax.random.PRNGKey(0)
    kx, kp = jax.random.split(key)

    B, T = 2, 16
    input_dims, output_dims, hidden_dims, depth = 4, 8, 16, 2
    component_dims = output_dims // 2

    x = jax.random.normal(kx, (B, T, input_dims), jnp.float32)
    params = init_params(kp, input_dims=input_dims, output_dims=output_dims,
                         hidden_dims=hidden_dims, depth=depth, length=T)

    # Production path: bf16 MXU operands, f32 accumulation / element-wise math.
    fwd = jax.jit(functools.partial(cost_tcn_encoder_forward, params))
    trend, season = jax.block_until_ready(fwd(x))

    assert trend.shape == (B, T, component_dims), trend.shape
    assert season.shape == (B, T, component_dims), season.shape
    assert bool(jnp.all(jnp.isfinite(trend))) and bool(jnp.all(jnp.isfinite(season)))

    # Structural sanity check: f32 MXU path vs a pure-JAX/XLA reference.
    fwd_f32 = jax.jit(functools.partial(cost_tcn_encoder_forward, params,
                                        mxu_dtype=jnp.float32))
    t32, s32 = jax.block_until_ready(fwd_f32(x))
    rt, rs = _reference_forward(params, x)
    err = max(float(jnp.max(jnp.abs(t32 - rt))), float(jnp.max(jnp.abs(s32 - rs))))
    assert err < 1e-1, f"Pallas output mismatches JAX reference (max abs err {err})"

    print("KERNEL_OK")
</pallas_src>

<mosaic_0001>
module attributes {stable_mosaic.version = 11 : i64} {
  func.func @_temporal_block_kernel(%arg0: i32, %arg1: memref<1x16x16xf32, #tpu.memory_space<vmem>>, %arg2: memref<3x16x16xbf16, #tpu.memory_space<vmem>>, %arg3: memref<1x16xf32, #tpu.memory_space<vmem>>, %arg4: memref<3x16x16xbf16, #tpu.memory_space<vmem>>, %arg5: memref<1x16xf32, #tpu.memory_space<vmem>>, %arg6: memref<1x16x16xf32, #tpu.memory_space<vmem>>, %arg7: memref<24x16xf32, #tpu.memory_space<vmem>>, %arg8: memref<24x16xf32, #tpu.memory_space<vmem>>) attributes {dimension_semantics = [#tpu.dimension_semantics<parallel>], iteration_bounds = array<i64: 2>, scalar_prefetch = 0 : i64, scratch_operands = 2 : i64, tpu.core_type = #tpu.core_type<tc>, window_params = [{transform_indices = @transform_0, window_bounds = array<i64: 1, 16, 16>}, {pipeline_mode = #tpu.pipeline_mode<synchronous>, transform_indices = @transform_1, window_bounds = array<i64: 3, 16, 16>}, {pipeline_mode = #tpu.pipeline_mode<synchronous>, transform_indices = @transform_2, window_bounds = array<i64: 1, 16>}, {pipeline_mode = #tpu.pipeline_mode<synchronous>, transform_indices = @transform_3, window_bounds = array<i64: 3, 16, 16>}, {pipeline_mode = #tpu.pipeline_mode<synchronous>, transform_indices = @transform_4, window_bounds = array<i64: 1, 16>}, {transform_indices = @transform_5, window_bounds = array<i64: 1, 16, 16>}]} {
    %c0 = arith.constant 0 : index
    %c0_0 = arith.constant 0 : index
    %c0_1 = arith.constant 0 : index
    %0 = vector.load %arg1[%c0, %c0_0, %c0_1] : memref<1x16x16xf32, #tpu.memory_space<vmem>>, vector<1x16x16xf32>
    %1 = vector.shape_cast %0 : vector<1x16x16xf32> to vector<16x16xf32>
    %cst = arith.constant 0.000000e+00 : f32
    %2 = vector.broadcast %cst : f32 to vector<24x16xf32>
    %c0_2 = arith.constant 0 : index
    %c0_3 = arith.constant 0 : index
    %3 = vector.load %arg7[%c0_2, %c0_3] : memref<24x16xf32, #tpu.memory_space<vmem>>, vector<24x16xf32>
    tpu.vector_store %arg7[%c0_2, %c0_3], %2 {strides = array<i32>} : memref<24x16xf32, #tpu.memory_space<vmem>>, vector<24x16xf32>,
    %c8 = arith.constant 8 : index
    %c0_4 = arith.constant 0 : index
    %4 = vector.load %arg7[%c8, %c0_4] : memref<24x16xf32, #tpu.memory_space<vmem>>, vector<16x16xf32>
    tpu.vector_store %arg7[%c8, %c0_4], %1 {strides = array<i32>} : memref<24x16xf32, #tpu.memory_space<vmem>>, vector<16x16xf32>,
    %c0_5 = arith.constant 0 : index
    %c0_6 = arith.constant 0 : index
    %5 = vector.load %arg7[%c0_5, %c0_6] : memref<24x16xf32, #tpu.memory_space<vmem>>, vector<24x16xf32>
    %c0_7 = arith.constant 0 : index
    %c0_8 = arith.constant 0 : index
    %6 = vector.load %arg3[%c0_7, %c0_8] : memref<1x16xf32, #tpu.memory_space<vmem>>, vector<1x16xf32>
    %7 = vector.extract_strided_slice %5 {offsets = [6, 0], sizes = [16, 16], strides = [1, 1]} : vector<24x16xf32> to vector<16x16xf32>
    %8 = arith.truncf %7 : vector<16x16xf32> to vector<16x16xbf16>
    %c0_9 = arith.constant 0 : index
    %c0_10 = arith.constant 0 : index
    %c0_11 = arith.constant 0 : index
    %9 = vector.load %arg2[%c0_9, %c0_10, %c0_11] : memref<3x16x16xbf16, #tpu.memory_space<vmem>>, vector<1x16x16xbf16>
    %10 = vector.shape_cast %9 : vector<1x16x16xbf16> to vector<16x16xbf16>
    %cst_12 = arith.constant dense<0.000000e+00> : vector<16x16xf32>
    %11 = tpu.matmul %8, %10, %cst_12 {dimension_numbers = #tpu.dot_dimension_numbers<[1], [0], [0], [1], [0, 0, 1, 1], [], []>} : vector<16x16xbf16>, vector<16x16xbf16>, vector<16x16xf32> -> vector<16x16xf32>
    %12 = vector.extract_strided_slice %5 {offsets = [7, 0], sizes = [16, 16], strides = [1, 1]} : vector<24x16xf32> to vector<16x16xf32>
    %13 = arith.truncf %12 : vector<16x16xf32> to vector<16x16xbf16>
    %c1 = arith.constant 1 : index
    %c0_13 = arith.constant 0 : index
    %c0_14 = arith.constant 0 : index
    %14 = vector.load %arg2[%c1, %c0_13, %c0_14] : memref<3x16x16xbf16, #tpu.memory_space<vmem>>, vector<1x16x16xbf16>
    %15 = vector.shape_cast %14 : vector<1x16x16xbf16> to vector<16x16xbf16>
    %cst_15 = arith.constant dense<0.000000e+00> : vector<16x16xf32>
    %16 = tpu.matmul %13, %15, %cst_15 {dimension_numbers = #tpu.dot_dimension_numbers<[1], [0], [0], [1], [0, 0, 1, 1], [], []>} : vector<16x16xbf16>, vector<16x16xbf16>, vector<16x16xf32> -> vector<16x16xf32>
    %17 = arith.addf %11, %16 : vector<16x16xf32>
    %18 = vector.extract_strided_slice %5 {offsets = [8, 0], sizes = [16, 16], strides = [1, 1]} : vector<24x16xf32> to vector<16x16xf32>
    %19 = arith.truncf %18 : vector<16x16xf32> to vector<16x16xbf16>
    %c2 = arith.constant 2 : index
    %c0_16 = arith.constant 0 : index
    %c0_17 = arith.constant 0 : index
    %20 = vector.load %arg2[%c2, %c0_16, %c0_17] : memref<3x16x16xbf16, #tpu.memory_space<vmem>>, vector<1x16x16xbf16>
    %21 = vector.shape_cast %20 : vector<1x16x16xbf16> to vector<16x16xbf16>
    %cst_18 = arith.constant dense<0.000000e+00> : vector<16x16xf32>
    %22 = tpu.matmul %19, %21, %cst_18 {dimension_numbers = #tpu.dot_dimension_numbers<[1], [0], [0], [1], [0, 0, 1, 1], [], []>} : vector<16x16xbf16>, vector<16x16xbf16>, vector<16x16xf32> -> vector<16x16xf32>
    %23 = arith.addf %17, %22 : vector<16x16xf32>
    %24 = vector.broadcast %6 : vector<1x16xf32> to vector<16x16xf32>
    %25 = arith.addf %23, %24 : vector<16x16xf32>
    %cst_19 = arith.constant 0.000000e+00 : f32
    %26 = vector.broadcast %cst_19 : f32 to vector<16x16xf32>
    %27 = arith.maximumf %25, %26 : vector<16x16xf32>
    %cst_20 = arith.constant 0.000000e+00 : f32
    %28 = vector.broadcast %cst_20 : f32 to vector<24x16xf32>
    %c0_21 = arith.constant 0 : index
    %c0_22 = arith.constant 0 : index
    %29 = vector.load %arg8[%c0_21, %c0_22] : memref<24x16xf32, #tpu.memory_space<vmem>>, vector<24x16xf32>
    tpu.vector_store %arg8[%c0_21, %c0_22], %28 {strides = array<i32>} : memref<24x16xf32, #tpu.memory_space<vmem>>, vector<24x16xf32>,
    %c8_23 = arith.constant 8 : index
    %c0_24 = arith.constant 0 : index
    %30 = vector.load %arg8[%c8_23, %c0_24] : memref<24x16xf32, #tpu.memory_space<vmem>>, vector<16x16xf32>
    tpu.vector_store %arg8[%c8_23, %c0_24], %27 {strides = array<i32>} : memref<24x16xf32, #tpu.memory_space<vmem>>, vector<16x16xf32>,
    %c0_25 = arith.constant 0 : index
    %c0_26 = arith.constant 0 : index
    %31 = vector.load %arg8[%c0_25, %c0_26] : memref<24x16xf32, #tpu.memory_space<vmem>>, vector<24x16xf32>
    %c0_27 = arith.constant 0 : index
    %c0_28 = arith.constant 0 : index
    %32 = vector.load %arg5[%c0_27, %c0_28] : memref<1x16xf32, #tpu.memory_space<vmem>>, vector<1x16xf32>
    %33 = vector.extract_strided_slice %31 {offsets = [6, 0], sizes = [16, 16], strides = [1, 1]} : vector<24x16xf32> to vector<16x16xf32>
    %34 = arith.truncf %33 : vector<16x16xf32> to vector<16x16xbf16>
    %c0_29 = arith.constant 0 : index
    %c0_30 = arith.constant 0 : index
    %c0_31 = arith.constant 0 : index
    %35 = vector.load %arg4[%c0_29, %c0_30, %c0_31] : memref<3x16x16xbf16, #tpu.memory_space<vmem>>, vector<1x16x16xbf16>
    %36 = vector.shape_cast %35 : vector<1x16x16xbf16> to vector<16x16xbf16>
    %cst_32 = arith.constant dense<0.000000e+00> : vector<16x16xf32>
    %37 = tpu.matmul %34, %36, %cst_32 {dimension_numbers = #tpu.dot_dimension_numbers<[1], [0], [0], [1], [0, 0, 1, 1], [], []>} : vector<16x16xbf16>, vector<16x16xbf16>, vector<16x16xf32> -> vector<16x16xf32>
    %38 = vector.extract_strided_slice %31 {offsets = [7, 0], sizes = [16, 16], strides = [1, 1]} : vector<24x16xf32> to vector<16x16xf32>
    %39 = arith.truncf %38 : vector<16x16xf32> to vector<16x16xbf16>
    %c1_33 = arith.constant 1 : index
    %c0_34 = arith.constant 0 : index
    %c0_35 = arith.constant 0 : index
    %40 = vector.load %arg4[%c1_33, %c0_34, %c0_35] : memref<3x16x16xbf16, #tpu.memory_space<vmem>>, vector<1x16x16xbf16>
    %41 = vector.shape_cast %40 : vector<1x16x16xbf16> to vector<16x16xbf16>
    %cst_36 = arith.constant dense<0.000000e+00> : vector<16x16xf32>
    %42 = tpu.matmul %39, %41, %cst_36 {dimension_numbers = #tpu.dot_dimension_numbers<[1], [0], [0], [1], [0, 0, 1, 1], [], []>} : vector<16x16xbf16>, vector<16x16xbf16>, vector<16x16xf32> -> vector<16x16xf32>
    %43 = arith.addf %37, %42 : vector<16x16xf32>
    %44 = vector.extract_strided_slice %31 {offsets = [8, 0], sizes = [16, 16], strides = [1, 1]} : vector<24x16xf32> to vector<16x16xf32>
    %45 = arith.truncf %44 : vector<16x16xf32> to vector<16x16xbf16>
    %c2_37 = arith.constant 2 : index
    %c0_38 = arith.constant 0 : index
    %c0_39 = arith.constant 0 : index
    %46 = vector.load %arg4[%c2_37, %c0_38, %c0_39] : memref<3x16x16xbf16, #tpu.memory_space<vmem>>, vector<1x16x16xbf16>
    %47 = vector.shape_cast %46 : vector<1x16x16xbf16> to vector<16x16xbf16>
    %cst_40 = arith.constant dense<0.000000e+00> : vector<16x16xf32>
    %48 = tpu.matmul %45, %47, %cst_40 {dimension_numbers = #tpu.dot_dimension_numbers<[1], [0], [0], [1], [0, 0, 1, 1], [], []>} : vector<16x16xbf16>, vector<16x16xbf16>, vector<16x16xf32> -> vector<16x16xf32>
    %49 = arith.addf %43, %48 : vector<16x16xf32>
    %50 = vector.broadcast %32 : vector<1x16xf32> to vector<16x16xf32>
    %51 = arith.addf %49, %50 : vector<16x16xf32>
    %cst_41 = arith.constant 0.000000e+00 : f32
    %52 = vector.broadcast %cst_41 : f32 to vector<16x16xf32>
    %53 = arith.maximumf %51, %52 : vector<16x16xf32>
    %54 = arith.addf %53, %1 : vector<16x16xf32>
    %cst_42 = arith.constant 0.000000e+00 : f32
    %55 = vector.broadcast %cst_42 : f32 to vector<16x16xf32>
    %56 = arith.maximumf %54, %55 : vector<16x16xf32>
    %c0_43 = arith.constant 0 : index
    %c0_44 = arith.constant 0 : index
    %c0_45 = arith.constant 0 : index
    %57 = vector.load %arg6[%c0_43, %c0_44, %c0_45] : memref<1x16x16xf32, #tpu.memory_space<vmem>>, vector<1x16x16xf32>
    %58 = vector.shape_cast %57 : vector<1x16x16xf32> to vector<16x16xf32>
    %59 = vector.shape_cast %56 : vector<16x16xf32> to vector<1x16x16xf32>
    tpu.vector_store %arg6[%c0_43, %c0_44, %c0_45], %59 {strides = array<i32>} : memref<1x16x16xf32, #tpu.memory_space<vmem>>, vector<1x16x16xf32>,
    return
  }
  func.func @transform_0(%arg0: i32) -> (i32, i32, i32) {
    %c0_i32 = arith.constant 0 : i32
    %c0_i32_0 = arith.constant 0 : i32
    %c0_i32_1 = arith.constant 0 : i32
    return %arg0, %c0_i32, %c0_i32_0 : i32, i32, i32
  }
  func.func @transform_1(%arg0: i32) -> (i32, i32, i32) {
    %c0_i32 = arith.constant 0 : i32
    %c0_i32_0 = arith.constant 0 : i32
    %c0_i32_1 = arith.constant 0 : i32
    %c0_i32_2 = arith.constant 0 : i32
    return %c0_i32, %c0_i32_0, %c0_i32_1 : i32, i32, i32
  }
  func.func @transform_2(%arg0: i32) -> (i32, i32) {
    %c0_i32 = arith.constant 0 : i32
    %c0_i32_0 = arith.constant 0 : i32
    %c0_i32_1 = arith.constant 0 : i32
    return %c0_i32, %c0_i32_0 : i32, i32
  }
  func.func @transform_3(%arg0: i32) -> (i32, i32, i32) {
    %c0_i32 = arith.constant 0 : i32
    %c0_i32_0 = arith.constant 0 : i32
    %c0_i32_1 = arith.constant 0 : i32
    %c0_i32_2 = arith.constant 0 : i32
    return %c0_i32, %c0_i32_0, %c0_i32_1 : i32, i32, i32
  }
  func.func @transform_4(%arg0: i32) -> (i32, i32) {
    %c0_i32 = arith.constant 0 : i32
    %c0_i32_0 = arith.constant 0 : i32
    %c0_i32_1 = arith.constant 0 : i32
    return %c0_i32, %c0_i32_0 : i32, i32
  }
  func.func @transform_5(%arg0: i32) -> (i32, i32, i32) {
    %c0_i32 = arith.constant 0 : i32
    %c0_i32_0 = arith.constant 0 : i32
    %c0_i32_1 = arith.constant 0 : i32
    return %arg0, %c0_i32, %c0_i32_0 : i32, i32, i32
  }
}

module attributes {stable_mosaic.version = 11 : i64} {
  func.func @_temporal_block_kernel(%arg0: i32, %arg1: memref<1x16x16xf32, #tpu.memory_space<vmem>>, %arg2: memref<3x16x16xbf16, #tpu.memory_space<vmem>>, %arg3: memref<1x16xf32, #tpu.memory_space<vmem>>, %arg4: memref<3x16x16xbf16, #tpu.memory_space<vmem>>, %arg5: memref<1x16xf32, #tpu.memory_space<vmem>>, %arg6: memref<1x16x16xf32, #tpu.memory_space<vmem>>, %arg7: memref<24x16xf32, #tpu.memory_space<vmem>>, %arg8: memref<24x16xf32, #tpu.memory_space<vmem>>) attributes {dimension_semantics = [#tpu.dimension_semantics<parallel>], iteration_bounds = array<i64: 2>, scalar_prefetch = 0 : i64, scratch_operands = 2 : i64, tpu.core_type = #tpu.core_type<tc>, window_params = [{transform_indices = @transform_0, window_bounds = array<i64: 1, 16, 16>}, {pipeline_mode = #tpu.pipeline_mode<synchronous>, transform_indices = @transform_1, window_bounds = array<i64: 3, 16, 16>}, {pipeline_mode = #tpu.pipeline_mode<synchronous>, transform_indices = @transform_2, window_bounds = array<i64: 1, 16>}, {pipeline_mode = #tpu.pipeline_mode<synchronous>, transform_indices = @transform_3, window_bounds = array<i64: 3, 16, 16>}, {pipeline_mode = #tpu.pipeline_mode<synchronous>, transform_indices = @transform_4, window_bounds = array<i64: 1, 16>}, {transform_indices = @transform_5, window_bounds = array<i64: 1, 16, 16>}]} {
    %c0 = arith.constant 0 : index
    %c0_0 = arith.constant 0 : index
    %c0_1 = arith.constant 0 : index
    %0 = vector.load %arg1[%c0, %c0_0, %c0_1] : memref<1x16x16xf32, #tpu.memory_space<vmem>>, vector<1x16x16xf32>
    %1 = vector.shape_cast %0 : vector<1x16x16xf32> to vector<16x16xf32>
    %cst = arith.constant 0.000000e+00 : f32
    %2 = vector.broadcast %cst : f32 to vector<24x16xf32>
    %c0_2 = arith.constant 0 : index
    %c0_3 = arith.constant 0 : index
    %3 = vector.load %arg7[%c0_2, %c0_3] : memref<24x16xf32, #tpu.memory_space<vmem>>, vector<24x16xf32>
    tpu.vector_store %arg7[%c0_2, %c0_3], %2 {strides = array<i32>} : memref<24x16xf32, #tpu.memory_space<vmem>>, vector<24x16xf32>,
    %c8 = arith.constant 8 : index
    %c0_4 = arith.constant 0 : index
    %4 = vector.load %arg7[%c8, %c0_4] : memref<24x16xf32, #tpu.memory_space<vmem>>, vector<16x16xf32>
    tpu.vector_store %arg7[%c8, %c0_4], %1 {strides = array<i32>} : memref<24x16xf32, #tpu.memory_space<vmem>>, vector<16x16xf32>,
    %c0_5 = arith.constant 0 : index
    %c0_6 = arith.constant 0 : index
    %5 = vector.load %arg7[%c0_5, %c0_6] : memref<24x16xf32, #tpu.memory_space<vmem>>, vector<24x16xf32>
    %c0_7 = arith.constant 0 : index
    %c0_8 = arith.constant 0 : index
    %6 = vector.load %arg3[%c0_7, %c0_8] : memref<1x16xf32, #tpu.memory_space<vmem>>, vector<1x16xf32>
    %7 = vector.extract_strided_slice %5 {offsets = [4, 0], sizes = [16, 16], strides = [1, 1]} : vector<24x16xf32> to vector<16x16xf32>
    %8 = arith.truncf %7 : vector<16x16xf32> to vector<16x16xbf16>
    %c0_9 = arith.constant 0 : index
    %c0_10 = arith.constant 0 : index
    %c0_11 = arith.constant 0 : index
    %9 = vector.load %arg2[%c0_9, %c0_10, %c0_11] : memref<3x16x16xbf16, #tpu.memory_space<vmem>>, vector<1x16x16xbf16>
    %10 = vector.shape_cast %9 : vector<1x16x16xbf16> to vector<16x16xbf16>
    %cst_12 = arith.constant dense<0.000000e+00> : vector<16x16xf32>
    %11 = tpu.matmul %8, %10, %cst_12 {dimension_numbers = #tpu.dot_dimension_numbers<[1], [0], [0], [1], [0, 0, 1, 1], [], []>} : vector<16x16xbf16>, vector<16x16xbf16>, vector<16x16xf32> -> vector<16x16xf32>
    %12 = vector.extract_strided_slice %5 {offsets = [6, 0], sizes = [16, 16], strides = [1, 1]} : vector<24x16xf32> to vector<16x16xf32>
    %13 = arith.truncf %12 : vector<16x16xf32> to vector<16x16xbf16>
    %c1 = arith.constant 1 : index
    %c0_13 = arith.constant 0 : index
    %c0_14 = arith.constant 0 : index
    %14 = vector.load %arg2[%c1, %c0_13, %c0_14] : memref<3x16x16xbf16, #tpu.memory_space<vmem>>, vector<1x16x16xbf16>
    %15 = vector.shape_cast %14 : vector<1x16x16xbf16> to vector<16x16xbf16>
    %cst_15 = arith.constant dense<0.000000e+00> : vector<16x16xf32>
    %16 = tpu.matmul %13, %15, %cst_15 {dimension_numbers = #tpu.dot_dimension_numbers<[1], [0], [0], [1], [0, 0, 1, 1], [], []>} : vector<16x16xbf16>, vector<16x16xbf16>, vector<16x16xf32> -> vector<16x16xf32>
    %17 = arith.addf %11, %16 : vector<16x16xf32>
    %18 = vector.extract_strided_slice %5 {offsets = [8, 0], sizes = [16, 16], strides = [1, 1]} : vector<24x16xf32> to vector<16x16xf32>
    %19 = arith.truncf %18 : vector<16x16xf32> to vector<16x16xbf16>
    %c2 = arith.constant 2 : index
    %c0_16 = arith.constant 0 : index
    %c0_17 = arith.constant 0 : index
    %20 = vector.load %arg2[%c2, %c0_16, %c0_17] : memref<3x16x16xbf16, #tpu.memory_space<vmem>>, vector<1x16x16xbf16>
    %21 = vector.shape_cast %20 : vector<1x16x16xbf16> to vector<16x16xbf16>
    %cst_18 = arith.constant dense<0.000000e+00> : vector<16x16xf32>
    %22 = tpu.matmul %19, %21, %cst_18 {dimension_numbers = #tpu.dot_dimension_numbers<[1], [0], [0], [1], [0, 0, 1, 1], [], []>} : vector<16x16xbf16>, vector<16x16xbf16>, vector<16x16xf32> -> vector<16x16xf32>
    %23 = arith.addf %17, %22 : vector<16x16xf32>
    %24 = vector.broadcast %6 : vector<1x16xf32> to vector<16x16xf32>
    %25 = arith.addf %23, %24 : vector<16x16xf32>
    %cst_19 = arith.constant 0.000000e+00 : f32
    %26 = vector.broadcast %cst_19 : f32 to vector<16x16xf32>
    %27 = arith.maximumf %25, %26 : vector<16x16xf32>
    %cst_20 = arith.constant 0.000000e+00 : f32
    %28 = vector.broadcast %cst_20 : f32 to vector<24x16xf32>
    %c0_21 = arith.constant 0 : index
    %c0_22 = arith.constant 0 : index
    %29 = vector.load %arg8[%c0_21, %c0_22] : memref<24x16xf32, #tpu.memory_space<vmem>>, vector<24x16xf32>
    tpu.vector_store %arg8[%c0_21, %c0_22], %28 {strides = array<i32>} : memref<24x16xf32, #tpu.memory_space<vmem>>, vector<24x16xf32>,
    %c8_23 = arith.constant 8 : index
    %c0_24 = arith.constant 0 : index
    %30 = vector.load %arg8[%c8_23, %c0_24] : memref<24x16xf32, #tpu.memory_space<vmem>>, vector<16x16xf32>
    tpu.vector_store %arg8[%c8_23, %c0_24], %27 {strides = array<i32>} : memref<24x16xf32, #tpu.memory_space<vmem>>, vector<16x16xf32>,
    %c0_25 = arith.constant 0 : index
    %c0_26 = arith.constant 0 : index
    %31 = vector.load %arg8[%c0_25, %c0_26] : memref<24x16xf32, #tpu.memory_space<vmem>>, vector<24x16xf32>
    %c0_27 = arith.constant 0 : index
    %c0_28 = arith.constant 0 : index
    %32 = vector.load %arg5[%c0_27, %c0_28] : memref<1x16xf32, #tpu.memory_space<vmem>>, vector<1x16xf32>
    %33 = vector.extract_strided_slice %31 {offsets = [4, 0], sizes = [16, 16], strides = [1, 1]} : vector<24x16xf32> to vector<16x16xf32>
    %34 = arith.truncf %33 : vector<16x16xf32> to vector<16x16xbf16>
    %c0_29 = arith.constant 0 : index
    %c0_30 = arith.constant 0 : index
    %c0_31 = arith.constant 0 : index
    %35 = vector.load %arg4[%c0_29, %c0_30, %c0_31] : memref<3x16x16xbf16, #tpu.memory_space<vmem>>, vector<1x16x16xbf16>
    %36 = vector.shape_cast %35 : vector<1x16x16xbf16> to vector<16x16xbf16>
    %cst_32 = arith.constant dense<0.000000e+00> : vector<16x16xf32>
    %37 = tpu.matmul %34, %36, %cst_32 {dimension_numbers = #tpu.dot_dimension_numbers<[1], [0], [0], [1], [0, 0, 1, 1], [], []>} : vector<16x16xbf16>, vector<16x16xbf16>, vector<16x16xf32> -> vector<16x16xf32>
    %38 = vector.extract_strided_slice %31 {offsets = [6, 0], sizes = [16, 16], strides = [1, 1]} : vector<24x16xf32> to vector<16x16xf32>
    %39 = arith.truncf %38 : vector<16x16xf32> to vector<16x16xbf16>
    %c1_33 = arith.constant 1 : index
    %c0_34 = arith.constant 0 : index
    %c0_35 = arith.constant 0 : index
    %40 = vector.load %arg4[%c1_33, %c0_34, %c0_35] : memref<3x16x16xbf16, #tpu.memory_space<vmem>>, vector<1x16x16xbf16>
    %41 = vector.shape_cast %40 : vector<1x16x16xbf16> to vector<16x16xbf16>
    %cst_36 = arith.constant dense<0.000000e+00> : vector<16x16xf32>
    %42 = tpu.matmul %39, %41, %cst_36 {dimension_numbers = #tpu.dot_dimension_numbers<[1], [0], [0], [1], [0, 0, 1, 1], [], []>} : vector<16x16xbf16>, vector<16x16xbf16>, vector<16x16xf32> -> vector<16x16xf32>
    %43 = arith.addf %37, %42 : vector<16x16xf32>
    %44 = vector.extract_strided_slice %31 {offsets = [8, 0], sizes = [16, 16], strides = [1, 1]} : vector<24x16xf32> to vector<16x16xf32>
    %45 = arith.truncf %44 : vector<16x16xf32> to vector<16x16xbf16>
    %c2_37 = arith.constant 2 : index
    %c0_38 = arith.constant 0 : index
    %c0_39 = arith.constant 0 : index
    %46 = vector.load %arg4[%c2_37, %c0_38, %c0_39] : memref<3x16x16xbf16, #tpu.memory_space<vmem>>, vector<1x16x16xbf16>
    %47 = vector.shape_cast %46 : vector<1x16x16xbf16> to vector<16x16xbf16>
    %cst_40 = arith.constant dense<0.000000e+00> : vector<16x16xf32>
    %48 = tpu.matmul %45, %47, %cst_40 {dimension_numbers = #tpu.dot_dimension_numbers<[1], [0], [0], [1], [0, 0, 1, 1], [], []>} : vector<16x16xbf16>, vector<16x16xbf16>, vector<16x16xf32> -> vector<16x16xf32>
    %49 = arith.addf %43, %48 : vector<16x16xf32>
    %50 = vector.broadcast %32 : vector<1x16xf32> to vector<16x16xf32>
    %51 = arith.addf %49, %50 : vector<16x16xf32>
    %cst_41 = arith.constant 0.000000e+00 : f32
    %52 = vector.broadcast %cst_41 : f32 to vector<16x16xf32>
    %53 = arith.maximumf %51, %52 : vector<16x16xf32>
    %54 = arith.addf %53, %1 : vector<16x16xf32>
    %cst_42 = arith.constant 0.000000e+00 : f32
    %55 = vector.broadcast %cst_42 : f32 to vector<16x16xf32>
    %56 = arith.maximumf %54, %55 : vector<16x16xf32>
    %c0_43 = arith.constant 0 : index
    %c0_44 = arith.constant 0 : index
    %c0_45 = arith.constant 0 : index
    %57 = vector.load %arg6[%c0_43, %c0_44, %c0_45] : memref<1x16x16xf32, #tpu.memory_space<vmem>>, vector<1x16x16xf32>
    %58 = vector.shape_cast %57 : vector<1x16x16xf32> to vector<16x16xf32>
    %59 = vector.shape_cast %56 : vector<16x16xf32> to vector<1x16x16xf32>
    tpu.vector_store %arg6[%c0_43, %c0_44, %c0_45], %59 {strides = array<i32>} : memref<1x16x16xf32, #tpu.memory_space<vmem>>, vector<1x16x16xf32>,
    return
  }
  func.func @transform_0(%arg0: i32) -> (i32, i32, i32) {
    %c0_i32 = arith.constant 0 : i32
    %c0_i32_0 = arith.constant 0 : i32
    %c0_i32_1 = arith.constant 0 : i32
    return %arg0, %c0_i32, %c0_i32_0 : i32, i32, i32
  }
  func.func @transform_1(%arg0: i32) -> (i32, i32, i32) {
    %c0_i32 = arith.constant 0 : i32
    %c0_i32_0 = arith.constant 0 : i32
    %c0_i32_1 = arith.constant 0 : i32
    %c0_i32_2 = arith.constant 0 : i32
    return %c0_i32, %c0_i32_0, %c0_i32_1 : i32, i32, i32
  }
  func.func @transform_2(%arg0: i32) -> (i32, i32) {
    %c0_i32 = arith.constant 0 : i32
    %c0_i32_0 = arith.constant 0 : i32
    %c0_i32_1 = arith.constant 0 : i32
    return %c0_i32, %c0_i32_0 : i32, i32
  }
  func.func @transform_3(%arg0: i32) -> (i32, i32, i32) {
    %c0_i32 = arith.constant 0 : i32
    %c0_i32_0 = arith.constant 0 : i32
    %c0_i32_1 = arith.constant 0 : i32
    %c0_i32_2 = arith.constant 0 : i32
    return %c0_i32, %c0_i32_0, %c0_i32_1 : i32, i32, i32
  }
  func.func @transform_4(%arg0: i32) -> (i32, i32) {
    %c0_i32 = arith.constant 0 : i32
    %c0_i32_0 = arith.constant 0 : i32
    %c0_i32_1 = arith.constant 0 : i32
    return %c0_i32, %c0_i32_0 : i32, i32
  }
  func.func @transform_5(%arg0: i32) -> (i32, i32, i32) {
    %c0_i32 = arith.constant 0 : i32
    %c0_i32_0 = arith.constant 0 : i32
    %c0_i32_1 = arith.constant 0 : i32
    return %arg0, %c0_i32, %c0_i32_0 : i32, i32, i32
  }
}

module attributes {stable_mosaic.version = 11 : i64} {
  func.func @_temporal_block_kernel(%arg0: i32, %arg1: memref<1x16x16xf32, #tpu.memory_space<vmem>>, %arg2: memref<3x16x4xbf16, #tpu.memory_space<vmem>>, %arg3: memref<1x4xf32, #tpu.memory_space<vmem>>, %arg4: memref<3x4x4xbf16, #tpu.memory_space<vmem>>, %arg5: memref<1x4xf32, #tpu.memory_space<vmem>>, %arg6: memref<16x4xbf16, #tpu.memory_space<vmem>>, %arg7: memref<1x4xf32, #tpu.memory_space<vmem>>, %arg8: memref<1x16x4xf32, #tpu.memory_space<vmem>>, %arg9: memref<24x16xf32, #tpu.memory_space<vmem>>, %arg10: memref<24x4xf32, #tpu.memory_space<vmem>>) attributes {dimension_semantics = [#tpu.dimension_semantics<parallel>], iteration_bounds = array<i64: 2>, scalar_prefetch = 0 : i64, scratch_operands = 2 : i64, tpu.core_type = #tpu.core_type<tc>, window_params = [{transform_indices = @transform_0, window_bounds = array<i64: 1, 16, 16>}, {pipeline_mode = #tpu.pipeline_mode<synchronous>, transform_indices = @transform_1, window_bounds = array<i64: 3, 16, 4>}, {pipeline_mode = #tpu.pipeline_mode<synchronous>, transform_indices = @transform_2, window_bounds = array<i64: 1, 4>}, {pipeline_mode = #tpu.pipeline_mode<synchronous>, transform_indices = @transform_3, window_bounds = array<i64: 3, 4, 4>}, {pipeline_mode = #tpu.pipeline_mode<synchronous>, transform_indices = @transform_4, window_bounds = array<i64: 1, 4>}, {pipeline_mode = #tpu.pipeline_mode<synchronous>, transform_indices = @transform_5, window_bounds = array<i64: 16, 4>}, {pipeline_mode = #tpu.pipeline_mode<synchronous>, transform_indices = @transform_6, window_bounds = array<i64: 1, 4>}, {transform_indices = @transform_7, window_bounds = array<i64: 1, 16, 4>}]} {
    %c0 = arith.constant 0 : index
    %c0_0 = arith.constant 0 : index
    %c0_1 = arith.constant 0 : index
    %0 = vector.load %arg1[%c0, %c0_0, %c0_1] : memref<1x16x16xf32, #tpu.memory_space<vmem>>, vector<1x16x16xf32>
    %1 = vector.shape_cast %0 : vector<1x16x16xf32> to vector<16x16xf32>
    %2 = arith.truncf %1 : vector<16x16xf32> to vector<16x16xbf16>
    %c0_2 = arith.constant 0 : index
    %c0_3 = arith.constant 0 : index
    %3 = vector.load %arg6[%c0_2, %c0_3] : memref<16x4xbf16, #tpu.memory_space<vmem>>, vector<16x4xbf16>
    %cst = arith.constant dense<0.000000e+00> : vector<16x4xf32>
    %4 = tpu.matmul %2, %3, %cst {dimension_numbers = #tpu.dot_dimension_numbers<[1], [0], [0], [1], [0, 0, 1, 1], [], []>} : vector<16x16xbf16>, vector<16x4xbf16>, vector<16x4xf32> -> vector<16x4xf32>
    %c0_4 = arith.constant 0 : index
    %c0_5 = arith.constant 0 : index
    %5 = vector.load %arg7[%c0_4, %c0_5] : memref<1x4xf32, #tpu.memory_space<vmem>>, vector<1x4xf32>
    %6 = vector.broadcast %5 : vector<1x4xf32> to vector<16x4xf32>
    %7 = arith.addf %4, %6 : vector<16x4xf32>
    %cst_6 = arith.constant 0.000000e+00 : f32
    %8 = vector.broadcast %cst_6 : f32 to vector<24x16xf32>
    %c0_7 = arith.constant 0 : index
    %c0_8 = arith.constant 0 : index
    %9 = vector.load %arg9[%c0_7, %c0_8] : memref<24x16xf32, #tpu.memory_space<vmem>>, vector<24x16xf32>
    tpu.vector_store %arg9[%c0_7, %c0_8], %8 {strides = array<i32>} : memref<24x16xf32, #tpu.memory_space<vmem>>, vector<24x16xf32>,
    %c8 = arith.constant 8 : index
    %c0_9 = arith.constant 0 : index
    %10 = vector.load %arg9[%c8, %c0_9] : memref<24x16xf32, #tpu.memory_space<vmem>>, vector<16x16xf32>
    tpu.vector_store %arg9[%c8, %c0_9], %1 {strides = array<i32>} : memref<24x16xf32, #tpu.memory_space<vmem>>, vector<16x16xf32>,
    %c0_10 = arith.constant 0 : index
    %c0_11 = arith.constant 0 : index
    %11 = vector.load %arg9[%c0_10, %c0_11] : memref<24x16xf32, #tpu.memory_space<vmem>>, vector<24x16xf32>
    %c0_12 = arith.constant 0 : index
    %c0_13 = arith.constant 0 : index
    %12 = vector.load %arg3[%c0_12, %c0_13] : memref<1x4xf32, #tpu.memory_space<vmem>>, vector<1x4xf32>
    %13 = vector.extract_strided_slice %11 {offsets = [0, 0], sizes = [16, 16], strides = [1, 1]} : vector<24x16xf32> to vector<16x16xf32>
    %14 = arith.truncf %13 : vector<16x16xf32> to vector<16x16xbf16>
    %c0_14 = arith.constant 0 : index
    %c0_15 = arith.constant 0 : index
    %c0_16 = arith.constant 0 : index
    %15 = vector.load %arg2[%c0_14, %c0_15, %c0_16] : memref<3x16x4xbf16, #tpu.memory_space<vmem>>, vector<1x16x4xbf16>
    %16 = vector.shape_cast %15 : vector<1x16x4xbf16> to vector<16x4xbf16>
    %cst_17 = arith.constant dense<0.000000e+00> : vector<16x4xf32>
    %17 = tpu.matmul %14, %16, %cst_17 {dimension_numbers = #tpu.dot_dimension_numbers<[1], [0], [0], [1], [0, 0, 1, 1], [], []>} : vector<16x16xbf16>, vector<16x4xbf16>, vector<16x4xf32> -> vector<16x4xf32>
    %18 = vector.extract_strided_slice %11 {offsets = [4, 0], sizes = [16, 16], strides = [1, 1]} : vector<24x16xf32> to vector<16x16xf32>
    %19 = arith.truncf %18 : vector<16x16xf32> to vector<16x16xbf16>
    %c1 = arith.constant 1 : index
    %c0_18 = arith.constant 0 : index
    %c0_19 = arith.constant 0 : index
    %20 = vector.load %arg2[%c1, %c0_18, %c0_19] : memref<3x16x4xbf16, #tpu.memory_space<vmem>>, vector<1x16x4xbf16>
    %21 = vector.shape_cast %20 : vector<1x16x4xbf16> to vector<16x4xbf16>
    %cst_20 = arith.constant dense<0.000000e+00> : vector<16x4xf32>
    %22 = tpu.matmul %19, %21, %cst_20 {dimension_numbers = #tpu.dot_dimension_numbers<[1], [0], [0], [1], [0, 0, 1, 1], [], []>} : vector<16x16xbf16>, vector<16x4xbf16>, vector<16x4xf32> -> vector<16x4xf32>
    %23 = arith.addf %17, %22 : vector<16x4xf32>
    %24 = vector.extract_strided_slice %11 {offsets = [8, 0], sizes = [16, 16], strides = [1, 1]} : vector<24x16xf32> to vector<16x16xf32>
    %25 = arith.truncf %24 : vector<16x16xf32> to vector<16x16xbf16>
    %c2 = arith.constant 2 : index
    %c0_21 = arith.constant 0 : index
    %c0_22 = arith.constant 0 : index
    %26 = vector.load %arg2[%c2, %c0_21, %c0_22] : memref<3x16x4xbf16, #tpu.memory_space<vmem>>, vector<1x16x4xbf16>
    %27 = vector.shape_cast %26 : vector<1x16x4xbf16> to vector<16x4xbf16>
    %cst_23 = arith.constant dense<0.000000e+00> : vector<16x4xf32>
    %28 = tpu.matmul %25, %27, %cst_23 {dimension_numbers = #tpu.dot_dimension_numbers<[1], [0], [0], [1], [0, 0, 1, 1], [], []>} : vector<16x16xbf16>, vector<16x4xbf16>, vector<16x4xf32> -> vector<16x4xf32>
    %29 = arith.addf %23, %28 : vector<16x4xf32>
    %30 = vector.broadcast %12 : vector<1x4xf32> to vector<16x4xf32>
    %31 = arith.addf %29, %30 : vector<16x4xf32>
    %cst_24 = arith.constant 0.000000e+00 : f32
    %32 = vector.broadcast %cst_24 : f32 to vector<16x4xf32>
    %33 = arith.maximumf %31, %32 : vector<16x4xf32>
    %cst_25 = arith.constant 0.000000e+00 : f32
    %34 = vector.broadcast %cst_25 : f32 to vector<24x4xf32>
    %c0_26 = arith.constant 0 : index
    %c0_27 = arith.constant 0 : index
    %35 = vector.load %arg10[%c0_26, %c0_27] : memref<24x4xf32, #tpu.memory_space<vmem>>, vector<24x4xf32>
    tpu.vector_store %arg10[%c0_26, %c0_27], %34 {strides = array<i32>} : memref<24x4xf32, #tpu.memory_space<vmem>>, vector<24x4xf32>,
    %c8_28 = arith.constant 8 : index
    %c0_29 = arith.constant 0 : index
    %36 = vector.load %arg10[%c8_28, %c0_29] : memref<24x4xf32, #tpu.memory_space<vmem>>, vector<16x4xf32>
    tpu.vector_store %arg10[%c8_28, %c0_29], %33 {strides = array<i32>} : memref<24x4xf32, #tpu.memory_space<vmem>>, vector<16x4xf32>,
    %c0_30 = arith.constant 0 : index
    %c0_31 = arith.constant 0 : index
    %37 = vector.load %arg10[%c0_30, %c0_31] : memref<24x4xf32, #tpu.memory_space<vmem>>, vector<24x4xf32>
    %c0_32 = arith.constant 0 : index
    %c0_33 = arith.constant 0 : index
    %38 = vector.load %arg5[%c0_32, %c0_33] : memref<1x4xf32, #tpu.memory_space<vmem>>, vector<1x4xf32>
    %39 = vector.extract_strided_slice %37 {offsets = [0, 0], sizes = [16, 4], strides = [1, 1]} : vector<24x4xf32> to vector<16x4xf32>
    %40 = arith.truncf %39 : vector<16x4xf32> to vector<16x4xbf16>
    %c0_34 = arith.constant 0 : index
    %c0_35 = arith.constant 0 : index
    %c0_36 = arith.constant 0 : index
    %41 = vector.load %arg4[%c0_34, %c0_35, %c0_36] : memref<3x4x4xbf16, #tpu.memory_space<vmem>>, vector<1x4x4xbf16>
    %42 = vector.shape_cast %41 : vector<1x4x4xbf16> to vector<4x4xbf16>
    %cst_37 = arith.constant dense<0.000000e+00> : vector<16x4xf32>
    %43 = tpu.matmul %40, %42, %cst_37 {dimension_numbers = #tpu.dot_dimension_numbers<[1], [0], [0], [1], [0, 0, 1, 1], [], []>} : vector<16x4xbf16>, vector<4x4xbf16>, vector<16x4xf32> -> vector<16x4xf32>
    %44 = vector.extract_strided_slice %37 {offsets = [4, 0], sizes = [16, 4], strides = [1, 1]} : vector<24x4xf32> to vector<16x4xf32>
    %45 = arith.truncf %44 : vector<16x4xf32> to vector<16x4xbf16>
    %c1_38 = arith.constant 1 : index
    %c0_39 = arith.constant 0 : index
    %c0_40 = arith.constant 0 : index
    %46 = vector.load %arg4[%c1_38, %c0_39, %c0_40] : memref<3x4x4xbf16, #tpu.memory_space<vmem>>, vector<1x4x4xbf16>
    %47 = vector.shape_cast %46 : vector<1x4x4xbf16> to vector<4x4xbf16>
    %cst_41 = arith.constant dense<0.000000e+00> : vector<16x4xf32>
    %48 = tpu.matmul %45, %47, %cst_41 {dimension_numbers = #tpu.dot_dimension_numbers<[1], [0], [0], [1], [0, 0, 1, 1], [], []>} : vector<16x4xbf16>, vector<4x4xbf16>, vector<16x4xf32> -> vector<16x4xf32>
    %49 = arith.addf %43, %48 : vector<16x4xf32>
    %50 = vector.extract_strided_slice %37 {offsets = [8, 0], sizes = [16, 4], strides = [1, 1]} : vector<24x4xf32> to vector<16x4xf32>
    %51 = arith.truncf %50 : vector<16x4xf32> to vector<16x4xbf16>
    %c2_42 = arith.constant 2 : index
    %c0_43 = arith.constant 0 : index
    %c0_44 = arith.constant 0 : index
    %52 = vector.load %arg4[%c2_42, %c0_43, %c0_44] : memref<3x4x4xbf16, #tpu.memory_space<vmem>>, vector<1x4x4xbf16>
    %53 = vector.shape_cast %52 : vector<1x4x4xbf16> to vector<4x4xbf16>
    %cst_45 = arith.constant dense<0.000000e+00> : vector<16x4xf32>
    %54 = tpu.matmul %51, %53, %cst_45 {dimension_numbers = #tpu.dot_dimension_numbers<[1], [0], [0], [1], [0, 0, 1, 1], [], []>} : vector<16x4xbf16>, vector<4x4xbf16>, vector<16x4xf32> -> vector<16x4xf32>
    %55 = arith.addf %49, %54 : vector<16x4xf32>
    %56 = vector.broadcast %38 : vector<1x4xf32> to vector<16x4xf32>
    %57 = arith.addf %55, %56 : vector<16x4xf32>
    %cst_46 = arith.constant 0.000000e+00 : f32
    %58 = vector.broadcast %cst_46 : f32 to vector<16x4xf32>
    %59 = arith.maximumf %57, %58 : vector<16x4xf32>
    %60 = arith.addf %59, %7 : vector<16x4xf32>
    %cst_47 = arith.constant 0.000000e+00 : f32
    %61 = vector.broadcast %cst_47 : f32 to vector<16x4xf32>
    %62 = arith.maximumf %60, %61 : vector<16x4xf32>
    %c0_48 = arith.constant 0 : index
    %c0_49 = arith.constant 0 : index
    %c0_50 = arith.constant 0 : index
    %63 = vector.load %arg8[%c0_48, %c0_49, %c0_50] : memref<1x16x4xf32, #tpu.memory_space<vmem>>, vector<1x16x4xf32>
    %64 = vector.shape_cast %63 : vector<1x16x4xf32> to vector<16x4xf32>
    %65 = vector.shape_cast %62 : vector<16x4xf32> to vector<1x16x4xf32>
    tpu.vector_store %arg8[%c0_48, %c0_49, %c0_50], %65 {strides = array<i32>} : memref<1x16x4xf32, #tpu.memory_space<vmem>>, vector<1x16x4xf32>,
    return
  }
  func.func @transform_0(%arg0: i32) -> (i32, i32, i32) {
    %c0_i32 = arith.constant 0 : i32
    %c0_i32_0 = arith.constant 0 : i32
    %c0_i32_1 = arith.constant 0 : i32
    return %arg0, %c0_i32, %c0_i32_0 : i32, i32, i32
  }
  func.func @transform_1(%arg0: i32) -> (i32, i32, i32) {
    %c0_i32 = arith.constant 0 : i32
    %c0_i32_0 = arith.constant 0 : i32
    %c0_i32_1 = arith.constant 0 : i32
    %c0_i32_2 = arith.constant 0 : i32
    return %c0_i32, %c0_i32_0, %c0_i32_1 : i32, i32, i32
  }
  func.func @transform_2(%arg0: i32) -> (i32, i32) {
    %c0_i32 = arith.constant 0 : i32
    %c0_i32_0 = arith.constant 0 : i32
    %c0_i32_1 = arith.constant 0 : i32
    return %c0_i32, %c0_i32_0 : i32, i32
  }
  func.func @transform_3(%arg0: i32) -> (i32, i32, i32) {
    %c0_i32 = arith.constant 0 : i32
    %c0_i32_0 = arith.constant 0 : i32
    %c0_i32_1 = arith.constant 0 : i32
    %c0_i32_2 = arith.constant 0 : i32
    return %c0_i32, %c0_i32_0, %c0_i32_1 : i32, i32, i32
  }
  func.func @transform_4(%arg0: i32) -> (i32, i32) {
    %c0_i32 = arith.constant 0 : i32
    %c0_i32_0 = arith.constant 0 : i32
    %c0_i32_1 = arith.constant 0 : i32
    return %c0_i32, %c0_i32_0 : i32, i32
  }
  func.func @transform_5(%arg0: i32) -> (i32, i32) {
    %c0_i32 = arith.constant 0 : i32
    %c0_i32_0 = arith.constant 0 : i32
    %c0_i32_1 = arith.constant 0 : i32
    return %c0_i32, %c0_i32_0 : i32, i32
  }
  func.func @transform_6(%arg0: i32) -> (i32, i32) {
    %c0_i32 = arith.constant 0 : i32
    %c0_i32_0 = arith.constant 0 : i32
    %c0_i32_1 = arith.constant 0 : i32
    return %c0_i32, %c0_i32_0 : i32, i32
  }
  func.func @transform_7(%arg0: i32) -> (i32, i32, i32) {
    %c0_i32 = arith.constant 0 : i32
    %c0_i32_0 = arith.constant 0 : i32
    %c0_i32_1 = arith.constant 0 : i32
    return %arg0, %c0_i32, %c0_i32_0 : i32, i32, i32
  }
}

module attributes {stable_mosaic.version = 11 : i64} {
  func.func @_masked_linear_kernel(%arg0: i32, %arg1: memref<32x4xf32, #tpu.memory_space<vmem>>, %arg2: memref<4x16xbf16, #tpu.memory_space<vmem>>, %arg3: memref<1x16xf32, #tpu.memory_space<vmem>>, %arg4: memref<32x1xf32, #tpu.memory_space<vmem>>, %arg5: memref<32x16xf32, #tpu.memory_space<vmem>>) attributes {dimension_semantics = [#tpu.dimension_semantics<parallel>], iteration_bounds = array<i64: 1>, scalar_prefetch = 0 : i64, scratch_operands = 0 : i64, tpu.core_type = #tpu.core_type<tc>, window_params = [{transform_indices = @transform_0, window_bounds = array<i64: 32, 4>}, {pipeline_mode = #tpu.pipeline_mode<synchronous>, transform_indices = @transform_1, window_bounds = array<i64: 4, 16>}, {pipeline_mode = #tpu.pipeline_mode<synchronous>, transform_indices = @transform_2, window_bounds = array<i64: 1, 16>}, {transform_indices = @transform_3, window_bounds = array<i64: 32, 1>}, {transform_indices = @transform_4, window_bounds = array<i64: 32, 16>}]} {
    %c0 = arith.constant 0 : index
    %c0_0 = arith.constant 0 : index
    %0 = vector.load %arg4[%c0, %c0_0] : memref<32x1xf32, #tpu.memory_space<vmem>>, vector<32x1xf32>
    %cst = arith.constant 0.000000e+00 : f32
    %1 = vector.broadcast %cst : f32 to vector<32x1xf32>
    %2 = arith.cmpf ogt, %0, %1 : vector<32x1xf32>
    %c0_1 = arith.constant 0 : index
    %c0_2 = arith.constant 0 : index
    %3 = vector.load %arg1[%c0_1, %c0_2] : memref<32x4xf32, #tpu.memory_space<vmem>>, vector<32x4xf32>
    %cst_3 = arith.constant 0.000000e+00 : f32
    %4 = vector.shape_cast %2 : vector<32x1xi1> to vector<32x1xi1>
    %5 = vector.broadcast %4 : vector<32x1xi1> to vector<32x4xi1>
    %6 = vector.broadcast %cst_3 : f32 to vector<32x4xf32>
    %7 = arith.select %5, %3, %6 : vector<32x4xi1>, vector<32x4xf32>
    %8 = arith.truncf %7 : vector<32x4xf32> to vector<32x4xbf16>
    %c0_4 = arith.constant 0 : index
    %c0_5 = arith.constant 0 : index
    %9 = vector.load %arg2[%c0_4, %c0_5] : memref<4x16xbf16, #tpu.memory_space<vmem>>, vector<4x16xbf16>
    %cst_6 = arith.constant dense<0.000000e+00> : vector<32x16xf32>
    %10 = tpu.matmul %8, %9, %cst_6 {dimension_numbers = #tpu.dot_dimension_numbers<[1], [0], [0], [1], [0, 0, 1, 1], [], []>} : vector<32x4xbf16>, vector<4x16xbf16>, vector<32x16xf32> -> vector<32x16xf32>
    %c0_7 = arith.constant 0 : index
    %c0_8 = arith.constant 0 : index
    %11 = vector.load %arg3[%c0_7, %c0_8] : memref<1x16xf32, #tpu.memory_space<vmem>>, vector<1x16xf32>
    %12 = vector.broadcast %11 : vector<1x16xf32> to vector<32x16xf32>
    %13 = arith.addf %10, %12 : vector<32x16xf32>
    %14 = vector.broadcast %0 : vector<32x1xf32> to vector<32x16xf32>
    %15 = arith.mulf %13, %14 : vector<32x16xf32>
    %c0_9 = arith.constant 0 : index
    %c0_10 = arith.constant 0 : index
    %16 = vector.load %arg5[%c0_9, %c0_10] : memref<32x16xf32, #tpu.memory_space<vmem>>, vector<32x16xf32>
    tpu.vector_store %arg5[%c0_9, %c0_10], %15 {strides = array<i32>} : memref<32x16xf32, #tpu.memory_space<vmem>>, vector<32x16xf32>,
    return
  }
  func.func @transform_0(%arg0: i32) -> (i32, i32) {
    %c0_i32 = arith.constant 0 : i32
    %c0_i32_0 = arith.constant 0 : i32
    return %arg0, %c0_i32 : i32, i32
  }
  func.func @transform_1(%arg0: i32) -> (i32, i32) {
    %c0_i32 = arith.constant 0 : i32
    %c0_i32_0 = arith.constant 0 : i32
    %c0_i32_1 = arith.constant 0 : i32
    return %c0_i32, %c0_i32_0 : i32, i32
  }
  func.func @transform_2(%arg0: i32) -> (i32, i32) {
    %c0_i32 = arith.constant 0 : i32
    %c0_i32_0 = arith.constant 0 : i32
    %c0_i32_1 = arith.constant 0 : i32
    return %c0_i32, %c0_i32_0 : i32, i32
  }
  func.func @transform_3(%arg0: i32) -> (i32, i32) {
    %c0_i32 = arith.constant 0 : i32
    %c0_i32_0 = arith.constant 0 : i32
    return %arg0, %c0_i32 : i32, i32
  }
  func.func @transform_4(%arg0: i32) -> (i32, i32) {
    %c0_i32 = arith.constant 0 : i32
    %c0_i32_0 = arith.constant 0 : i32
    return %arg0, %c0_i32 : i32, i32
  }
}

module attributes {stable_mosaic.version = 11 : i64} {
  func.func @_conv_block_kernel(%arg0: i32, %arg1: memref<1x16x16xf32, #tpu.memory_space<vmem>>, %arg2: memref<3x16x8xbf16, #tpu.memory_space<vmem>>, %arg3: memref<1x8xf32, #tpu.memory_space<vmem>>, %arg4: memref<3x8x8xbf16, #tpu.memory_space<vmem>>, %arg5: memref<1x8xf32, #tpu.memory_space<vmem>>, %arg6: memref<16x8xbf16, #tpu.memory_space<vmem>>, %arg7: memref<1x8xf32, #tpu.memory_space<vmem>>, %arg8: memref<1x16x8xf32, #tpu.memory_space<vmem>>, %arg9: memref<28x16xf32, #tpu.memory_space<vmem>>, %arg10: memref<28x8xf32, #tpu.memory_space<vmem>>) attributes {dimension_semantics = [#tpu.dimension_semantics<parallel>], iteration_bounds = array<i64: 2>, scalar_prefetch = 0 : i64, scratch_operands = 2 : i64, tpu.core_type = #tpu.core_type<tc>, window_params = [{transform_indices = @transform_0, window_bounds = array<i64: 1, 16, 16>}, {pipeline_mode = #tpu.pipeline_mode<synchronous>, transform_indices = @transform_1, window_bounds = array<i64: 3, 16, 8>}, {pipeline_mode = #tpu.pipeline_mode<synchronous>, transform_indices = @transform_2, window_bounds = array<i64: 1, 8>}, {pipeline_mode = #tpu.pipeline_mode<synchronous>, transform_indices = @transform_3, window_bounds = array<i64: 3, 8, 8>}, {pipeline_mode = #tpu.pipeline_mode<synchronous>, transform_indices = @transform_4, window_bounds = array<i64: 1, 8>}, {pipeline_mode = #tpu.pipeline_mode<synchronous>, transform_indices = @transform_5, window_bounds = array<i64: 16, 8>}, {pipeline_mode = #tpu.pipeline_mode<synchronous>, transform_indices = @transform_6, window_bounds = array<i64: 1, 8>}, {transform_indices = @transform_7, window_bounds = array<i64: 1, 16, 8>}]} {
    %c0 = arith.constant 0 : index
    %c0_0 = arith.constant 0 : index
    %c0_1 = arith.constant 0 : index
    %0 = vector.load %arg1[%c0, %c0_0, %c0_1] : memref<1x16x16xf32, #tpu.memory_space<vmem>>, vector<1x16x16xf32>
    %1 = vector.shape_cast %0 : vector<1x16x16xf32> to vector<16x16xf32>
    %2 = arith.truncf %1 : vector<16x16xf32> to vector<16x16xbf16>
    %c0_2 = arith.constant 0 : index
    %c0_3 = arith.constant 0 : index
    %3 = vector.load %arg6[%c0_2, %c0_3] : memref<16x8xbf16, #tpu.memory_space<vmem>>, vector<16x8xbf16>
    %cst = arith.constant dense<0.000000e+00> : vector<16x8xf32>
    %4 = tpu.matmul %2, %3, %cst {dimension_numbers = #tpu.dot_dimension_numbers<[1], [0], [0], [1], [0, 0, 1, 1], [], []>} : vector<16x16xbf16>, vector<16x8xbf16>, vector<16x8xf32> -> vector<16x8xf32>
    %c0_4 = arith.constant 0 : index
    %c0_5 = arith.constant 0 : index
    %5 = vector.load %arg7[%c0_4, %c0_5] : memref<1x8xf32, #tpu.memory_space<vmem>>, vector<1x8xf32>
    %6 = vector.broadcast %5 : vector<1x8xf32> to vector<16x8xf32>
    %7 = arith.addf %4, %6 : vector<16x8xf32>
    %cst_6 = arith.constant 0.000000e+00 : f32
    %8 = vector.broadcast %cst_6 : f32 to vector<28x16xf32>
    %c0_7 = arith.constant 0 : index
    %c0_8 = arith.constant 0 : index
    %9 = vector.load %arg9[%c0_7, %c0_8] : memref<28x16xf32, #tpu.memory_space<vmem>>, vector<28x16xf32>
    tpu.vector_store %arg9[%c0_7, %c0_8], %8 {strides = array<i32>} : memref<28x16xf32, #tpu.memory_space<vmem>>, vector<28x16xf32>,
    %10 = arith.mulf %1, %1 : vector<16x16xf32>
    %11 = arith.mulf %1, %10 : vector<16x16xf32>
    %cst_9 = arith.constant 4.471500e-02 : f32
    %12 = vector.broadcast %cst_9 : f32 to vector<16x16xf32>
    %13 = arith.mulf %12, %11 : vector<16x16xf32>
    %14 = arith.addf %1, %13 : vector<16x16xf32>
    %cst_10 = arith.constant 0.797884583 : f32
    %15 = vector.broadcast %cst_10 : f32 to vector<16x16xf32>
    %16 = arith.mulf %15, %14 : vector<16x16xf32>
    %17 = math.tanh %16 : vector<16x16xf32>
    %cst_11 = arith.constant 1.000000e+00 : f32
    %18 = vector.broadcast %cst_11 : f32 to vector<16x16xf32>
    %19 = arith.addf %18, %17 : vector<16x16xf32>
    %cst_12 = arith.constant 5.000000e-01 : f32
    %20 = vector.broadcast %cst_12 : f32 to vector<16x16xf32>
    %21 = arith.mulf %20, %19 : vector<16x16xf32>
    %22 = arith.mulf %1, %21 : vector<16x16xf32>
    %c8 = arith.constant 8 : index
    %c0_13 = arith.constant 0 : index
    %23 = vector.load %arg9[%c8, %c0_13] : memref<28x16xf32, #tpu.memory_space<vmem>>, vector<16x16xf32>
    tpu.vector_store %arg9[%c8, %c0_13], %22 {strides = array<i32>} : memref<28x16xf32, #tpu.memory_space<vmem>>, vector<16x16xf32>,
    %c0_14 = arith.constant 0 : index
    %c0_15 = arith.constant 0 : index
    %24 = vector.load %arg9[%c0_14, %c0_15] : memref<28x16xf32, #tpu.memory_space<vmem>>, vector<28x16xf32>
    %c0_16 = arith.constant 0 : index
    %c0_17 = arith.constant 0 : index
    %25 = vector.load %arg3[%c0_16, %c0_17] : memref<1x8xf32, #tpu.memory_space<vmem>>, vector<1x8xf32>
    %26 = vector.extract_strided_slice %24 {offsets = [4, 0], sizes = [16, 16], strides = [1, 1]} : vector<28x16xf32> to vector<16x16xf32>
    %27 = arith.truncf %26 : vector<16x16xf32> to vector<16x16xbf16>
    %c0_18 = arith.constant 0 : index
    %c0_19 = arith.constant 0 : index
    %c0_20 = arith.constant 0 : index
    %28 = vector.load %arg2[%c0_18, %c0_19, %c0_20] : memref<3x16x8xbf16, #tpu.memory_space<vmem>>, vector<1x16x8xbf16>
    %29 = vector.shape_cast %28 : vector<1x16x8xbf16> to vector<16x8xbf16>
    %cst_21 = arith.constant dense<0.000000e+00> : vector<16x8xf32>
    %30 = tpu.matmul %27, %29, %cst_21 {dimension_numbers = #tpu.dot_dimension_numbers<[1], [0], [0], [1], [0, 0, 1, 1], [], []>} : vector<16x16xbf16>, vector<16x8xbf16>, vector<16x8xf32> -> vector<16x8xf32>
    %31 = vector.extract_strided_slice %24 {offsets = [8, 0], sizes = [16, 16], strides = [1, 1]} : vector<28x16xf32> to vector<16x16xf32>
    %32 = arith.truncf %31 : vector<16x16xf32> to vector<16x16xbf16>
    %c1 = arith.constant 1 : index
    %c0_22 = arith.constant 0 : index
    %c0_23 = arith.constant 0 : index
    %33 = vector.load %arg2[%c1, %c0_22, %c0_23] : memref<3x16x8xbf16, #tpu.memory_space<vmem>>, vector<1x16x8xbf16>
    %34 = vector.shape_cast %33 : vector<1x16x8xbf16> to vector<16x8xbf16>
    %cst_24 = arith.constant dense<0.000000e+00> : vector<16x8xf32>
    %35 = tpu.matmul %32, %34, %cst_24 {dimension_numbers = #tpu.dot_dimension_numbers<[1], [0], [0], [1], [0, 0, 1, 1], [], []>} : vector<16x16xbf16>, vector<16x8xbf16>, vector<16x8xf32> -> vector<16x8xf32>
    %36 = arith.addf %30, %35 : vector<16x8xf32>
    %37 = vector.extract_strided_slice %24 {offsets = [12, 0], sizes = [16, 16], strides = [1, 1]} : vector<28x16xf32> to vector<16x16xf32>
    %38 = arith.truncf %37 : vector<16x16xf32> to vector<16x16xbf16>
    %c2 = arith.constant 2 : index
    %c0_25 = arith.constant 0 : index
    %c0_26 = arith.constant 0 : index
    %39 = vector.load %arg2[%c2, %c0_25, %c0_26] : memref<3x16x8xbf16, #tpu.memory_space<vmem>>, vector<1x16x8xbf16>
    %40 = vector.shape_cast %39 : vector<1x16x8xbf16> to vector<16x8xbf16>
    %cst_27 = arith.constant dense<0.000000e+00> : vector<16x8xf32>
    %41 = tpu.matmul %38, %40, %cst_27 {dimension_numbers = #tpu.dot_dimension_numbers<[1], [0], [0], [1], [0, 0, 1, 1], [], []>} : vector<16x16xbf16>, vector<16x8xbf16>, vector<16x8xf32> -> vector<16x8xf32>
    %42 = arith.addf %36, %41 : vector<16x8xf32>
    %43 = vector.broadcast %25 : vector<1x8xf32> to vector<16x8xf32>
    %44 = arith.addf %42, %43 : vector<16x8xf32>
    %cst_28 = arith.constant 0.000000e+00 : f32
    %45 = vector.broadcast %cst_28 : f32 to vector<28x8xf32>
    %c0_29 = arith.constant 0 : index
    %c0_30 = arith.constant 0 : index
    %46 = vector.load %arg10[%c0_29, %c0_30] : memref<28x8xf32, #tpu.memory_space<vmem>>, vector<28x8xf32>
    tpu.vector_store %arg10[%c0_29, %c0_30], %45 {strides = array<i32>} : memref<28x8xf32, #tpu.memory_space<vmem>>, vector<28x8xf32>,
    %47 = arith.mulf %44, %44 : vector<16x8xf32>
    %48 = arith.mulf %44, %47 : vector<16x8xf32>
    %cst_31 = arith.constant 4.471500e-02 : f32
    %49 = vector.broadcast %cst_31 : f32 to vector<16x8xf32>
    %50 = arith.mulf %49, %48 : vector<16x8xf32>
    %51 = arith.addf %44, %50 : vector<16x8xf32>
    %cst_32 = arith.constant 0.797884583 : f32
    %52 = vector.broadcast %cst_32 : f32 to vector<16x8xf32>
    %53 = arith.mulf %52, %51 : vector<16x8xf32>
    %54 = math.tanh %53 : vector<16x8xf32>
    %cst_33 = arith.constant 1.000000e+00 : f32
    %55 = vector.broadcast %cst_33 : f32 to vector<16x8xf32>
    %56 = arith.addf %55, %54 : vector<16x8xf32>
    %cst_34 = arith.constant 5.000000e-01 : f32
    %57 = vector.broadcast %cst_34 : f32 to vector<16x8xf32>
    %58 = arith.mulf %57, %56 : vector<16x8xf32>
    %59 = arith.mulf %44, %58 : vector<16x8xf32>
    %c8_35 = arith.constant 8 : index
    %c0_36 = arith.constant 0 : index
    %60 = vector.load %arg10[%c8_35, %c0_36] : memref<28x8xf32, #tpu.memory_space<vmem>>, vector<16x8xf32>
    tpu.vector_store %arg10[%c8_35, %c0_36], %59 {strides = array<i32>} : memref<28x8xf32, #tpu.memory_space<vmem>>, vector<16x8xf32>,
    %c0_37 = arith.constant 0 : index
    %c0_38 = arith.constant 0 : index
    %61 = vector.load %arg10[%c0_37, %c0_38] : memref<28x8xf32, #tpu.memory_space<vmem>>, vector<28x8xf32>
    %c0_39 = arith.constant 0 : index
    %c0_40 = arith.constant 0 : index
    %62 = vector.load %arg5[%c0_39, %c0_40] : memref<1x8xf32, #tpu.memory_space<vmem>>, vector<1x8xf32>
    %63 = vector.extract_strided_slice %61 {offsets = [4, 0], sizes = [16, 8], strides = [1, 1]} : vector<28x8xf32> to vector<16x8xf32>
    %64 = arith.truncf %63 : vector<16x8xf32> to vector<16x8xbf16>
    %c0_41 = arith.constant 0 : index
    %c0_42 = arith.constant 0 : index
    %c0_43 = arith.constant 0 : index
    %65 = vector.load %arg4[%c0_41, %c0_42, %c0_43] : memref<3x8x8xbf16, #tpu.memory_space<vmem>>, vector<1x8x8xbf16>
    %66 = vector.shape_cast %65 : vector<1x8x8xbf16> to vector<8x8xbf16>
    %cst_44 = arith.constant dense<0.000000e+00> : vector<16x8xf32>
    %67 = tpu.matmul %64, %66, %cst_44 {dimension_numbers = #tpu.dot_dimension_numbers<[1], [0], [0], [1], [0, 0, 1, 1], [], []>} : vector<16x8xbf16>, vector<8x8xbf16>, vector<16x8xf32> -> vector<16x8xf32>
    %68 = vector.extract_strided_slice %61 {offsets = [8, 0], sizes = [16, 8], strides = [1, 1]} : vector<28x8xf32> to vector<16x8xf32>
    %69 = arith.truncf %68 : vector<16x8xf32> to vector<16x8xbf16>
    %c1_45 = arith.constant 1 : index
    %c0_46 = arith.constant 0 : index
    %c0_47 = arith.constant 0 : index
    %70 = vector.load %arg4[%c1_45, %c0_46, %c0_47] : memref<3x8x8xbf16, #tpu.memory_space<vmem>>, vector<1x8x8xbf16>
    %71 = vector.shape_cast %70 : vector<1x8x8xbf16> to vector<8x8xbf16>
    %cst_48 = arith.constant dense<0.000000e+00> : vector<16x8xf32>
    %72 = tpu.matmul %69, %71, %cst_48 {dimension_numbers = #tpu.dot_dimension_numbers<[1], [0], [0], [1], [0, 0, 1, 1], [], []>} : vector<16x8xbf16>, vector<8x8xbf16>, vector<16x8xf32> -> vector<16x8xf32>
    %73 = arith.addf %67, %72 : vector<16x8xf32>
    %74 = vector.extract_strided_slice %61 {offsets = [12, 0], sizes = [16, 8], strides = [1, 1]} : vector<28x8xf32> to vector<16x8xf32>
    %75 = arith.truncf %74 : vector<16x8xf32> to vector<16x8xbf16>
    %c2_49 = arith.constant 2 : index
    %c0_50 = arith.constant 0 : index
    %c0_51 = arith.constant 0 : index
    %76 = vector.load %arg4[%c2_49, %c0_50, %c0_51] : memref<3x8x8xbf16, #tpu.memory_space<vmem>>, vector<1x8x8xbf16>
    %77 = vector.shape_cast %76 : vector<1x8x8xbf16> to vector<8x8xbf16>
    %cst_52 = arith.constant dense<0.000000e+00> : vector<16x8xf32>
    %78 = tpu.matmul %75, %77, %cst_52 {dimension_numbers = #tpu.dot_dimension_numbers<[1], [0], [0], [1], [0, 0, 1, 1], [], []>} : vector<16x8xbf16>, vector<8x8xbf16>, vector<16x8xf32> -> vector<16x8xf32>
    %79 = arith.addf %73, %78 : vector<16x8xf32>
    %80 = vector.broadcast %62 : vector<1x8xf32> to vector<16x8xf32>
    %81 = arith.addf %79, %80 : vector<16x8xf32>
    %82 = arith.addf %81, %7 : vector<16x8xf32>
    %c0_53 = arith.constant 0 : index
    %c0_54 = arith.constant 0 : index
    %c0_55 = arith.constant 0 : index
    %83 = vector.load %arg8[%c0_53, %c0_54, %c0_55] : memref<1x16x8xf32, #tpu.memory_space<vmem>>, vector<1x16x8xf32>
    %84 = vector.shape_cast %83 : vector<1x16x8xf32> to vector<16x8xf32>
    %85 = vector.shape_cast %82 : vector<16x8xf32> to vector<1x16x8xf32>
    tpu.vector_store %arg8[%c0_53, %c0_54, %c0_55], %85 {strides = array<i32>} : memref<1x16x8xf32, #tpu.memory_space<vmem>>, vector<1x16x8xf32>,
    return
  }
  func.func @transform_0(%arg0: i32) -> (i32, i32, i32) {
    %c0_i32 = arith.constant 0 : i32
    %c0_i32_0 = arith.constant 0 : i32
    %c0_i32_1 = arith.constant 0 : i32
    return %arg0, %c0_i32, %c0_i32_0 : i32, i32, i32
  }
  func.func @transform_1(%arg0: i32) -> (i32, i32, i32) {
    %c0_i32 = arith.constant 0 : i32
    %c0_i32_0 = arith.constant 0 : i32
    %c0_i32_1 = arith.constant 0 : i32
    %c0_i32_2 = arith.constant 0 : i32
    return %c0_i32, %c0_i32_0, %c0_i32_1 : i32, i32, i32
  }
  func.func @transform_2(%arg0: i32) -> (i32, i32) {
    %c0_i32 = arith.constant 0 : i32
    %c0_i32_0 = arith.constant 0 : i32
    %c0_i32_1 = arith.constant 0 : i32
    return %c0_i32, %c0_i32_0 : i32, i32
  }
  func.func @transform_3(%arg0: i32) -> (i32, i32, i32) {
    %c0_i32 = arith.constant 0 : i32
    %c0_i32_0 = arith.constant 0 : i32
    %c0_i32_1 = arith.constant 0 : i32
    %c0_i32_2 = arith.constant 0 : i32
    return %c0_i32, %c0_i32_0, %c0_i32_1 : i32, i32, i32
  }
  func.func @transform_4(%arg0: i32) -> (i32, i32) {
    %c0_i32 = arith.constant 0 : i32
    %c0_i32_0 = arith.constant 0 : i32
    %c0_i32_1 = arith.constant 0 : i32
    return %c0_i32, %c0_i32_0 : i32, i32
  }
  func.func @transform_5(%arg0: i32) -> (i32, i32) {
    %c0_i32 = arith.constant 0 : i32
    %c0_i32_0 = arith.constant 0 : i32
    %c0_i32_1 = arith.constant 0 : i32
    return %c0_i32, %c0_i32_0 : i32, i32
  }
  func.func @transform_6(%arg0: i32) -> (i32, i32) {
    %c0_i32 = arith.constant 0 : i32
    %c0_i32_0 = arith.constant 0 : i32
    %c0_i32_1 = arith.constant 0 : i32
    return %c0_i32, %c0_i32_0 : i32, i32
  }
  func.func @transform_7(%arg0: i32) -> (i32, i32, i32) {
    %c0_i32 = arith.constant 0 : i32
    %c0_i32_0 = arith.constant 0 : i32
    %c0_i32_1 = arith.constant 0 : i32
    return %arg0, %c0_i32, %c0_i32_0 : i32, i32, i32
  }
}

module attributes {stable_mosaic.version = 11 : i64} {
  func.func @_conv_block_kernel(%arg0: i32, %arg1: memref<1x16x16xf32, #tpu.memory_space<vmem>>, %arg2: memref<3x16x16xbf16, #tpu.memory_space<vmem>>, %arg3: memref<1x16xf32, #tpu.memory_space<vmem>>, %arg4: memref<3x16x16xbf16, #tpu.memory_space<vmem>>, %arg5: memref<1x16xf32, #tpu.memory_space<vmem>>, %arg6: memref<1x16x16xf32, #tpu.memory_space<vmem>>, %arg7: memref<25x16xf32, #tpu.memory_space<vmem>>, %arg8: memref<25x16xf32, #tpu.memory_space<vmem>>) attributes {dimension_semantics = [#tpu.dimension_semantics<parallel>], iteration_bounds = array<i64: 2>, scalar_prefetch = 0 : i64, scratch_operands = 2 : i64, tpu.core_type = #tpu.core_type<tc>, window_params = [{transform_indices = @transform_0, window_bounds = array<i64: 1, 16, 16>}, {pipeline_mode = #tpu.pipeline_mode<synchronous>, transform_indices = @transform_1, window_bounds = array<i64: 3, 16, 16>}, {pipeline_mode = #tpu.pipeline_mode<synchronous>, transform_indices = @transform_2, window_bounds = array<i64: 1, 16>}, {pipeline_mode = #tpu.pipeline_mode<synchronous>, transform_indices = @transform_3, window_bounds = array<i64: 3, 16, 16>}, {pipeline_mode = #tpu.pipeline_mode<synchronous>, transform_indices = @transform_4, window_bounds = array<i64: 1, 16>}, {transform_indices = @transform_5, window_bounds = array<i64: 1, 16, 16>}]} {
    %c0 = arith.constant 0 : index
    %c0_0 = arith.constant 0 : index
    %c0_1 = arith.constant 0 : index
    %0 = vector.load %arg1[%c0, %c0_0, %c0_1] : memref<1x16x16xf32, #tpu.memory_space<vmem>>, vector<1x16x16xf32>
    %1 = vector.shape_cast %0 : vector<1x16x16xf32> to vector<16x16xf32>
    %cst = arith.constant 0.000000e+00 : f32
    %2 = vector.broadcast %cst : f32 to vector<25x16xf32>
    %c0_2 = arith.constant 0 : index
    %c0_3 = arith.constant 0 : index
    %3 = vector.load %arg7[%c0_2, %c0_3] : memref<25x16xf32, #tpu.memory_space<vmem>>, vector<25x16xf32>
    tpu.vector_store %arg7[%c0_2, %c0_3], %2 {strides = array<i32>} : memref<25x16xf32, #tpu.memory_space<vmem>>, vector<25x16xf32>,
    %4 = arith.mulf %1, %1 : vector<16x16xf32>
    %5 = arith.mulf %1, %4 : vector<16x16xf32>
    %cst_4 = arith.constant 4.471500e-02 : f32
    %6 = vector.broadcast %cst_4 : f32 to vector<16x16xf32>
    %7 = arith.mulf %6, %5 : vector<16x16xf32>
    %8 = arith.addf %1, %7 : vector<16x16xf32>
    %cst_5 = arith.constant 0.797884583 : f32
    %9 = vector.broadcast %cst_5 : f32 to vector<16x16xf32>
    %10 = arith.mulf %9, %8 : vector<16x16xf32>
    %11 = math.tanh %10 : vector<16x16xf32>
    %cst_6 = arith.constant 1.000000e+00 : f32
    %12 = vector.broadcast %cst_6 : f32 to vector<16x16xf32>
    %13 = arith.addf %12, %11 : vector<16x16xf32>
    %cst_7 = arith.constant 5.000000e-01 : f32
    %14 = vector.broadcast %cst_7 : f32 to vector<16x16xf32>
    %15 = arith.mulf %14, %13 : vector<16x16xf32>
    %16 = arith.mulf %1, %15 : vector<16x16xf32>
    %c8 = arith.constant 8 : index
    %c0_8 = arith.constant 0 : index
    %17 = vector.load %arg7[%c8, %c0_8] : memref<25x16xf32, #tpu.memory_space<vmem>>, vector<16x16xf32>
    tpu.vector_store %arg7[%c8, %c0_8], %16 {strides = array<i32>} : memref<25x16xf32, #tpu.memory_space<vmem>>, vector<16x16xf32>,
    %c0_9 = arith.constant 0 : index
    %c0_10 = arith.constant 0 : index
    %18 = vector.load %arg7[%c0_9, %c0_10] : memref<25x16xf32, #tpu.memory_space<vmem>>, vector<25x16xf32>
    %c0_11 = arith.constant 0 : index
    %c0_12 = arith.constant 0 : index
    %19 = vector.load %arg3[%c0_11, %c0_12] : memref<1x16xf32, #tpu.memory_space<vmem>>, vector<1x16xf32>
    %20 = vector.extract_strided_slice %18 {offsets = [7, 0], sizes = [16, 16], strides = [1, 1]} : vector<25x16xf32> to vector<16x16xf32>
    %21 = arith.truncf %20 : vector<16x16xf32> to vector<16x16xbf16>
    %c0_13 = arith.constant 0 : index
    %c0_14 = arith.constant 0 : index
    %c0_15 = arith.constant 0 : index
    %22 = vector.load %arg2[%c0_13, %c0_14, %c0_15] : memref<3x16x16xbf16, #tpu.memory_space<vmem>>, vector<1x16x16xbf16>
    %23 = vector.shape_cast %22 : vector<1x16x16xbf16> to vector<16x16xbf16>
    %cst_16 = arith.constant dense<0.000000e+00> : vector<16x16xf32>
    %24 = tpu.matmul %21, %23, %cst_16 {dimension_numbers = #tpu.dot_dimension_numbers<[1], [0], [0], [1], [0, 0, 1, 1], [], []>} : vector<16x16xbf16>, vector<16x16xbf16>, vector<16x16xf32> -> vector<16x16xf32>
    %25 = vector.extract_strided_slice %18 {offsets = [8, 0], sizes = [16, 16], strides = [1, 1]} : vector<25x16xf32> to vector<16x16xf32>
    %26 = arith.truncf %25 : vector<16x16xf32> to vector<16x16xbf16>
    %c1 = arith.constant 1 : index
    %c0_17 = arith.constant 0 : index
    %c0_18 = arith.constant 0 : index
    %27 = vector.load %arg2[%c1, %c0_17, %c0_18] : memref<3x16x16xbf16, #tpu.memory_space<vmem>>, vector<1x16x16xbf16>
    %28 = vector.shape_cast %27 : vector<1x16x16xbf16> to vector<16x16xbf16>
    %cst_19 = arith.constant dense<0.000000e+00> : vector<16x16xf32>
    %29 = tpu.matmul %26, %28, %cst_19 {dimension_numbers = #tpu.dot_dimension_numbers<[1], [0], [0], [1], [0, 0, 1, 1], [], []>} : vector<16x16xbf16>, vector<16x16xbf16>, vector<16x16xf32> -> vector<16x16xf32>
    %30 = arith.addf %24, %29 : vector<16x16xf32>
    %31 = vector.extract_strided_slice %18 {offsets = [9, 0], sizes = [16, 16], strides = [1, 1]} : vector<25x16xf32> to vector<16x16xf32>
    %32 = arith.truncf %31 : vector<16x16xf32> to vector<16x16xbf16>
    %c2 = arith.constant 2 : index
    %c0_20 = arith.constant 0 : index
    %c0_21 = arith.constant 0 : index
    %33 = vector.load %arg2[%c2, %c0_20, %c0_21] : memref<3x16x16xbf16, #tpu.memory_space<vmem>>, vector<1x16x16xbf16>
    %34 = vector.shape_cast %33 : vector<1x16x16xbf16> to vector<16x16xbf16>
    %cst_22 = arith.constant dense<0.000000e+00> : vector<16x16xf32>
    %35 = tpu.matmul %32, %34, %cst_22 {dimension_numbers = #tpu.dot_dimension_numbers<[1], [0], [0], [1], [0, 0, 1, 1], [], []>} : vector<16x16xbf16>, vector<16x16xbf16>, vector<16x16xf32> -> vector<16x16xf32>
    %36 = arith.addf %30, %35 : vector<16x16xf32>
    %37 = vector.broadcast %19 : vector<1x16xf32> to vector<16x16xf32>
    %38 = arith.addf %36, %37 : vector<16x16xf32>
    %cst_23 = arith.constant 0.000000e+00 : f32
    %39 = vector.broadcast %cst_23 : f32 to vector<25x16xf32>
    %c0_24 = arith.constant 0 : index
    %c0_25 = arith.constant 0 : index
    %40 = vector.load %arg8[%c0_24, %c0_25] : memref<25x16xf32, #tpu.memory_space<vmem>>, vector<25x16xf32>
    tpu.vector_store %arg8[%c0_24, %c0_25], %39 {strides = array<i32>} : memref<25x16xf32, #tpu.memory_space<vmem>>, vector<25x16xf32>,
    %41 = arith.mulf %38, %38 : vector<16x16xf32>
    %42 = arith.mulf %38, %41 : vector<16x16xf32>
    %cst_26 = arith.constant 4.471500e-02 : f32
    %43 = vector.broadcast %cst_26 : f32 to vector<16x16xf32>
    %44 = arith.mulf %43, %42 : vector<16x16xf32>
    %45 = arith.addf %38, %44 : vector<16x16xf32>
    %cst_27 = arith.constant 0.797884583 : f32
    %46 = vector.broadcast %cst_27 : f32 to vector<16x16xf32>
    %47 = arith.mulf %46, %45 : vector<16x16xf32>
    %48 = math.tanh %47 : vector<16x16xf32>
    %cst_28 = arith.constant 1.000000e+00 : f32
    %49 = vector.broadcast %cst_28 : f32 to vector<16x16xf32>
    %50 = arith.addf %49, %48 : vector<16x16xf32>
    %cst_29 = arith.constant 5.000000e-01 : f32
    %51 = vector.broadcast %cst_29 : f32 to vector<16x16xf32>
    %52 = arith.mulf %51, %50 : vector<16x16xf32>
    %53 = arith.mulf %38, %52 : vector<16x16xf32>
    %c8_30 = arith.constant 8 : index
    %c0_31 = arith.constant 0 : index
    %54 = vector.load %arg8[%c8_30, %c0_31] : memref<25x16xf32, #tpu.memory_space<vmem>>, vector<16x16xf32>
    tpu.vector_store %arg8[%c8_30, %c0_31], %53 {strides = array<i32>} : memref<25x16xf32, #tpu.memory_space<vmem>>, vector<16x16xf32>,
    %c0_32 = arith.constant 0 : index
    %c0_33 = arith.constant 0 : index
    %55 = vector.load %arg8[%c0_32, %c0_33] : memref<25x16xf32, #tpu.memory_space<vmem>>, vector<25x16xf32>
    %c0_34 = arith.constant 0 : index
    %c0_35 = arith.constant 0 : index
    %56 = vector.load %arg5[%c0_34, %c0_35] : memref<1x16xf32, #tpu.memory_space<vmem>>, vector<1x16xf32>
    %57 = vector.extract_strided_slice %55 {offsets = [7, 0], sizes = [16, 16], strides = [1, 1]} : vector<25x16xf32> to vector<16x16xf32>
    %58 = arith.truncf %57 : vector<16x16xf32> to vector<16x16xbf16>
    %c0_36 = arith.constant 0 : index
    %c0_37 = arith.constant 0 : index
    %c0_38 = arith.constant 0 : index
    %59 = vector.load %arg4[%c0_36, %c0_37, %c0_38] : memref<3x16x16xbf16, #tpu.memory_space<vmem>>, vector<1x16x16xbf16>
    %60 = vector.shape_cast %59 : vector<1x16x16xbf16> to vector<16x16xbf16>
    %cst_39 = arith.constant dense<0.000000e+00> : vector<16x16xf32>
    %61 = tpu.matmul %58, %60, %cst_39 {dimension_numbers = #tpu.dot_dimension_numbers<[1], [0], [0], [1], [0, 0, 1, 1], [], []>} : vector<16x16xbf16>, vector<16x16xbf16>, vector<16x16xf32> -> vector<16x16xf32>
    %62 = vector.extract_strided_slice %55 {offsets = [8, 0], sizes = [16, 16], strides = [1, 1]} : vector<25x16xf32> to vector<16x16xf32>
    %63 = arith.truncf %62 : vector<16x16xf32> to vector<16x16xbf16>
    %c1_40 = arith.constant 1 : index
    %c0_41 = arith.constant 0 : index
    %c0_42 = arith.constant 0 : index
    %64 = vector.load %arg4[%c1_40, %c0_41, %c0_42] : memref<3x16x16xbf16, #tpu.memory_space<vmem>>, vector<1x16x16xbf16>
    %65 = vector.shape_cast %64 : vector<1x16x16xbf16> to vector<16x16xbf16>
    %cst_43 = arith.constant dense<0.000000e+00> : vector<16x16xf32>
    %66 = tpu.matmul %63, %65, %cst_43 {dimension_numbers = #tpu.dot_dimension_numbers<[1], [0], [0], [1], [0, 0, 1, 1], [], []>} : vector<16x16xbf16>, vector<16x16xbf16>, vector<16x16xf32> -> vector<16x16xf32>
    %67 = arith.addf %61, %66 : vector<16x16xf32>
    %68 = vector.extract_strided_slice %55 {offsets = [9, 0], sizes = [16, 16], strides = [1, 1]} : vector<25x16xf32> to vector<16x16xf32>
    %69 = arith.truncf %68 : vector<16x16xf32> to vector<16x16xbf16>
    %c2_44 = arith.constant 2 : index
    %c0_45 = arith.constant 0 : index
    %c0_46 = arith.constant 0 : index
    %70 = vector.load %arg4[%c2_44, %c0_45, %c0_46] : memref<3x16x16xbf16, #tpu.memory_space<vmem>>, vector<1x16x16xbf16>
    %71 = vector.shape_cast %70 : vector<1x16x16xbf16> to vector<16x16xbf16>
    %cst_47 = arith.constant dense<0.000000e+00> : vector<16x16xf32>
    %72 = tpu.matmul %69, %71, %cst_47 {dimension_numbers = #tpu.dot_dimension_numbers<[1], [0], [0], [1], [0, 0, 1, 1], [], []>} : vector<16x16xbf16>, vector<16x16xbf16>, vector<16x16xf32> -> vector<16x16xf32>
    %73 = arith.addf %67, %72 : vector<16x16xf32>
    %74 = vector.broadcast %56 : vector<1x16xf32> to vector<16x16xf32>
    %75 = arith.addf %73, %74 : vector<16x16xf32>
    %76 = arith.addf %75, %1 : vector<16x16xf32>
    %c0_48 = arith.constant 0 : index
    %c0_49 = arith.constant 0 : index
    %c0_50 = arith.constant 0 : index
    %77 = vector.load %arg6[%c0_48, %c0_49, %c0_50] : memref<1x16x16xf32, #tpu.memory_space<vmem>>, vector<1x16x16xf32>
    %78 = vector.shape_cast %77 : vector<1x16x16xf32> to vector<16x16xf32>
    %79 = vector.shape_cast %76 : vector<16x16xf32> to vector<1x16x16xf32>
    tpu.vector_store %arg6[%c0_48, %c0_49, %c0_50], %79 {strides = array<i32>} : memref<1x16x16xf32, #tpu.memory_space<vmem>>, vector<1x16x16xf32>,
    return
  }
  func.func @transform_0(%arg0: i32) -> (i32, i32, i32) {
    %c0_i32 = arith.constant 0 : i32
    %c0_i32_0 = arith.constant 0 : i32
    %c0_i32_1 = arith.constant 0 : i32
    return %arg0, %c0_i32, %c0_i32_0 : i32, i32, i32
  }
  func.func @transform_1(%arg0: i32) -> (i32, i32, i32) {
    %c0_i32 = arith.constant 0 : i32
    %c0_i32_0 = arith.constant 0 : i32
    %c0_i32_1 = arith.constant 0 : i32
    %c0_i32_2 = arith.constant 0 : i32
    return %c0_i32, %c0_i32_0, %c0_i32_1 : i32, i32, i32
  }
  func.func @transform_2(%arg0: i32) -> (i32, i32) {
    %c0_i32 = arith.constant 0 : i32
    %c0_i32_0 = arith.constant 0 : i32
    %c0_i32_1 = arith.constant 0 : i32
    return %c0_i32, %c0_i32_0 : i32, i32
  }
  func.func @transform_3(%arg0: i32) -> (i32, i32, i32) {
    %c0_i32 = arith.constant 0 : i32
    %c0_i32_0 = arith.constant 0 : i32
    %c0_i32_1 = arith.constant 0 : i32
    %c0_i32_2 = arith.constant 0 : i32
    return %c0_i32, %c0_i32_0, %c0_i32_1 : i32, i32, i32
  }
  func.func @transform_4(%arg0: i32) -> (i32, i32) {
    %c0_i32 = arith.constant 0 : i32
    %c0_i32_0 = arith.constant 0 : i32
    %c0_i32_1 = arith.constant 0 : i32
    return %c0_i32, %c0_i32_0 : i32, i32
  }
  func.func @transform_5(%arg0: i32) -> (i32, i32, i32) {
    %c0_i32 = arith.constant 0 : i32
    %c0_i32_0 = arith.constant 0 : i32
    %c0_i32_1 = arith.constant 0 : i32
    return %arg0, %c0_i32, %c0_i32_0 : i32, i32, i32
  }
}

module attributes {stable_mosaic.version = 11 : i64} {
  func.func @_conv_block_kernel(%arg0: i32, %arg1: memref<1x16x16xf32, #tpu.memory_space<vmem>>, %arg2: memref<3x16x16xbf16, #tpu.memory_space<vmem>>, %arg3: memref<1x16xf32, #tpu.memory_space<vmem>>, %arg4: memref<3x16x16xbf16, #tpu.memory_space<vmem>>, %arg5: memref<1x16xf32, #tpu.memory_space<vmem>>, %arg6: memref<1x16x16xf32, #tpu.memory_space<vmem>>, %arg7: memref<26x16xf32, #tpu.memory_space<vmem>>, %arg8: memref<26x16xf32, #tpu.memory_space<vmem>>) attributes {dimension_semantics = [#tpu.dimension_semantics<parallel>], iteration_bounds = array<i64: 2>, scalar_prefetch = 0 : i64, scratch_operands = 2 : i64, tpu.core_type = #tpu.core_type<tc>, window_params = [{transform_indices = @transform_0, window_bounds = array<i64: 1, 16, 16>}, {pipeline_mode = #tpu.pipeline_mode<synchronous>, transform_indices = @transform_1, window_bounds = array<i64: 3, 16, 16>}, {pipeline_mode = #tpu.pipeline_mode<synchronous>, transform_indices = @transform_2, window_bounds = array<i64: 1, 16>}, {pipeline_mode = #tpu.pipeline_mode<synchronous>, transform_indices = @transform_3, window_bounds = array<i64: 3, 16, 16>}, {pipeline_mode = #tpu.pipeline_mode<synchronous>, transform_indices = @transform_4, window_bounds = array<i64: 1, 16>}, {transform_indices = @transform_5, window_bounds = array<i64: 1, 16, 16>}]} {
    %c0 = arith.constant 0 : index
    %c0_0 = arith.constant 0 : index
    %c0_1 = arith.constant 0 : index
    %0 = vector.load %arg1[%c0, %c0_0, %c0_1] : memref<1x16x16xf32, #tpu.memory_space<vmem>>, vector<1x16x16xf32>
    %1 = vector.shape_cast %0 : vector<1x16x16xf32> to vector<16x16xf32>
    %cst = arith.constant 0.000000e+00 : f32
    %2 = vector.broadcast %cst : f32 to vector<26x16xf32>
    %c0_2 = arith.constant 0 : index
    %c0_3 = arith.constant 0 : index
    %3 = vector.load %arg7[%c0_2, %c0_3] : memref<26x16xf32, #tpu.memory_space<vmem>>, vector<26x16xf32>
    tpu.vector_store %arg7[%c0_2, %c0_3], %2 {strides = array<i32>} : memref<26x16xf32, #tpu.memory_space<vmem>>, vector<26x16xf32>,
    %4 = arith.mulf %1, %1 : vector<16x16xf32>
    %5 = arith.mulf %1, %4 : vector<16x16xf32>
    %cst_4 = arith.constant 4.471500e-02 : f32
    %6 = vector.broadcast %cst_4 : f32 to vector<16x16xf32>
    %7 = arith.mulf %6, %5 : vector<16x16xf32>
    %8 = arith.addf %1, %7 : vector<16x16xf32>
    %cst_5 = arith.constant 0.797884583 : f32
    %9 = vector.broadcast %cst_5 : f32 to vector<16x16xf32>
    %10 = arith.mulf %9, %8 : vector<16x16xf32>
    %11 = math.tanh %10 : vector<16x16xf32>
    %cst_6 = arith.constant 1.000000e+00 : f32
    %12 = vector.broadcast %cst_6 : f32 to vector<16x16xf32>
    %13 = arith.addf %12, %11 : vector<16x16xf32>
    %cst_7 = arith.constant 5.000000e-01 : f32
    %14 = vector.broadcast %cst_7 : f32 to vector<16x16xf32>
    %15 = arith.mulf %14, %13 : vector<16x16xf32>
    %16 = arith.mulf %1, %15 : vector<16x16xf32>
    %c8 = arith.constant 8 : index
    %c0_8 = arith.constant 0 : index
    %17 = vector.load %arg7[%c8, %c0_8] : memref<26x16xf32, #tpu.memory_space<vmem>>, vector<16x16xf32>
    tpu.vector_store %arg7[%c8, %c0_8], %16 {strides = array<i32>} : memref<26x16xf32, #tpu.memory_space<vmem>>, vector<16x16xf32>,
    %c0_9 = arith.constant 0 : index
    %c0_10 = arith.constant 0 : index
    %18 = vector.load %arg7[%c0_9, %c0_10] : memref<26x16xf32, #tpu.memory_space<vmem>>, vector<26x16xf32>
    %c0_11 = arith.constant 0 : index
    %c0_12 = arith.constant 0 : index
    %19 = vector.load %arg3[%c0_11, %c0_12] : memref<1x16xf32, #tpu.memory_space<vmem>>, vector<1x16xf32>
    %20 = vector.extract_strided_slice %18 {offsets = [6, 0], sizes = [16, 16], strides = [1, 1]} : vector<26x16xf32> to vector<16x16xf32>
    %21 = arith.truncf %20 : vector<16x16xf32> to vector<16x16xbf16>
    %c0_13 = arith.constant 0 : index
    %c0_14 = arith.constant 0 : index
    %c0_15 = arith.constant 0 : index
    %22 = vector.load %arg2[%c0_13, %c0_14, %c0_15] : memref<3x16x16xbf16, #tpu.memory_space<vmem>>, vector<1x16x16xbf16>
    %23 = vector.shape_cast %22 : vector<1x16x16xbf16> to vector<16x16xbf16>
    %cst_16 = arith.constant dense<0.000000e+00> : vector<16x16xf32>
    %24 = tpu.matmul %21, %23, %cst_16 {dimension_numbers = #tpu.dot_dimension_numbers<[1], [0], [0], [1], [0, 0, 1, 1], [], []>} : vector<16x16xbf16>, vector<16x16xbf16>, vector<16x16xf32> -> vector<16x16xf32>
    %25 = vector.extract_strided_slice %18 {offsets = [8, 0], sizes = [16, 16], strides = [1, 1]} : vector<26x16xf32> to vector<16x16xf32>
    %26 = arith.truncf %25 : vector<16x16xf32> to vector<16x16xbf16>
    %c1 = arith.constant 1 : index
    %c0_17 = arith.constant 0 : index
    %c0_18 = arith.constant 0 : index
    %27 = vector.load %arg2[%c1, %c0_17, %c0_18] : memref<3x16x16xbf16, #tpu.memory_space<vmem>>, vector<1x16x16xbf16>
    %28 = vector.shape_cast %27 : vector<1x16x16xbf16> to vector<16x16xbf16>
    %cst_19 = arith.constant dense<0.000000e+00> : vector<16x16xf32>
    %29 = tpu.matmul %26, %28, %cst_19 {dimension_numbers = #tpu.dot_dimension_numbers<[1], [0], [0], [1], [0, 0, 1, 1], [], []>} : vector<16x16xbf16>, vector<16x16xbf16>, vector<16x16xf32> -> vector<16x16xf32>
    %30 = arith.addf %24, %29 : vector<16x16xf32>
    %31 = vector.extract_strided_slice %18 {offsets = [10, 0], sizes = [16, 16], strides = [1, 1]} : vector<26x16xf32> to vector<16x16xf32>
    %32 = arith.truncf %31 : vector<16x16xf32> to vector<16x16xbf16>
    %c2 = arith.constant 2 : index
    %c0_20 = arith.constant 0 : index
    %c0_21 = arith.constant 0 : index
    %33 = vector.load %arg2[%c2, %c0_20, %c0_21] : memref<3x16x16xbf16, #tpu.memory_space<vmem>>, vector<1x16x16xbf16>
    %34 = vector.shape_cast %33 : vector<1x16x16xbf16> to vector<16x16xbf16>
    %cst_22 = arith.constant dense<0.000000e+00> : vector<16x16xf32>
    %35 = tpu.matmul %32, %34, %cst_22 {dimension_numbers = #tpu.dot_dimension_numbers<[1], [0], [0], [1], [0, 0, 1, 1], [], []>} : vector<16x16xbf16>, vector<16x16xbf16>, vector<16x16xf32> -> vector<16x16xf32>
    %36 = arith.addf %30, %35 : vector<16x16xf32>
    %37 = vector.broadcast %19 : vector<1x16xf32> to vector<16x16xf32>
    %38 = arith.addf %36, %37 : vector<16x16xf32>
    %cst_23 = arith.constant 0.000000e+00 : f32
    %39 = vector.broadcast %cst_23 : f32 to vector<26x16xf32>
    %c0_24 = arith.constant 0 : index
    %c0_25 = arith.constant 0 : index
    %40 = vector.load %arg8[%c0_24, %c0_25] : memref<26x16xf32, #tpu.memory_space<vmem>>, vector<26x16xf32>
    tpu.vector_store %arg8[%c0_24, %c0_25], %39 {strides = array<i32>} : memref<26x16xf32, #tpu.memory_space<vmem>>, vector<26x16xf32>,
    %41 = arith.mulf %38, %38 : vector<16x16xf32>
    %42 = arith.mulf %38, %41 : vector<16x16xf32>
    %cst_26 = arith.constant 4.471500e-02 : f32
    %43 = vector.broadcast %cst_26 : f32 to vector<16x16xf32>
    %44 = arith.mulf %43, %42 : vector<16x16xf32>
    %45 = arith.addf %38, %44 : vector<16x16xf32>
    %cst_27 = arith.constant 0.797884583 : f32
    %46 = vector.broadcast %cst_27 : f32 to vector<16x16xf32>
    %47 = arith.mulf %46, %45 : vector<16x16xf32>
    %48 = math.tanh %47 : vector<16x16xf32>
    %cst_28 = arith.constant 1.000000e+00 : f32
    %49 = vector.broadcast %cst_28 : f32 to vector<16x16xf32>
    %50 = arith.addf %49, %48 : vector<16x16xf32>
    %cst_29 = arith.constant 5.000000e-01 : f32
    %51 = vector.broadcast %cst_29 : f32 to vector<16x16xf32>
    %52 = arith.mulf %51, %50 : vector<16x16xf32>
    %53 = arith.mulf %38, %52 : vector<16x16xf32>
    %c8_30 = arith.constant 8 : index
    %c0_31 = arith.constant 0 : index
    %54 = vector.load %arg8[%c8_30, %c0_31] : memref<26x16xf32, #tpu.memory_space<vmem>>, vector<16x16xf32>
    tpu.vector_store %arg8[%c8_30, %c0_31], %53 {strides = array<i32>} : memref<26x16xf32, #tpu.memory_space<vmem>>, vector<16x16xf32>,
    %c0_32 = arith.constant 0 : index
    %c0_33 = arith.constant 0 : index
    %55 = vector.load %arg8[%c0_32, %c0_33] : memref<26x16xf32, #tpu.memory_space<vmem>>, vector<26x16xf32>
    %c0_34 = arith.constant 0 : index
    %c0_35 = arith.constant 0 : index
    %56 = vector.load %arg5[%c0_34, %c0_35] : memref<1x16xf32, #tpu.memory_space<vmem>>, vector<1x16xf32>
    %57 = vector.extract_strided_slice %55 {offsets = [6, 0], sizes = [16, 16], strides = [1, 1]} : vector<26x16xf32> to vector<16x16xf32>
    %58 = arith.truncf %57 : vector<16x16xf32> to vector<16x16xbf16>
    %c0_36 = arith.constant 0 : index
    %c0_37 = arith.constant 0 : index
    %c0_38 = arith.constant 0 : index
    %59 = vector.load %arg4[%c0_36, %c0_37, %c0_38] : memref<3x16x16xbf16, #tpu.memory_space<vmem>>, vector<1x16x16xbf16>
    %60 = vector.shape_cast %59 : vector<1x16x16xbf16> to vector<16x16xbf16>
    %cst_39 = arith.constant dense<0.000000e+00> : vector<16x16xf32>
    %61 = tpu.matmul %58, %60, %cst_39 {dimension_numbers = #tpu.dot_dimension_numbers<[1], [0], [0], [1], [0, 0, 1, 1], [], []>} : vector<16x16xbf16>, vector<16x16xbf16>, vector<16x16xf32> -> vector<16x16xf32>
    %62 = vector.extract_strided_slice %55 {offsets = [8, 0], sizes = [16, 16], strides = [1, 1]} : vector<26x16xf32> to vector<16x16xf32>
    %63 = arith.truncf %62 : vector<16x16xf32> to vector<16x16xbf16>
    %c1_40 = arith.constant 1 : index
    %c0_41 = arith.constant 0 : index
    %c0_42 = arith.constant 0 : index
    %64 = vector.load %arg4[%c1_40, %c0_41, %c0_42] : memref<3x16x16xbf16, #tpu.memory_space<vmem>>, vector<1x16x16xbf16>
    %65 = vector.shape_cast %64 : vector<1x16x16xbf16> to vector<16x16xbf16>
    %cst_43 = arith.constant dense<0.000000e+00> : vector<16x16xf32>
    %66 = tpu.matmul %63, %65, %cst_43 {dimension_numbers = #tpu.dot_dimension_numbers<[1], [0], [0], [1], [0, 0, 1, 1], [], []>} : vector<16x16xbf16>, vector<16x16xbf16>, vector<16x16xf32> -> vector<16x16xf32>
    %67 = arith.addf %61, %66 : vector<16x16xf32>
    %68 = vector.extract_strided_slice %55 {offsets = [10, 0], sizes = [16, 16], strides = [1, 1]} : vector<26x16xf32> to vector<16x16xf32>
    %69 = arith.truncf %68 : vector<16x16xf32> to vector<16x16xbf16>
    %c2_44 = arith.constant 2 : index
    %c0_45 = arith.constant 0 : index
    %c0_46 = arith.constant 0 : index
    %70 = vector.load %arg4[%c2_44, %c0_45, %c0_46] : memref<3x16x16xbf16, #tpu.memory_space<vmem>>, vector<1x16x16xbf16>
    %71 = vector.shape_cast %70 : vector<1x16x16xbf16> to vector<16x16xbf16>
    %cst_47 = arith.constant dense<0.000000e+00> : vector<16x16xf32>
    %72 = tpu.matmul %69, %71, %cst_47 {dimension_numbers = #tpu.dot_dimension_numbers<[1], [0], [0], [1], [0, 0, 1, 1], [], []>} : vector<16x16xbf16>, vector<16x16xbf16>, vector<16x16xf32> -> vector<16x16xf32>
    %73 = arith.addf %67, %72 : vector<16x16xf32>
    %74 = vector.broadcast %56 : vector<1x16xf32> to vector<16x16xf32>
    %75 = arith.addf %73, %74 : vector<16x16xf32>
    %76 = arith.addf %75, %1 : vector<16x16xf32>
    %c0_48 = arith.constant 0 : index
    %c0_49 = arith.constant 0 : index
    %c0_50 = arith.constant 0 : index
    %77 = vector.load %arg6[%c0_48, %c0_49, %c0_50] : memref<1x16x16xf32, #tpu.memory_space<vmem>>, vector<1x16x16xf32>
    %78 = vector.shape_cast %77 : vector<1x16x16xf32> to vector<16x16xf32>
    %79 = vector.shape_cast %76 : vector<16x16xf32> to vector<1x16x16xf32>
    tpu.vector_store %arg6[%c0_48, %c0_49, %c0_50], %79 {strides = array<i32>} : memref<1x16x16xf32, #tpu.memory_space<vmem>>, vector<1x16x16xf32>,
    return
  }
  func.func @transform_0(%arg0: i32) -> (i32, i32, i32) {
    %c0_i32 = arith.constant 0 : i32
    %c0_i32_0 = arith.constant 0 : i32
    %c0_i32_1 = arith.constant 0 : i32
    return %arg0, %c0_i32, %c0_i32_0 : i32, i32, i32
  }
  func.func @transform_1(%arg0: i32) -> (i32, i32, i32) {
    %c0_i32 = arith.constant 0 : i32
    %c0_i32_0 = arith.constant 0 : i32
    %c0_i32_1 = arith.constant 0 : i32
    %c0_i32_2 = arith.constant 0 : i32
    return %c0_i32, %c0_i32_0, %c0_i32_1 : i32, i32, i32
  }
  func.func @transform_2(%arg0: i32) -> (i32, i32) {
    %c0_i32 = arith.constant 0 : i32
    %c0_i32_0 = arith.constant 0 : i32
    %c0_i32_1 = arith.constant 0 : i32
    return %c0_i32, %c0_i32_0 : i32, i32
  }
  func.func @transform_3(%arg0: i32) -> (i32, i32, i32) {
    %c0_i32 = arith.constant 0 : i32
    %c0_i32_0 = arith.constant 0 : i32
    %c0_i32_1 = arith.constant 0 : i32
    %c0_i32_2 = arith.constant 0 : i32
    return %c0_i32, %c0_i32_0, %c0_i32_1 : i32, i32, i32
  }
  func.func @transform_4(%arg0: i32) -> (i32, i32) {
    %c0_i32 = arith.constant 0 : i32
    %c0_i32_0 = arith.constant 0 : i32
    %c0_i32_1 = arith.constant 0 : i32
    return %c0_i32, %c0_i32_0 : i32, i32
  }
  func.func @transform_5(%arg0: i32) -> (i32, i32, i32) {
    %c0_i32 = arith.constant 0 : i32
    %c0_i32_0 = arith.constant 0 : i32
    %c0_i32_1 = arith.constant 0 : i32
    return %arg0, %c0_i32, %c0_i32_0 : i32, i32, i32
  }
}

module attributes {stable_mosaic.version = 11 : i64} {
  func.func @_banded_fourier_kernel(%arg0: i32, %arg1: memref<9x2x8xf32, #tpu.memory_space<vmem>>, %arg2: memref<9x2x8xf32, #tpu.memory_space<vmem>>, %arg3: memref<9x8x4xbf16, #tpu.memory_space<vmem>>, %arg4: memref<9x8x4xbf16, #tpu.memory_space<vmem>>, %arg5: memref<9x8x4xbf16, #tpu.memory_space<vmem>>, %arg6: memref<9x1x4xf32, #tpu.memory_space<vmem>>, %arg7: memref<9x1x4xf32, #tpu.memory_space<vmem>>, %arg8: memref<9x2x4xf32, #tpu.memory_space<vmem>>, %arg9: memref<9x2x4xf32, #tpu.memory_space<vmem>>) attributes {dimension_semantics = [#tpu.dimension_semantics<parallel>], iteration_bounds = array<i64: 1>, scalar_prefetch = 0 : i64, scratch_operands = 0 : i64, tpu.core_type = #tpu.core_type<tc>, window_params = [{transform_indices = @transform_0, window_bounds = array<i64: 9, 2, 8>}, {transform_indices = @transform_1, window_bounds = array<i64: 9, 2, 8>}, {transform_indices = @transform_2, window_bounds = array<i64: 9, 8, 4>}, {transform_indices = @transform_3, window_bounds = array<i64: 9, 8, 4>}, {transform_indices = @transform_4, window_bounds = array<i64: 9, 8, 4>}, {transform_indices = @transform_5, window_bounds = array<i64: 9, 1, 4>}, {transform_indices = @transform_6, window_bounds = array<i64: 9, 1, 4>}, {transform_indices = @transform_7, window_bounds = array<i64: 9, 2, 4>}, {transform_indices = @transform_8, window_bounds = array<i64: 9, 2, 4>}]} {
    %c0 = arith.constant 0 : index
    %c0_0 = arith.constant 0 : index
    %c0_1 = arith.constant 0 : index
    %0 = vector.load %arg1[%c0, %c0_0, %c0_1] : memref<9x2x8xf32, #tpu.memory_space<vmem>>, vector<9x2x8xf32>
    %c0_2 = arith.constant 0 : index
    %c0_3 = arith.constant 0 : index
    %c0_4 = arith.constant 0 : index
    %1 = vector.load %arg2[%c0_2, %c0_3, %c0_4] : memref<9x2x8xf32, #tpu.memory_space<vmem>>, vector<9x2x8xf32>
    %2 = arith.addf %0, %1 : vector<9x2x8xf32>
    %3 = arith.truncf %2 : vector<9x2x8xf32> to vector<9x2x8xbf16>
    %4 = arith.truncf %0 : vector<9x2x8xf32> to vector<9x2x8xbf16>
    %5 = arith.truncf %1 : vector<9x2x8xf32> to vector<9x2x8xbf16>
    %c0_5 = arith.constant 0 : index
    %c0_6 = arith.constant 0 : index
    %c0_7 = arith.constant 0 : index
    %6 = vector.load %arg3[%c0_5, %c0_6, %c0_7] : memref<9x8x4xbf16, #tpu.memory_space<vmem>>, vector<9x8x4xbf16>
    "tpu.trace_start"() <{level = 10 : i32, message = "fbc,fco->fbo"}> : () -> ()
    %cst = arith.constant dense<0.000000e+00> : vector<9x2x4xf32>
    %7 = tpu.matmul %4, %6, %cst {dimension_numbers = #tpu.dot_dimension_numbers<[2], [1], [1], [2], [0, 0, 0, 1, 1, 2], [0], [0]>} : vector<9x2x8xbf16>, vector<9x8x4xbf16>, vector<9x2x4xf32> -> vector<9x2x4xf32>
    "tpu.trace_stop"() : () -> ()
    %c0_8 = arith.constant 0 : index
    %c0_9 = arith.constant 0 : index
    %c0_10 = arith.constant 0 : index
    %8 = vector.load %arg4[%c0_8, %c0_9, %c0_10] : memref<9x8x4xbf16, #tpu.memory_space<vmem>>, vector<9x8x4xbf16>
    "tpu.trace_start"() <{level = 10 : i32, message = "fbc,fco->fbo"}> : () -> ()
    %cst_11 = arith.constant dense<0.000000e+00> : vector<9x2x4xf32>
    %9 = tpu.matmul %5, %8, %cst_11 {dimension_numbers = #tpu.dot_dimension_numbers<[2], [1], [1], [2], [0, 0, 0, 1, 1, 2], [0], [0]>} : vector<9x2x8xbf16>, vector<9x8x4xbf16>, vector<9x2x4xf32> -> vector<9x2x4xf32>
    "tpu.trace_stop"() : () -> ()
    %c0_12 = arith.constant 0 : index
    %c0_13 = arith.constant 0 : index
    %c0_14 = arith.constant 0 : index
    %10 = vector.load %arg5[%c0_12, %c0_13, %c0_14] : memref<9x8x4xbf16, #tpu.memory_space<vmem>>, vector<9x8x4xbf16>
    "tpu.trace_start"() <{level = 10 : i32, message = "fbc,fco->fbo"}> : () -> ()
    %cst_15 = arith.constant dense<0.000000e+00> : vector<9x2x4xf32>
    %11 = tpu.matmul %3, %10, %cst_15 {dimension_numbers = #tpu.dot_dimension_numbers<[2], [1], [1], [2], [0, 0, 0, 1, 1, 2], [0], [0]>} : vector<9x2x8xbf16>, vector<9x8x4xbf16>, vector<9x2x4xf32> -> vector<9x2x4xf32>
    "tpu.trace_stop"() : () -> ()
    %12 = arith.subf %7, %9 : vector<9x2x4xf32>
    %c0_16 = arith.constant 0 : index
    %c0_17 = arith.constant 0 : index
    %c0_18 = arith.constant 0 : index
    %13 = vector.load %arg6[%c0_16, %c0_17, %c0_18] : memref<9x1x4xf32, #tpu.memory_space<vmem>>, vector<9x1x4xf32>
    %14 = vector.broadcast %13 : vector<9x1x4xf32> to vector<9x2x4xf32>
    %15 = arith.addf %12, %14 : vector<9x2x4xf32>
    %c0_19 = arith.constant 0 : index
    %c0_20 = arith.constant 0 : index
    %c0_21 = arith.constant 0 : index
    %16 = vector.load %arg8[%c0_19, %c0_20, %c0_21] : memref<9x2x4xf32, #tpu.memory_space<vmem>>, vector<9x2x4xf32>
    tpu.vector_store %arg8[%c0_19, %c0_20, %c0_21], %15 {strides = array<i32>} : memref<9x2x4xf32, #tpu.memory_space<vmem>>, vector<9x2x4xf32>,
    %17 = arith.subf %11, %7 : vector<9x2x4xf32>
    %18 = arith.subf %17, %9 : vector<9x2x4xf32>
    %c0_22 = arith.constant 0 : index
    %c0_23 = arith.constant 0 : index
    %c0_24 = arith.constant 0 : index
    %19 = vector.load %arg7[%c0_22, %c0_23, %c0_24] : memref<9x1x4xf32, #tpu.memory_space<vmem>>, vector<9x1x4xf32>
    %20 = vector.broadcast %19 : vector<9x1x4xf32> to vector<9x2x4xf32>
    %21 = arith.addf %18, %20 : vector<9x2x4xf32>
    %c0_25 = arith.constant 0 : index
    %c0_26 = arith.constant 0 : index
    %c0_27 = arith.constant 0 : index
    %22 = vector.load %arg9[%c0_25, %c0_26, %c0_27] : memref<9x2x4xf32, #tpu.memory_space<vmem>>, vector<9x2x4xf32>
    tpu.vector_store %arg9[%c0_25, %c0_26, %c0_27], %21 {strides = array<i32>} : memref<9x2x4xf32, #tpu.memory_space<vmem>>, vector<9x2x4xf32>,
    return
  }
  func.func @transform_0(%arg0: i32) -> (i32, i32, i32) {
    %c0_i32 = arith.constant 0 : i32
    %c0_i32_0 = arith.constant 0 : i32
    %c0_i32_1 = arith.constant 0 : i32
    return %arg0, %c0_i32, %c0_i32_0 : i32, i32, i32
  }
  func.func @transform_1(%arg0: i32) -> (i32, i32, i32) {
    %c0_i32 = arith.constant 0 : i32
    %c0_i32_0 = arith.constant 0 : i32
    %c0_i32_1 = arith.constant 0 : i32
    return %arg0, %c0_i32, %c0_i32_0 : i32, i32, i32
  }
  func.func @transform_2(%arg0: i32) -> (i32, i32, i32) {
    %c0_i32 = arith.constant 0 : i32
    %c0_i32_0 = arith.constant 0 : i32
    %c0_i32_1 = arith.constant 0 : i32
    return %arg0, %c0_i32, %c0_i32_0 : i32, i32, i32
  }
  func.func @transform_3(%arg0: i32) -> (i32, i32, i32) {
    %c0_i32 = arith.constant 0 : i32
    %c0_i32_0 = arith.constant 0 : i32
    %c0_i32_1 = arith.constant 0 : i32
    return %arg0, %c0_i32, %c0_i32_0 : i32, i32, i32
  }
  func.func @transform_4(%arg0: i32) -> (i32, i32, i32) {
    %c0_i32 = arith.constant 0 : i32
    %c0_i32_0 = arith.constant 0 : i32
    %c0_i32_1 = arith.constant 0 : i32
    return %arg0, %c0_i32, %c0_i32_0 : i32, i32, i32
  }
  func.func @transform_5(%arg0: i32) -> (i32, i32, i32) {
    %c0_i32 = arith.constant 0 : i32
    %c0_i32_0 = arith.constant 0 : i32
    %c0_i32_1 = arith.constant 0 : i32
    return %arg0, %c0_i32, %c0_i32_0 : i32, i32, i32
  }
  func.func @transform_6(%arg0: i32) -> (i32, i32, i32) {
    %c0_i32 = arith.constant 0 : i32
    %c0_i32_0 = arith.constant 0 : i32
    %c0_i32_1 = arith.constant 0 : i32
    return %arg0, %c0_i32, %c0_i32_0 : i32, i32, i32
  }
  func.func @transform_7(%arg0: i32) -> (i32, i32, i32) {
    %c0_i32 = arith.constant 0 : i32
    %c0_i32_0 = arith.constant 0 : i32
    %c0_i32_1 = arith.constant 0 : i32
    return %arg0, %c0_i32, %c0_i32_0 : i32, i32, i32
  }
  func.func @transform_8(%arg0: i32) -> (i32, i32, i32) {
    %c0_i32 = arith.constant 0 : i32
    %c0_i32_0 = arith.constant 0 : i32
    %c0_i32_1 = arith.constant 0 : i32
    return %arg0, %c0_i32, %c0_i32_0 : i32, i32, i32
  }
}

</mosaic_0001>

<bundles_post_ra>
// kernel: cost_tcn_encoder_forward.8
= control target key start
LH: loop header
LB: loop body
LE: loop exit
PB: predicated region body
PF: predicated region fallthrough
CT: control target
= control target key end

     0   :  { %v173_v0 = vmov 0   ;;  %vm71_vm4 = vcmask 1041408   ;;  %vm64_vm9 = vcmask 31744   ;;  %vm148_vm10 = vcmask 130048   ;;  %s241_s3 = inlined_call_operand.vmem [shape: f32[32,1], index: 3, kind: input, shape index: {}]   ;;  %s242_s1 = inlined_call_operand.vmem [shape: bf16[4,16], index: 1, kind: input, shape index: {}]   ;;  %s243_s0 = inlined_call_operand.vmem [shape: f32[32,4], index: 0, kind: input, shape index: {}]   ;;  %s244_s2 = inlined_call_operand.vmem [shape: f32[1,16], index: 2, kind: input, shape index: {}]   ;;  %s245_s4 = inlined_call_operand.vmem [shape: f32[32,16], index: 4, kind: output, shape index: {}]  }
   0x1   :  { %172 = vset.pattern.permute.xlu1 %v173_v0  ;;  %171 = vset.pattern.permute.xlu0 %v173_v0  ;;  %v20_v1 = vld [vmem:[%s241_s3 + $0x10] sm:$0xff]  ;;  %v18_v2 = vld [vmem:[%s241_s3] sm:$0xff]  ;;  %v21_v3 = vld [vmem:[%s241_s3 + $0x18] sm:$0xff] }
   0x2   :  { %vm24_vm0 = vcmp.gt.f32.partialorder %v20_v1, 0.0  ;;  %vm22_vm1 = vcmp.gt.f32.partialorder %v18_v2, 0.0  ;;  %vm25_vm2 = vcmp.gt.f32.partialorder %v21_v3, 0.0  ;;  %v19_v4 = vld [vmem:[%s241_s3 + $0x8] sm:$0xff]  ;;  %v56_v9 = vld [vmem:[%s242_s1] sm:$0x3] }
   0x3   :  { %v32_v5 = vsel %vm24_vm0, 1, %v173_v0  ;;  %v30_v6 = vsel %vm22_vm1, 1, %v173_v0  ;;  %vm23_vm3 = vcmp.gt.f32.partialorder %v19_v4, 0.0  ;;  %v33_v7 = vsel %vm25_vm2, 1, %v173_v0  ;;  %169 = vmatprep.subr.msk.bf16.mxu0 %vm71_vm4, %v56_v9  ;;  %v28_v13 = vld [vmem:[%s243_s0 + $0x10] sm:$0xff]  ;;  %v26_v14 = vld [vmem:[%s243_s0] sm:$0xff] }
   0x4   :  { %41 = vperm.xlu1 %172, %v32_v5   ;;  %35 = vperm.xlu0 %171, %v30_v6   ;;  %v31_v8 = vsel %vm23_vm3, 1, %v173_v0  ;;  %v73_v10 = vsel %vm71_vm4, %v56_v9, 0  ;;  %v29_v15 = vld [vmem:[%s243_s0 + $0x18] sm:$0xff]  ;;  %v27_v16 = vld [vmem:[%s243_s0 + $0x8] sm:$0xff]  ;;  %v157_v27 = vld [vmem:[%s244_s2] ss:$0 sm:$0xff] }
   0x5   :  { %164 = vmatpush3.bf16.msra.mxu0 %v73_v10 }
   0x8   :  { %44 = vperm.xlu1 %172, %v33_v7   ;;  %38 = vperm.xlu0 %171, %v31_v8  }
   0xc   :  { %131 = vperm.xlu1 %172, %v19_v4   ;;  %126 = vperm.xlu0 %171, %v18_v2  }
  0x10   :  { %141 = vperm.xlu1 %172, %v21_v3   ;;  %136 = vperm.xlu0 %171, %v20_v1  }
  0x83   :  { %v42_v11 = vpop.permute.xlu1 %41  ;;  %v36_v12 = vpop.permute.xlu0 %35 }
  0x84   :  { %vm48_vm5 = vcmp.eq.s32.totalorder %v42_v11, 1  ;;  %vm46_vm6 = vcmp.eq.s32.totalorder %v36_v12, 1 }
  0x85   :  { %v52_v19 = vsel %vm48_vm5, %v28_v13, 0.0  ;;  %v50_v20 = vsel %vm46_vm6, %v26_v14, 0.0 }
  0x87   :  { %v45_v17 = vpop.permute.xlu1 %44  ;;  %v39_v18 = vpop.permute.xlu0 %38 }
  0x88   :  { %vm49_vm7 = vcmp.eq.s32.totalorder %v45_v17, 1  ;;  %vm47_vm8 = vcmp.eq.s32.totalorder %v39_v18, 1 }
  0x89   :  { %v53_v21 = vsel %vm49_vm7, %v29_v15, 0.0  ;;  %v51_v22 = vsel %vm47_vm8, %v27_v16, 0.0 }
  0x8a   :  { %v55_v23 = vpack.c.bf16 %v53_v21, %v52_v19  ;;  %v54_v24 = vpack.c.bf16 %v51_v22, %v50_v20 }
  0x8b   :  { %v127_v25 = vpop.permute.xlu0 %126  ;;  %v132_v26 = vpop.permute.xlu1 %131 }
  0x8c   :  { %165 = vmatprep.mubr.msk.bf16.mxu0 %vm64_vm9, %v54_v24 }
  0x8d   :  { %166 = vmatmul.mubr.msk.bf16.vlgmr.msra.gmra.mrb[0].mxu0 %vm64_vm9, %v55_v23 }
  0x8f   :  { %v137_v31 = vpop.permute.xlu0 %136  ;;  %v142_v37 = vpop.permute.xlu1 %141 }
 0x160   :  { %v167_v28 = vpop.f32.mrb[0].mxu0 }
 0x161   :  { %v118_v29 = vadd.f32 %v167_v28, %v157_v27  ;;  %v109_v30 = vpop.f32.mrb[1].mxu0 }
 0x162   :  { %v110_v32 = vadd.f32 %v157_v27, %v109_v30  ;;  %v168_v33 = vpop.f32.mrb[2].mxu0 }
 0x163   :  { %v146_v34 = vmul.f32 %v137_v31, %v118_v29  ;;  %v121_v35 = vadd.f32 %v168_v33, %v157_v27  ;;  %v112_v36 = vpop.f32.mrb[3].mxu0 }
 0x164   :  { %v144_v38 = vmul.f32 %v127_v25, %v110_v32  ;;  %v113_v39 = vadd.f32 %v157_v27, %v112_v36 }
 0x165   :  { %151 = vst.msk [vmem:[%s245_s4 + $0x10] sm:$0xff] %vm148_vm10, %v146_v34  ;;  %v147_v40 = vmul.f32 %v142_v37, %v121_v35 }
 0x166   :  { %149 = vst.msk [vmem:[%s245_s4] sm:$0xff] %vm148_vm10, %v144_v38  ;;  %v145_v41 = vmul.f32 %v132_v26, %v113_v39 }
 0x167   :  { %152 = vst.msk [vmem:[%s245_s4 + $0x18] sm:$0xff] %vm148_vm10, %v147_v40 }
 0x168   :  { %150 = vst.msk [vmem:[%s245_s4 + $0x8] sm:$0xff] %vm148_vm10, %v145_v41 }

// kernel: cost_tcn_encoder_forward.10
= control target key start
LH: loop header
LB: loop body
LE: loop exit
PB: predicated region body
PF: predicated region fallthrough
CT: control target
= control target key end

     0   :  { %s811_s18 = smov 0   ;;  %s913_s0 = inlined_call_operand.vmem [shape: f32[2,16,16], index: 0, kind: input, shape index: {}]   ;;  %s914_s1 = inlined_call_operand.vmem [shape: bf16[3,16,16], index: 1, kind: input, shape index: {}]   ;;  %s915_s2 = inlined_call_operand.vmem [shape: f32[1,16], index: 2, kind: input, shape index: {}]   ;;  %s916_s3 = inlined_call_operand.vmem [shape: bf16[3,16,16], index: 3, kind: input, shape index: {}]   ;;  %s917_s4 = inlined_call_operand.vmem [shape: f32[1,16], index: 4, kind: input, shape index: {}]   ;;  %s918_s5 = inlined_call_operand.vmem [shape: f32[2,16,16], index: 5, kind: output, shape index: {}]  }
   0x1 LB: > { %s672_s19 = sadd.s32 4294967295, %s777_s18   ;;  %p676_p0 = scmp.ge.s32.totalorder %s777_s18, 1  ;;  %s777_s18 = sphi %s811_s18, %s15_s18  }
   0x2   : > { %p187_p1 = scmp.lt.s32.totalorder %s777_s18, 3 }
   0x4   : > { %p188_p2 = pnand %p676_p0, %p187_p1 }
   0x5   : > { %v765_v0 = vld [vmem:[%s914_s1 + $0x8] sm:$0xff] (!%p188_p2)   ;;  %v779_v1 = vmov (!%p188_p2), 0.0   ;;  %v766_v2 = vld [vmem:[%s914_s1] sm:$0xff] (!%p188_p2)   ;;  %vm780_vm0 = vmmov (!%p188_p2), 0   ;;  %p215_p3 = scmp.lt.s32.totalorder (!%p188_p2), %s672_s19, 1  ;;  %vm228_vm1 = vcmask (!%p188_p2), 130048  }
   0x6   : > { %191 = sbr.rel (%p188_p2) target bundleno = 504 (0x1f8), region = 40  ;;  %719 = vmatprep.subr.bf16.mxu0 (!%p188_p2), %v779_v1  ;;  %725 = vmatprep.subr.bf16.mxu1 (!%p188_p2), %v779_v1  ;;  %229 = vst.msk [vmem:[#allocation2] sm:$0xff] (!%p188_p2), %vm228_vm1, %v779_v1  ;;  %230 = vst.msk [vmem:[#allocation2 + $0x8] sm:$0xff] (!%p188_p2), %vm228_vm1, %v779_v1  ;;  %vm247_vm2 = vcmask (!%p188_p2), 1044480   ;;  %vm301_vm3 = vcmask (!%p188_p2), 1045504   ;;  %v767_v14 = vld [vmem:[%s914_s1 + $0x10] sm:$0xff] (!%p188_p2)  }
   0x7   : > { %720 = vmatpush3.bf16.msra.mxu0 (!%p188_p2), %v765_v0  ;;  %721 = vmatprep.mubr.msk.bf16.mxu0 (!%p188_p2), %vm780_vm0, %v779_v1  ;;  %231 = vst.msk [vmem:[#allocation2 + $0x10] sm:$0xff] (!%p188_p2), %vm228_vm1, %v779_v1  ;;  %421 = vst.msk [vmem:[#allocation3] sm:$0xff] (!%p188_p2), %vm228_vm1, %v779_v1  ;;  %v768_v18 = vld [vmem:[%s916_s3 + $0x8] sm:$0xff] (!%p188_p2)   ;;  %v769_v19 = vld [vmem:[%s916_s3] sm:$0xff] (!%p188_p2)  }
   0x8   : > { %726 = vmatpush3.bf16.msra.mxu1 (!%p188_p2), %v766_v2  ;;  %727 = vmatprep.mubr.msk.bf16.mxu1 (!%p188_p2), %vm780_vm0, %v779_v1  ;;  %422 = vst.msk [vmem:[#allocation3 + $0x8] sm:$0xff] (!%p188_p2), %vm228_vm1, %v779_v1  ;;  %423 = vst.msk [vmem:[#allocation3 + $0x10] sm:$0xff] (!%p188_p2), %vm228_vm1, %v779_v1  ;;  %v691_v30 = vld [vmem:[%s915_s2] ss:$0 sm:$0xff] (!%p188_p2)  ;;  %v770_v50 = vld [vmem:[%s916_s3 + $0x10] sm:$0xff] (!%p188_p2)  }
   0x9   : > { %731 = vmatprep.subr.bf16.mxu0 (!%p188_p2), %v779_v1  ;;  %737 = vmatprep.subr.bf16.mxu1 (!%p188_p2), %v779_v1  ;;  %v702_v0 = vld [vmem:[%s917_s4] ss:$0 sm:$0xff] (!%p188_p2) }
   0xd   : > { %s920_s19 = smov (!%p215_p3, %s672_s19), 1  ;;  %v234_v5 = vld [vmem:[#allocation2] sm:$0xff] }
   0xe   : > { %s705_s24 = sshll.u32 %s920_s19, 4  ;;  %v426_v41 = vld [vmem:[#allocation3] sm:$0xff] }
   0xf   : > { %s219_s27 = scalar_lea.vmem %s913_s0, %s705_s24  ;;  %s224_s17 = scalar_lea.vmem %s918_s5, %s705_s24 }
  0x10   : > { %v853_v3 = vld [vmem:[%s219_s27] sm:$0xff]  ;;  %v855_v4 = vld [vmem:[%s219_s27 + $0x8] sm:$0xff] }
  0x11   : > { %232 = vst.msk [vmem:[#allocation2 + $0x8] sm:$0xff] %vm228_vm1, %v853_v3  ;;  %233 = vst.msk [vmem:[#allocation2 + $0x10] sm:$0xff] %vm228_vm1, %v855_v4 }
  0x18   : > { %v235_v6 = vld [vmem:[#allocation2 + $0x8] sm:$0xff]  ;;  %v236_v7 = vld [vmem:[#allocation2 + $0x10] sm:$0xff] }
  0x19   : > { %v238_v8 = vpack.c.bf16 %v235_v6, %v234_v5  ;;  %v239_v9 = vpack.c.bf16 %v236_v7, %v236_v7  ;;  %v355_v17 = vpack.c.bf16 %v236_v7, %v235_v6 }
  0x1b   : > { %v248_v10 = vrot.slane %v238_v8, 3  ;;  %v249_v11 = vrot.slane %v239_v9, 3  ;;  %v302_v12 = vrot.slane %v238_v8, 2  ;;  %v303_v13 = vrot.slane %v239_v9, 2 }
  0x1d   : > { %v250_v15 = vsel %vm247_vm2, %v248_v10, %v249_v11  ;;  %v304_v16 = vsel %vm301_vm3, %v302_v12, %v303_v13 }
  0x1e   : > { %722 = vmatmul.mubr.msk.bf16.vlgmr.msra.gmra.mrb[0].mxu0 %vm228_vm1, %v250_v15  ;;  %728 = vmatmul.mubr.msk.bf16.vlgmr.msra.gmra.mrb[0].mxu1 %vm228_vm1, %v304_v16 }
  0x1f   : > { %732 = vmatpush3.bf16.msra.mxu0 %v767_v14  ;;  %733 = vmatprep.mubr.msk.bf16.mxu0 %vm780_vm0, %v779_v1 }
  0x20   : > { %743 = vmatprep.subr.bf16.mxu0 %v779_v1  ;;  %739 = vmatprep.mubr.msk.bf16.mxu1 %vm780_vm0, %v779_v1 }
  0x21   : > { %738 = vmatpush3.bf16.msra.mxu1 %v768_v18 }
  0x22   : > { %749 = vmatprep.subr.bf16.mxu1 %v779_v1 }
  0x26   : > { %734 = vmatmul.mubr.msk.bf16.vlgmr.msra.gmra.mrb[4].mxu0 %vm228_vm1, %v355_v17 }
  0x27   : > { %745 = vmatprep.mubr.msk.bf16.mxu0 %vm780_vm0, %v779_v1  ;;  %744 = vmatpush3.bf16.msra.mxu0 %v769_v19 }
  0xf1   : > { %v294_v20 = vpop.f32.mrb[0].mxu0  ;;  %v348_v21 = vpop.f32.mrb[0].mxu1 }
  0xf2   : > { %v349_v22 = vadd.f32 %v348_v21, %v294_v20  ;;  %v723_v23 = vpop.f32.mrb[1].mxu0  ;;  %v729_v24 = vpop.f32.mrb[1].mxu1 }
  0xf3   : > { %v297_v25 = vpop.f32.mrb[2].mxu0  ;;  %v351_v26 = vpop.f32.mrb[2].mxu1 }
  0xf4   : > { %v352_v27 = vadd.f32 %v351_v26, %v297_v25  ;;  %v724_v28 = vpop.f32.mrb[3].mxu0  ;;  %v730_v29 = vpop.f32.mrb[3].mxu1 }
  0xf9   : > { %v402_v31 = vpop.f32.mrb[4].mxu0 }
  0xfa   : > { %v409_v32 = vadd.f32 %v402_v31, %v349_v22  ;;  %v735_v33 = vpop.f32.mrb[5].mxu0 }
  0xfb   : > { %v405_v34 = vpop.f32.mrb[6].mxu0 }
  0xfc   : > { %v417_v35 = vadd.f32 %v691_v30, %v409_v32  ;;  %v410_v36 = vadd.f32 %v405_v34, %v352_v27  ;;  %v736_v37 = vpop.f32.mrb[7].mxu0 }
  0xfe   : > { %v419_v38 = vmax.f32 %v417_v35, 0.0  ;;  %v418_v39 = vadd.f32 %v691_v30, %v410_v36 }
 0x100   : > { %424 = vst.msk [vmem:[#allocation3 + $0x8] sm:$0xff] %vm228_vm1, %v419_v38  ;;  %v420_v40 = vmax.f32 %v418_v39, 0.0 }
 0x102   : > { %425 = vst.msk [vmem:[#allocation3 + $0x10] sm:$0xff] %vm228_vm1, %v420_v40 }
 0x107   : > { %v427_v42 = vld [vmem:[#allocation3 + $0x8] sm:$0xff] }
 0x108   : > { %v430_v43 = vpack.c.bf16 %v427_v42, %v426_v41 }
 0x109   : > { %v428_v44 = vld [vmem:[#allocation3 + $0x10] sm:$0xff] }
 0x10a   : > { %v431_v45 = vpack.c.bf16 %v428_v44, %v428_v44  ;;  %v439_v46 = vrot.slane %v430_v43, 3  ;;  %v492_v48 = vrot.slane %v430_v43, 2  ;;  %v545_v53 = vpack.c.bf16 %v428_v44, %v427_v42 }
 0x10c   : > { %v440_v47 = vrot.slane %v431_v45, 3  ;;  %v493_v49 = vrot.slane %v431_v45, 2 }
 0x10e   : > { %v441_v51 = vsel %vm247_vm2, %v439_v46, %v440_v47  ;;  %v494_v52 = vsel %vm301_vm3, %v492_v48, %v493_v49 }
 0x10f   : > { %740 = vmatmul.mubr.msk.bf16.vlgmr.msra.gmra.mrb[4].mxu1 %vm228_vm1, %v441_v51  ;;  %746 = vmatmul.mubr.msk.bf16.vlgmr.msra.gmra.mrb[8].mxu0 %vm228_vm1, %v494_v52 }
 0x110   : > { %750 = vmatpush3.bf16.msra.mxu1 %v770_v50  ;;  %751 = vmatprep.mubr.msk.bf16.mxu1 %vm780_vm0, %v779_v1 }
 0x117   : > { %752 = vmatmul.mubr.msk.bf16.vlgmr.msra.gmra.mrb[8].mxu1 %vm228_vm1, %v545_v53 }
 0x1e2   : > { %v485_v54 = vpop.f32.mrb[4].mxu1  ;;  %v538_v55 = vpop.f32.mrb[8].mxu0 }
 0x1e3   : > { %v539_v56 = vadd.f32 %v538_v55, %v485_v54  ;;  %v741_v57 = vpop.f32.mrb[5].mxu1  ;;  %v747_v58 = vpop.f32.mrb[9].mxu0 }
 0x1e4   : > { %v488_v59 = vpop.f32.mrb[6].mxu1  ;;  %v541_v60 = vpop.f32.mrb[10].mxu0 }
 0x1e5   : > { %v542_v61 = vadd.f32 %v541_v60, %v488_v59  ;;  %v742_v62 = vpop.f32.mrb[7].mxu1  ;;  %v748_v63 = vpop.f32.mrb[11].mxu0 }
 0x1ea   : > { %v592_v2 = vpop.f32.mrb[8].mxu1 }
 0x1eb   : > { %v599_v1 = vadd.f32 %v592_v2, %v539_v56  ;;  %v753_v5 = vpop.f32.mrb[9].mxu1 }
 0x1ec   : > { %v595_v6 = vpop.f32.mrb[10].mxu1 }
 0x1ed   : > { %v607_v7 = vadd.f32 %v702_v0, %v599_v1  ;;  %v600_v8 = vadd.f32 %v595_v6, %v542_v61  ;;  %v754_v9 = vpop.f32.mrb[11].mxu1 }
 0x1ef   : > { %v609_v10 = vmax.f32 %v607_v7, 0.0  ;;  %v608_v11 = vadd.f32 %v702_v0, %v600_v8 }
 0x1f1   : > { %v611_v12 = vadd.f32 %v609_v10, %v853_v3  ;;  %v610_v13 = vmax.f32 %v608_v11, 0.0 }
 0x1f3   : > { %v613_v14 = vmax.f32 %v611_v12, 0.0  ;;  %v612_v15 = vadd.f32 %v610_v13, %v855_v4 }
 0x1f5   : > { %615 = vst.msk [vmem:[%s224_s17] sm:$0xff] %vm228_vm1, %v613_v14  ;;  %v614_v16 = vmax.f32 %v612_v15, 0.0 }
 0x1f7   : > { %616 = vst.msk [vmem:[%s224_s17 + $0x8] sm:$0xff] %vm228_vm1, %v614_v16 }
 0x1f8 PF: > { %s15_s18 = sadd.s32 1, %s777_s18  }
 0x1f9   : > { %p12_p4 = scmp.ge.s32.totalorder %s15_s18, 4  }
 0x1fb   :  { %14 = sbr.rel (!%p12_p4) target bundleno = 1 (0x1), region = 74 }

// kernel: cost_tcn_encoder_forward.9
= control target key start
LH: loop header
LB: loop body
LE: loop exit
PB: predicated region body
PF: predicated region fallthrough
CT: control target
= control target key end

     0   :  { %s839_s18 = smov 0   ;;  %s941_s0 = inlined_call_operand.vmem [shape: f32[2,16,16], index: 0, kind: input, shape index: {}]   ;;  %s942_s1 = inlined_call_operand.vmem [shape: bf16[3,16,16], index: 1, kind: input, shape index: {}]   ;;  %s943_s2 = inlined_call_operand.vmem [shape: f32[1,16], index: 2, kind: input, shape index: {}]   ;;  %s944_s3 = inlined_call_operand.vmem [shape: bf16[3,16,16], index: 3, kind: input, shape index: {}]   ;;  %s945_s4 = inlined_call_operand.vmem [shape: f32[1,16], index: 4, kind: input, shape index: {}]   ;;  %s946_s5 = inlined_call_operand.vmem [shape: f32[2,16,16], index: 5, kind: output, shape index: {}]  }
   0x1 LB: > { %s700_s19 = sadd.s32 4294967295, %s805_s18   ;;  %p704_p0 = scmp.ge.s32.totalorder %s805_s18, 1  ;;  %s805_s18 = sphi %s839_s18, %s15_s18  }
   0x2   : > { %p187_p1 = scmp.lt.s32.totalorder %s805_s18, 3 }
   0x4   : > { %p188_p2 = pnand %p704_p0, %p187_p1 }
   0x5   : > { %v793_v0 = vld [vmem:[%s942_s1 + $0x8] sm:$0xff] (!%p188_p2)   ;;  %v807_v1 = vmov (!%p188_p2), 0.0   ;;  %v794_v2 = vld [vmem:[%s942_s1] sm:$0xff] (!%p188_p2)   ;;  %vm808_vm0 = vmmov (!%p188_p2), 0   ;;  %p215_p3 = scmp.lt.s32.totalorder (!%p188_p2), %s700_s19, 1  ;;  %vm228_vm1 = vcmask (!%p188_p2), 130048  }
   0x6   : > { %191 = sbr.rel (%p188_p2) target bundleno = 513 (0x201), region = 40  ;;  %747 = vmatprep.subr.bf16.mxu0 (!%p188_p2), %v807_v1  ;;  %753 = vmatprep.subr.bf16.mxu1 (!%p188_p2), %v807_v1  ;;  %229 = vst.msk [vmem:[#allocation2] sm:$0xff] (!%p188_p2), %vm228_vm1, %v807_v1  ;;  %230 = vst.msk [vmem:[#allocation2 + $0x8] sm:$0xff] (!%p188_p2), %vm228_vm1, %v807_v1  ;;  %vm315_vm2 = vcmask (!%p188_p2), 1044480   ;;  %vm245_vm3 = vsmask.f32 (!%p188_p2), 4352 }
   0x7   : > { %748 = vmatpush3.bf16.msra.mxu0 (!%p188_p2), %v793_v0  ;;  %749 = vmatprep.mubr.msk.bf16.mxu0 (!%p188_p2), %vm808_vm0, %v807_v1  ;;  %231 = vst.msk [vmem:[#allocation2 + $0x10] sm:$0xff] (!%p188_p2), %vm228_vm1, %v807_v1  ;;  %435 = vst.msk [vmem:[#allocation3] sm:$0xff] (!%p188_p2), %vm228_vm1, %v807_v1  ;;  %v795_v23 = vld [vmem:[%s942_s1 + $0x10] sm:$0xff] (!%p188_p2)   ;;  %v796_v26 = vld [vmem:[%s944_s3 + $0x8] sm:$0xff] (!%p188_p2)  }
   0x8   : > { %754 = vmatpush3.bf16.msra.mxu1 (!%p188_p2), %v794_v2  ;;  %755 = vmatprep.mubr.msk.bf16.mxu1 (!%p188_p2), %vm808_vm0, %v807_v1  ;;  %436 = vst.msk [vmem:[#allocation3 + $0x8] sm:$0xff] (!%p188_p2), %vm228_vm1, %v807_v1  ;;  %437 = vst.msk [vmem:[#allocation3 + $0x10] sm:$0xff] (!%p188_p2), %vm228_vm1, %v807_v1  ;;  %v797_v27 = vld [vmem:[%s944_s3] sm:$0xff] (!%p188_p2)  }
   0x9   : > { %759 = vmatprep.subr.bf16.mxu0 (!%p188_p2), %v807_v1  ;;  %765 = vmatprep.subr.bf16.mxu1 (!%p188_p2), %v807_v1  ;;  %v719_v38 = vld [vmem:[%s943_s2] ss:$0 sm:$0xff] (!%p188_p2) }
   0xd   : > { %s948_s19 = smov (!%p215_p3, %s700_s19), 1  ;;  %v234_v5 = vld [vmem:[#allocation2] sm:$0xff] }
   0xe   : > { %s733_s24 = sshll.u32 %s948_s19, 4  ;;  %v440_v49 = vld [vmem:[#allocation3] sm:$0xff] }
   0xf   : > { %s219_s27 = scalar_lea.vmem %s941_s0, %s733_s24  ;;  %s224_s17 = scalar_lea.vmem %s946_s5, %s733_s24 }
  0x10   : > { %v881_v3 = vld [vmem:[%s219_s27] sm:$0xff]  ;;  %v883_v4 = vld [vmem:[%s219_s27 + $0x8] sm:$0xff] }
  0x11   : > { %232 = vst.msk [vmem:[#allocation2 + $0x8] sm:$0xff] %vm228_vm1, %v881_v3  ;;  %233 = vst.msk [vmem:[#allocation2 + $0x10] sm:$0xff] %vm228_vm1, %v883_v4 }
  0x18   : > { %v235_v6 = vld [vmem:[#allocation2 + $0x8] sm:$0xff]  ;;  %v236_v7 = vld [vmem:[#allocation2 + $0x10] sm:$0xff] }
  0x19   : > { %v238_v8 = vpack.c.bf16 %v235_v6, %v234_v5  ;;  %v239_v9 = vpack.c.bf16 %v236_v7, %v236_v7  ;;  %v369_v25 = vpack.c.bf16 %v236_v7, %v235_v6  ;;  %v798_v6 = vld [vmem:[%s944_s3 + $0x10] sm:$0xff]  }
  0x1b   : > { %v247_v10 = vshrl.u32 %v238_v8, 16  ;;  %v250_v11 = vshll.u32 %v238_v8, 16  ;;  %v255_v12 = vshrl.u32 %v239_v9, 16  ;;  %v258_v13 = vshll.u32 %v239_v9, 16 }
  0x1c   : > { %v316_v14 = vrot.slane %v238_v8, 3  ;;  %v317_v15 = vrot.slane %v239_v9, 3 }
  0x1d   : > { %v249_v16 = vrot.slane %v247_v10, 3  ;;  %v252_v17 = vrot.slane %v250_v11, 4  ;;  %v257_v18 = vrot.slane %v255_v12, 3  ;;  %v260_v19 = vrot.slane %v258_v13, 4 }
  0x1e   : > { %v318_v20 = vsel %vm315_vm2, %v316_v14, %v317_v15 }
  0x1f   : > { %v253_v21 = vor.u32 %v252_v17, %v249_v16  ;;  %v261_v22 = vor.u32 %v260_v19, %v257_v18  ;;  %756 = vmatmul.mubr.msk.bf16.vlgmr.msra.gmra.mrb[0].mxu1 %vm228_vm1, %v318_v20  ;;  %v730_v19 = vld [vmem:[%s945_s4] ss:$0 sm:$0xff] }
  0x20   : > { %767 = vmatprep.mubr.msk.bf16.mxu1 %vm808_vm0, %v807_v1  ;;  %766 = vmatpush3.bf16.msra.mxu1 %v796_v26 }
  0x21   : > { %v262_v24 = vsel %vm245_vm3, %v253_v21, %v261_v22  ;;  %777 = vmatprep.subr.bf16.mxu1 %v807_v1 }
  0x22   : > { %750 = vmatmul.mubr.msk.bf16.vlgmr.msra.gmra.mrb[0].mxu0 %vm228_vm1, %v262_v24 }
  0x23   : > { %760 = vmatpush3.bf16.msra.mxu0 %v795_v23  ;;  %761 = vmatprep.mubr.msk.bf16.mxu0 %vm808_vm0, %v807_v1 }
  0x24   : > { %771 = vmatprep.subr.bf16.mxu0 %v807_v1 }
  0x2a   : > { %762 = vmatmul.mubr.msk.bf16.vlgmr.msra.gmra.mrb[4].mxu0 %vm228_vm1, %v369_v25 }
  0x2b   : > { %773 = vmatprep.mubr.msk.bf16.mxu0 %vm808_vm0, %v807_v1  ;;  %772 = vmatpush3.bf16.msra.mxu0 %v797_v27 }
  0xf2   : > { %v362_v28 = vpop.f32.mrb[0].mxu1 }
  0xf3   : > { %v757_v29 = vpop.f32.mrb[1].mxu1 }
  0xf4   : > { %v365_v30 = vpop.f32.mrb[2].mxu1 }
  0xf5   : > { %v306_v31 = vpop.f32.mrb[0].mxu0  ;;  %v758_v32 = vpop.f32.mrb[3].mxu1 }
  0xf6   : > { %v363_v33 = vadd.f32 %v362_v28, %v306_v31  ;;  %v751_v34 = vpop.f32.mrb[1].mxu0 }
  0xf7   : > { %v309_v35 = vpop.f32.mrb[2].mxu0 }
  0xf8   : > { %v366_v36 = vadd.f32 %v365_v30, %v309_v35  ;;  %v752_v37 = vpop.f32.mrb[3].mxu0 }
  0xfd   : > { %v416_v39 = vpop.f32.mrb[4].mxu0 }
  0xfe   : > { %v423_v40 = vadd.f32 %v416_v39, %v363_v33  ;;  %v763_v41 = vpop.f32.mrb[5].mxu0 }
  0xff   : > { %v419_v42 = vpop.f32.mrb[6].mxu0 }
 0x100   : > { %v431_v43 = vadd.f32 %v719_v38, %v423_v40  ;;  %v424_v44 = vadd.f32 %v419_v42, %v366_v36  ;;  %v764_v45 = vpop.f32.mrb[7].mxu0 }
 0x102   : > { %v433_v46 = vmax.f32 %v431_v43, 0.0  ;;  %v432_v47 = vadd.f32 %v719_v38, %v424_v44 }
 0x104   : > { %438 = vst.msk [vmem:[#allocation3 + $0x8] sm:$0xff] %vm228_vm1, %v433_v46  ;;  %v434_v48 = vmax.f32 %v432_v47, 0.0 }
 0x106   : > { %439 = vst.msk [vmem:[#allocation3 + $0x10] sm:$0xff] %vm228_vm1, %v434_v48 }
 0x10b   : > { %v441_v50 = vld [vmem:[#allocation3 + $0x8] sm:$0xff] }
 0x10c   : > { %v444_v51 = vpack.c.bf16 %v441_v50, %v440_v49 }
 0x10d   : > { %v442_v52 = vld [vmem:[#allocation3 + $0x10] sm:$0xff] }
 0x10e   : > { %v445_v53 = vpack.c.bf16 %v442_v52, %v442_v52  ;;  %v452_v54 = vshrl.u32 %v444_v51, 16  ;;  %v455_v55 = vshll.u32 %v444_v51, 16  ;;  %v520_v56 = vrot.slane %v444_v51, 3 }
 0x10f   : > { %v573_v8 = vpack.c.bf16 %v442_v52, %v441_v50 }
 0x110   : > { %v521_v57 = vrot.slane %v445_v53, 3  ;;  %v460_v58 = vshrl.u32 %v445_v53, 16  ;;  %v454_v59 = vrot.slane %v452_v54, 3  ;;  %v457_v60 = vrot.slane %v455_v55, 4 }
 0x111   : > { %v463_v61 = vshll.u32 %v445_v53, 16 }
 0x112   : > { %v522_v62 = vsel %vm315_vm2, %v520_v56, %v521_v57  ;;  %v462_v63 = vrot.slane %v460_v58, 3  ;;  %v458_v2 = vor.u32 %v457_v60, %v454_v59 }
 0x113   : > { %774 = vmatmul.mubr.msk.bf16.vlgmr.msra.gmra.mrb[8].mxu0 %vm228_vm1, %v522_v62  ;;  %v465_v0 = vrot.slane %v463_v61, 4 }
 0x115   : > { %v466_v5 = vor.u32 %v465_v0, %v462_v63 }
 0x117   : > { %v467_v7 = vsel %vm245_vm3, %v458_v2, %v466_v5 }
 0x118   : > { %768 = vmatmul.mubr.msk.bf16.vlgmr.msra.gmra.mrb[4].mxu1 %vm228_vm1, %v467_v7 }
 0x119   : > { %778 = vmatpush3.bf16.msra.mxu1 %v798_v6  ;;  %779 = vmatprep.mubr.msk.bf16.mxu1 %vm808_vm0, %v807_v1 }
 0x120   : > { %780 = vmatmul.mubr.msk.bf16.vlgmr.msra.gmra.mrb[8].mxu1 %vm228_vm1, %v573_v8 }
 0x1e6   : > { %v566_v9 = vpop.f32.mrb[8].mxu0 }
 0x1e7   : > { %v775_v10 = vpop.f32.mrb[9].mxu0 }
 0x1e8   : > { %v569_v11 = vpop.f32.mrb[10].mxu0 }
 0x1e9   : > { %v776_v12 = vpop.f32.mrb[11].mxu0 }
 0x1eb   : > { %v511_v13 = vpop.f32.mrb[4].mxu1 }
 0x1ec   : > { %v567_v14 = vadd.f32 %v566_v9, %v511_v13  ;;  %v769_v15 = vpop.f32.mrb[5].mxu1 }
 0x1ed   : > { %v514_v16 = vpop.f32.mrb[6].mxu1 }
 0x1ee   : > { %v570_v17 = vadd.f32 %v569_v11, %v514_v16  ;;  %v770_v18 = vpop.f32.mrb[7].mxu1 }
 0x1f3   : > { %v620_v20 = vpop.f32.mrb[8].mxu1 }
 0x1f4   : > { %v627_v1 = vadd.f32 %v620_v20, %v567_v14  ;;  %v781_v21 = vpop.f32.mrb[9].mxu1 }
 0x1f5   : > { %v623_v22 = vpop.f32.mrb[10].mxu1 }
 0x1f6   : > { %v635_v23 = vadd.f32 %v730_v19, %v627_v1  ;;  %v628_v24 = vadd.f32 %v623_v22, %v570_v17  ;;  %v782_v25 = vpop.f32.mrb[11].mxu1 }
 0x1f8   : > { %v637_v26 = vmax.f32 %v635_v23, 0.0  ;;  %v636_v27 = vadd.f32 %v730_v19, %v628_v24 }
 0x1fa   : > { %v639_v28 = vadd.f32 %v637_v26, %v881_v3  ;;  %v638_v29 = vmax.f32 %v636_v27, 0.0 }
 0x1fc   : > { %v641_v30 = vmax.f32 %v639_v28, 0.0  ;;  %v640_v31 = vadd.f32 %v638_v29, %v883_v4 }
 0x1fe   : > { %643 = vst.msk [vmem:[%s224_s17] sm:$0xff] %vm228_vm1, %v641_v30  ;;  %v642_v32 = vmax.f32 %v640_v31, 0.0 }
 0x200   : > { %644 = vst.msk [vmem:[%s224_s17 + $0x8] sm:$0xff] %vm228_vm1, %v642_v32 }
 0x201 PF: > { %s15_s18 = sadd.s32 1, %s805_s18  }
 0x202   : > { %p12_p4 = scmp.ge.s32.totalorder %s15_s18, 4  }
 0x204   :  { %14 = sbr.rel (!%p12_p4) target bundleno = 1 (0x1), region = 74 }

// kernel: cost_tcn_encoder_forward.11
= control target key start
LH: loop header
LB: loop body
LE: loop exit
PB: predicated region body
PF: predicated region fallthrough
CT: control target
= control target key end

     0   :  { %s922_s24 = smov 0   ;;  %s1030_s0 = inlined_call_operand.vmem [shape: f32[2,16,16], index: 0, kind: input, shape index: {}]   ;;  %s1031_s1 = inlined_call_operand.vmem [shape: bf16[3,16,4], index: 1, kind: input, shape index: {}]   ;;  %s1032_s2 = inlined_call_operand.vmem [shape: f32[1,4], index: 2, kind: input, shape index: {}]   ;;  %s1033_s3 = inlined_call_operand.vmem [shape: bf16[3,4,4], index: 3, kind: input, shape index: {}]   ;;  %s1034_s4 = inlined_call_operand.vmem [shape: f32[1,4], index: 4, kind: input, shape index: {}]   ;;  %s1035_s5 = inlined_call_operand.vmem [shape: bf16[16,4], index: 5, kind: input, shape index: {}]   ;;  %s1036_s6 = inlined_call_operand.vmem [shape: f32[1,4], index: 6, kind: input, shape index: {}]   ;;  %s1037_s7 = inlined_call_operand.vmem [shape: f32[2,16,4], index: 7, kind: output, shape index: {}]  }
   0x1 LB: > { %s769_s25 = sadd.s32 4294967295, %s878_s24   ;;  %p773_p0 = scmp.ge.s32.totalorder %s878_s24, 1  ;;  %s878_s24 = sphi %s922_s24, %s17_s24  }
   0x2   : > { %p237_p1 = scmp.lt.s32.totalorder %s878_s24, 3 }
   0x4   : > { %p238_p2 = pnand %p773_p0, %p237_p1 }
   0x5   : > { %v868_v0 = vld [vmem:[%s1035_s5] sm:$0xff] (!%p238_p2)   ;;  %v880_v1 = vmov (!%p238_p2), 0.0   ;;  %p269_p3 = scmp.lt.s32.totalorder (!%p238_p2), %s769_s25, 1  ;;  %vm298_vm0 = vcmask (!%p238_p2), 130048   ;;  %v869_v2 = vld [vmem:[%s1031_s1 + $0x8] sm:$0xff] (!%p238_p2)   ;;  %vm881_vm1 = vmmov (!%p238_p2), 0  }
   0x6   : > { %241 = sbr.rel (%p238_p2) target bundleno = 504 (0x1f8), region = 48  ;;  %816 = vmatprep.subr.bf16.mxu0 (!%p238_p2), %v880_v1  ;;  %822 = vmatprep.subr.bf16.mxu1 (!%p238_p2), %v880_v1  ;;  %343 = vst.msk [vmem:[#allocation2] sm:$0xff] (!%p238_p2), %vm298_vm0, %v880_v1  ;;  %344 = vst.msk [vmem:[#allocation2 + $0x8] sm:$0xff] (!%p238_p2), %vm298_vm0, %v880_v1  ;;  %v870_v5 = vld [vmem:[%s1031_s1] sm:$0xff] (!%p238_p2)   ;;  %vm361_vm2 = vcmask (!%p238_p2), 1045504   ;;  %v871_v14 = vld [vmem:[%s1031_s1 + $0x10] sm:$0xff] (!%p238_p2)  }
   0x7   : > { %817 = vmatpush3.bf16.msra.mxu0 (!%p238_p2), %v868_v0  ;;  %818 = vmatprep.mubr.msk.bf16.mxu0 (!%p238_p2), %vm881_vm1, %v880_v1  ;;  %345 = vst.msk [vmem:[#allocation2 + $0x10] sm:$0xff] (!%p238_p2), %vm298_vm0, %v880_v1  ;;  %vm531_vm3 = vcmask (!%p238_p2), 31744   ;;  %v792_v17 = vld [vmem:[%s1033_s3 + $0x2] sm:$0x3] (!%p238_p2)  ;;  %vm554_vm4 = vcmask (!%p238_p2), 1041408  }
   0x8   : > { %823 = vmatpush3.bf16.msra.mxu1 (!%p238_p2), %v869_v2  ;;  %828 = vmatprep.subr.bf16.mxu0 (!%p238_p2), %v880_v1  ;;  %533 = vst.msk [vmem:[#allocation3 + $0x8] sm:$0xff] (!%p238_p2), %vm531_vm3, %v880_v1  ;;  %532 = vst.msk [vmem:[#allocation3] sm:$0xff] (!%p238_p2), %vm531_vm3, %v880_v1  ;;  %v542_v18 = vld [vmem:[%s1033_s3] sm:$0x3] (!%p238_p2)  ;;  %v556_v19 = vsel (!%p238_p2), %vm554_vm4, %v792_v17, 0 }
   0x9   : > { %824 = vmatprep.mubr.msk.bf16.mxu1 (!%p238_p2), %vm881_vm1, %v880_v1  ;;  %834 = vmatprep.subr.bf16.mxu1 (!%p238_p2), %v880_v1  ;;  %534 = vst.msk [vmem:[#allocation3 + $0x10] sm:$0xff] (!%p238_p2), %vm531_vm3, %v880_v1  ;;  %v603_v20 = vsel (!%p238_p2), %vm554_vm4, %v542_v18, 0  ;;  %v791_v35 = vld [vmem:[%s1032_s2] ss:$0 sm:$0xff] (!%p238_p2)  ;;  %v795_v51 = vld [vmem:[%s1033_s3 + $0x4] sm:$0x3] (!%p238_p2) }
   0xa   : > { %v653_v54 = vsel (!%p238_p2), %vm554_vm4, %v795_v51, 0 }
   0xd   : > { %s1039_s25 = smov (!%p269_p3, %s769_s25), 1  ;;  %v348_v7 = vld [vmem:[#allocation2] sm:$0xff] }
   0xe   : > { %s800_s30 = sshll.u32 %s1039_s25, 4 }
   0xf   : > { %s273_s10 = scalar_lea.vmem %s1030_s0, %s800_s30  ;;  %v537_v46 = vld [vmem:[#allocation3] sm:$0xff]  ;;  %s278_s9 = scalar_lea.vmem %s1037_s7, %s800_s30 }
  0x10   : > { %v280_v3 = vld [vmem:[%s273_s10] sm:$0xff]  ;;  %v281_v4 = vld [vmem:[%s273_s10 + $0x8] sm:$0xff] }
  0x11   : > { %v282_v6 = vpack.c.bf16 %v281_v4, %v280_v3  ;;  %346 = vst.msk [vmem:[#allocation2 + $0x8] sm:$0xff] %vm298_vm0, %v280_v3  ;;  %347 = vst.msk [vmem:[#allocation2 + $0x10] sm:$0xff] %vm298_vm0, %v281_v4  ;;  %v797_v4 = vld [vmem:[%s1034_s4] ss:$0 sm:$0xff] }
  0x13   : > { %819 = vmatmul.mubr.msk.bf16.vlgmr.msra.gmra.mrb[0].mxu0 %vm298_vm0, %v282_v6 }
  0x14   : > { %829 = vmatpush3.bf16.msra.mxu0 %v870_v5  ;;  %830 = vmatprep.mubr.msk.bf16.mxu0 %vm881_vm1, %v880_v1 }
  0x15   : > { %840 = vmatprep.subr.bf16.mxu0 %v880_v1 }
  0x18   : > { %v349_v8 = vld [vmem:[#allocation2 + $0x8] sm:$0xff]  ;;  %v350_v9 = vld [vmem:[#allocation2 + $0x10] sm:$0xff] }
  0x19   : > { %v352_v10 = vpack.c.bf16 %v349_v8, %v348_v7  ;;  %v355_v11 = vpack.c.bf16 %v350_v9, %v350_v9  ;;  %v465_v16 = vpack.c.bf16 %v350_v9, %v349_v8  ;;  %v778_v7 = vld [vmem:[%s1036_s6] ss:$0 sm:$0xff] }
  0x1b   : > { %v362_v12 = vrot.slane %v352_v10, 2  ;;  %v363_v13 = vrot.slane %v355_v11, 2  ;;  %831 = vmatmul.mubr.msk.bf16.vlgmr.msra.gmra.mrb[4].mxu0 %vm298_vm0, %v352_v10 }
  0x1c   : > { %842 = vmatprep.mubr.msk.bf16.mxu0 %vm881_vm1, %v880_v1  ;;  %841 = vmatpush3.bf16.msra.mxu0 %v556_v19 }
  0x1d   : > { %v364_v15 = vsel %vm361_vm2, %v362_v12, %v363_v13  ;;  %852 = vmatprep.subr.bf16.mxu0 %v880_v1 }
  0x1e   : > { %825 = vmatmul.mubr.msk.bf16.vlgmr.msra.gmra.mrb[0].mxu1 %vm298_vm0, %v364_v15 }
  0x1f   : > { %835 = vmatpush3.bf16.msra.mxu1 %v871_v14  ;;  %836 = vmatprep.mubr.msk.bf16.mxu1 %vm881_vm1, %v880_v1 }
  0x20   : > { %846 = vmatprep.subr.bf16.mxu1 %v880_v1 }
  0x26   : > { %837 = vmatmul.mubr.msk.bf16.vlgmr.msra.gmra.mrb[4].mxu1 %vm298_vm0, %v465_v16 }
  0x27   : > { %848 = vmatprep.mubr.msk.bf16.mxu1 %vm881_vm1, %v880_v1  ;;  %847 = vmatpush3.bf16.msra.mxu1 %v603_v20 }
  0xe6   : > { %v336_v21 = vpop.f32.mrb[0].mxu0 }
  0xe7   : > { %v820_v22 = vpop.f32.mrb[1].mxu0  ;;  %v337_v12 = vadd.f32 %v778_v7, %v336_v21 }
  0xe8   : > { %v996_v23 = vpop.f32.mrb[2].mxu0 }
  0xe9   : > { %v821_v24 = vpop.f32.mrb[3].mxu0  ;;  %v340_v15 = vadd.f32 %v778_v7, %v996_v23 }
  0xee   : > { %v458_v25 = vpop.f32.mrb[4].mxu0 }
  0xef   : > { %v832_v26 = vpop.f32.mrb[5].mxu0 }
  0xf0   : > { %v461_v27 = vpop.f32.mrb[6].mxu0 }
  0xf1   : > { %v408_v28 = vpop.f32.mrb[0].mxu1  ;;  %v833_v29 = vpop.f32.mrb[7].mxu0 }
  0xf2   : > { %v459_v30 = vadd.f32 %v458_v25, %v408_v28  ;;  %v826_v31 = vpop.f32.mrb[1].mxu1 }
  0xf3   : > { %v411_v32 = vpop.f32.mrb[2].mxu1 }
  0xf4   : > { %v462_v33 = vadd.f32 %v461_v27, %v411_v32  ;;  %v827_v34 = vpop.f32.mrb[3].mxu1 }
  0xf9   : > { %v512_v36 = vpop.f32.mrb[4].mxu1 }
  0xfa   : > { %v519_v37 = vadd.f32 %v512_v36, %v459_v30  ;;  %v838_v38 = vpop.f32.mrb[5].mxu1 }
  0xfb   : > { %v515_v39 = vpop.f32.mrb[6].mxu1 }
  0xfc   : > { %v527_v40 = vadd.f32 %v791_v35, %v519_v37  ;;  %v520_v41 = vadd.f32 %v515_v39, %v462_v33  ;;  %v839_v42 = vpop.f32.mrb[7].mxu1 }
  0xfe   : > { %v529_v43 = vmax.f32 %v527_v40, 0.0  ;;  %v528_v44 = vadd.f32 %v791_v35, %v520_v41 }
 0x100   : > { %535 = vst.msk [vmem:[#allocation3 + $0x8] sm:$0xff] %vm531_vm3, %v529_v43  ;;  %v530_v45 = vmax.f32 %v528_v44, 0.0 }
 0x102   : > { %536 = vst.msk [vmem:[#allocation3 + $0x10] sm:$0xff] %vm531_vm3, %v530_v45 }
 0x107   : > { %v538_v47 = vld [vmem:[#allocation3 + $0x8] sm:$0xff] }
 0x108   : > { %v541_v48 = vpack.c.bf16 %v538_v47, %v537_v46 }
 0x109   : > { %v539_v49 = vld [vmem:[#allocation3 + $0x10] sm:$0xff] }
 0x10a   : > { %849 = vmatmul.mubr.msk.bf16.vlgmr.msra.gmra.mrb[8].mxu1 %vm531_vm3, %v541_v48  ;;  %v543_v50 = vpack.c.bf16 %v539_v49, %v539_v49  ;;  %v548_v52 = vrot.slane %v541_v48, 2  ;;  %v646_v56 = vpack.c.bf16 %v539_v49, %v538_v47 }
 0x10c   : > { %v549_v53 = vrot.slane %v543_v50, 2 }
 0x10e   : > { %v550_v55 = vsel %vm361_vm2, %v548_v52, %v549_v53 }
 0x10f   : > { %843 = vmatmul.mubr.msk.bf16.vlgmr.msra.gmra.mrb[8].mxu0 %vm531_vm3, %v550_v55 }
 0x110   : > { %853 = vmatpush3.bf16.msra.mxu0 %v653_v54  ;;  %854 = vmatprep.mubr.msk.bf16.mxu0 %vm881_vm1, %v880_v1 }
 0x117   : > { %855 = vmatmul.mubr.msk.bf16.vlgmr.msra.gmra.mrb[12].mxu0 %vm531_vm3, %v646_v56 }
 0x1dd   : > { %v639_v57 = vpop.f32.mrb[8].mxu1 }
 0x1de   : > { %v850_v58 = vpop.f32.mrb[9].mxu1 }
 0x1df   : > { %v642_v59 = vpop.f32.mrb[10].mxu1 }
 0x1e0   : > { %v851_v60 = vpop.f32.mrb[11].mxu1 }
 0x1e2   : > { %v592_v61 = vpop.f32.mrb[8].mxu0 }
 0x1e3   : > { %v640_v62 = vadd.f32 %v639_v57, %v592_v61  ;;  %v844_v63 = vpop.f32.mrb[9].mxu0 }
 0x1e4   : > { %v595_v0 = vpop.f32.mrb[10].mxu0 }
 0x1e5   : > { %v643_v2 = vadd.f32 %v642_v59, %v595_v0  ;;  %v845_v3 = vpop.f32.mrb[11].mxu0 }
 0x1ea   : > { %v689_v5 = vpop.f32.mrb[12].mxu0 }
 0x1eb   : > { %v696_v1 = vadd.f32 %v689_v5, %v640_v62  ;;  %v856_v6 = vpop.f32.mrb[13].mxu0 }
 0x1ec   : > { %v692_v8 = vpop.f32.mrb[14].mxu0 }
 0x1ed   : > { %v704_v9 = vadd.f32 %v797_v4, %v696_v1  ;;  %v697_v10 = vadd.f32 %v692_v8, %v643_v2  ;;  %v857_v11 = vpop.f32.mrb[15].mxu0 }
 0x1ef   : > { %v706_v13 = vmax.f32 %v704_v9, 0.0  ;;  %v705_v14 = vadd.f32 %v797_v4, %v697_v10 }
 0x1f1   : > { %v708_v16 = vadd.f32 %v706_v13, %v337_v12  ;;  %v707_v17 = vmax.f32 %v705_v14, 0.0 }
 0x1f3   : > { %v710_v18 = vmax.f32 %v708_v16, 0.0  ;;  %v709_v19 = vadd.f32 %v707_v17, %v340_v15 }
 0x1f5   : > { %712 = vst.msk [vmem:[%s278_s9] sm:$0xff] %vm531_vm3, %v710_v18  ;;  %v711_v20 = vmax.f32 %v709_v19, 0.0 }
 0x1f7   : > { %713 = vst.msk [vmem:[%s278_s9 + $0x8] sm:$0xff] %vm531_vm3, %v711_v20 }
 0x1f8 PF: > { %s17_s24 = sadd.s32 1, %s878_s24  }
 0x1f9   : > { %p14_p4 = scmp.ge.s32.totalorder %s17_s24, 4  }
 0x1fb   :  { %16 = sbr.rel (!%p14_p4) target bundleno = 1 (0x1), region = 82 }

// kernel: cost_tcn_encoder_forward.14
= control target key start
LH: loop header
LB: loop body
LE: loop exit
PB: predicated region body
PF: predicated region fallthrough
CT: control target
= control target key end

     0   :  { %s992_s24 = smov 0   ;;  %s1107_s0 = inlined_call_operand.vmem [shape: f32[2,16,16], index: 0, kind: input, shape index: {}]   ;;  %s1108_s1 = inlined_call_operand.vmem [shape: bf16[3,16,8], index: 1, kind: input, shape index: {}]   ;;  %s1109_s2 = inlined_call_operand.vmem [shape: f32[1,8], index: 2, kind: input, shape index: {}]   ;;  %s1110_s3 = inlined_call_operand.vmem [shape: bf16[3,8,8], index: 3, kind: input, shape index: {}]   ;;  %s1111_s4 = inlined_call_operand.vmem [shape: f32[1,8], index: 4, kind: input, shape index: {}]   ;;  %s1112_s5 = inlined_call_operand.vmem [shape: bf16[16,8], index: 5, kind: input, shape index: {}]   ;;  %s1113_s6 = inlined_call_operand.vmem [shape: f32[1,8], index: 6, kind: input, shape index: {}]   ;;  %s1114_s7 = inlined_call_operand.vmem [shape: f32[2,16,8], index: 7, kind: output, shape index: {}]  }
   0x1 LB: > { %s817_s25 = sadd.s32 4294967295, %s948_s24   ;;  %p821_p0 = scmp.ge.s32.totalorder %s948_s24, 1  ;;  %s948_s24 = sphi %s992_s24, %s17_s24  }
   0x2   : > { %p237_p1 = scmp.lt.s32.totalorder %s948_s24, 3 }
   0x4   : > { %p238_p2 = pnand %p821_p0, %p237_p1 }
   0x5   : > { %v930_v0 = vld [vmem:[%s1112_s5] sm:$0xff] (!%p238_p2)   ;;  %v950_v1 = vmov (!%p238_p2), 0.0   ;;  %p269_p3 = scmp.lt.s32.totalorder (!%p238_p2), %s817_s25, 1  ;;  %vm298_vm0 = vcmask (!%p238_p2), 130048   ;;  %vm951_vm1 = vmmov (!%p238_p2), 0   ;;  %vm346_vm2 = vcmask (!%p238_p2), 125952  }
   0x6   : > { %241 = sbr.rel (%p238_p2) target bundleno = 559 (0x22f), region = 48  ;;  %864 = vmatprep.subr.bf16.mxu1 (!%p238_p2), %v950_v1  ;;  %876 = vmatprep.subr.bf16.mxu0 (!%p238_p2), %v950_v1  ;;  %343 = vst.msk [vmem:[#allocation2] sm:$0xff] (!%p238_p2), %vm298_vm0, %v950_v1  ;;  %344 = vst.msk [vmem:[#allocation2 + $0x8] sm:$0xff] (!%p238_p2), %vm298_vm0, %v950_v1  ;;  %v932_v2 = vld [vmem:[%s1108_s1] sm:$0xff] (!%p238_p2)   ;;  %v931_v5 = vld [vmem:[%s1108_s1 + $0x8] sm:$0xff] (!%p238_p2)   ;;  %vm433_vm3 = vcmask (!%p238_p2), 1045504  }
   0x7   : > { %865 = vmatpush3.bf16.msra.mxu1 (!%p238_p2), %v930_v0  ;;  %866 = vmatprep.mubr.msk.bf16.mxu1 (!%p238_p2), %vm951_vm1, %v950_v1  ;;  %345 = vst.msk [vmem:[#allocation2 + $0x10] sm:$0xff] (!%p238_p2), %vm298_vm0, %v950_v1  ;;  %v933_v29 = vld [vmem:[%s1108_s1 + $0x10] sm:$0xff] (!%p238_p2)   ;;  %vm556_vm4 = vcmask (!%p238_p2), 64512   ;;  %vm560_vm5 = vcmask (!%p238_p2), 60416   ;;  %v840_v40 = vld [vmem:[%s1110_s3 + $0x4] sm:$0xf] (!%p238_p2) }
   0x8   : > { %870 = vmatprep.subr.bf16.mxu1 (!%p238_p2), %v950_v1  ;;  %878 = vmatprep.mubr.msk.bf16.mxu0 (!%p238_p2), %vm951_vm1, %v950_v1  ;;  %347 = vst.msk [vmem:[#allocation2 + $0x18] sm:$0xf] (!%p238_p2), %vm346_vm2, %v950_v1  ;;  %vm596_vm6 = vcmask (!%p238_p2), 1043456   ;;  %v839_v56 = vld [vmem:[%s1109_s2] ss:$0 sm:$0xff] (!%p238_p2) }
   0x9   : > { %877 = vmatpush3.bf16.msra.mxu0 (!%p238_p2), %v932_v2  ;;  %558 = vst.msk [vmem:[#allocation3 + $0x8] sm:$0xff] (!%p238_p2), %vm556_vm4, %v950_v1  ;;  %557 = vst.msk [vmem:[#allocation3] sm:$0xff] (!%p238_p2), %vm556_vm4, %v950_v1  ;;  %v598_v41 = vsel (!%p238_p2), %vm596_vm6, %v840_v40, 0  ;;  %v845_v40 = vld [vmem:[%s1111_s4] ss:$0 sm:$0xff] (!%p238_p2) }
   0xa   : > { %888 = vmatprep.subr.bf16.mxu0 (!%p238_p2), %v950_v1  ;;  %559 = vst.msk [vmem:[#allocation3 + $0x10] sm:$0xff] (!%p238_p2), %vm556_vm4, %v950_v1 }
   0xb   : > { %561 = vst.msk [vmem:[#allocation3 + $0x18] sm:$0xf] (!%p238_p2), %vm560_vm5, %v950_v1 }
   0xd   : > { %s1116_s25 = smov (!%p269_p3, %s817_s25), 1  ;;  %v368_v25 = vld [vmem:[#allocation2] sm:$0xff] }
   0xe   : > { %s848_s30 = sshll.u32 %s1116_s25, 4 }
   0xf   : > { %s273_s10 = scalar_lea.vmem %s1107_s0, %s848_s30  ;;  %v371_v26 = vld [vmem:[#allocation2 + $0x18] sm:$0xf]  ;;  %s278_s9 = scalar_lea.vmem %s1114_s7, %s848_s30 }
  0x10   : > { %v280_v3 = vld [vmem:[%s273_s10] sm:$0xff]  ;;  %v281_v4 = vld [vmem:[%s273_s10 + $0x8] sm:$0xff]  ;;  %v487_v31 = vpack.c.bf16 %v371_v26, %v371_v26 }
  0x11   : > { %v282_v6 = vpack.c.bf16 %v281_v4, %v280_v3  ;;  %v348_v7 = vmul.f32 %v280_v3, %v280_v3  ;;  %v349_v8 = vmul.f32 %v281_v4, %v281_v4 }
  0x12   : > { %v494_v37 = vrot.slane %v487_v31, 2 }
  0x13   : > { %867 = vmatmul.mubr.msk.bf16.vlgmr.msra.gmra.mrb[0].mxu1 %vm298_vm0, %v282_v6  ;;  %v350_v9 = vmul.f32 %v348_v7, %v280_v3  ;;  %v351_v10 = vmul.f32 %v349_v8, %v281_v4 }
  0x14   : > { %871 = vmatpush3.bf16.msra.mxu1 %v931_v5  ;;  %872 = vmatprep.mubr.msk.bf16.mxu1 %vm951_vm1, %v950_v1 }
  0x15   : > { %v352_v11 = vmul.f32 0.044715, %v350_v9  ;;  %v353_v12 = vmul.f32 0.044715, %v351_v10  ;;  %882 = vmatprep.subr.bf16.mxu1 %v950_v1 }
  0x17   : > { %v354_v13 = vadd.f32 %v352_v11, %v280_v3  ;;  %v355_v14 = vadd.f32 %v353_v12, %v281_v4 }
  0x19   : > { %v356_v15 = vmul.f32 0.7978846, %v354_v13  ;;  %v357_v16 = vmul.f32 0.7978846, %v355_v14 }
  0x1b   : > { %934 = vtanh.f32 %v356_v15 }
  0x1c   : > { %936 = vtanh.f32 %v357_v16 }
  0x25   : > { %v935_v17 = vpop.eup %934 }
  0x26   : > { %v937_v18 = vpop.eup %936  ;;  %v360_v19 = vadd.f32 1.0, %v935_v17 }
  0x27   : > { %v361_v20 = vadd.f32 1.0, %v937_v18 }
  0x28   : > { %v362_v21 = vmul.f32 0.5, %v360_v19 }
  0x29   : > { %v363_v22 = vmul.f32 0.5, %v361_v20  ;;  %v589_v20 = vld [vmem:[%s1110_s3] sm:$0xf] }
  0x2a   : > { %v364_v23 = vmul.f32 %v362_v21, %v280_v3 }
  0x2b   : > { %v365_v24 = vmul.f32 %v363_v22, %v281_v4 }
  0x2c   : > { %366 = vst.msk [vmem:[#allocation2 + $0x8] sm:$0xff] %vm298_vm0, %v364_v23 }
  0x2d   : > { %367 = vst.msk [vmem:[#allocation2 + $0x10] sm:$0xff] %vm298_vm0, %v365_v24  ;;  %v650_v24 = vsel %vm596_vm6, %v589_v20, 0 }
  0x33   : > { %v369_v27 = vld [vmem:[#allocation2 + $0x8] sm:$0xff] }
  0x34   : > { %v370_v28 = vld [vmem:[#allocation2 + $0x10] sm:$0xff]  ;;  %v373_v30 = vpack.c.bf16 %v369_v27, %v368_v25  ;;  %v582_v25 = vld [vmem:[#allocation3] sm:$0xff] }
  0x35   : > { %v377_v32 = vpack.c.bf16 %v370_v28, %v369_v27  ;;  %v374_v33 = vpack.c.bf16 %v370_v28, %v370_v28 }
  0x36   : > { %v434_v34 = vrot.slane %v373_v30, 2 }
  0x37   : > { %873 = vmatmul.mubr.msk.bf16.vlgmr.msra.gmra.mrb[4].mxu1 %vm298_vm0, %v377_v32  ;;  %v435_v35 = vrot.slane %v374_v33, 2  ;;  %v493_v36 = vrot.slane %v377_v32, 2  ;;  %v585_v33 = vld [vmem:[#allocation3 + $0x18] sm:$0xf] }
  0x38   : > { %883 = vmatpush3.bf16.msra.mxu1 %v933_v29  ;;  %884 = vmatprep.mubr.msk.bf16.mxu1 %vm951_vm1, %v950_v1  ;;  %v843_v29 = vld [vmem:[%s1110_s3 + $0x8] sm:$0xf] }
  0x39   : > { %v436_v38 = vsel %vm433_vm3, %v434_v34, %v435_v35  ;;  %v495_v39 = vsel %vm433_vm3, %v493_v36, %v494_v37  ;;  %v705_v31 = vsel %vm596_vm6, %v843_v29, 0  ;;  %v693_v34 = vpack.c.bf16 %v585_v33, %v585_v33 }
  0x3a   : > { %879 = vmatmul.mubr.msk.bf16.vlgmr.msra.gmra.mrb[0].mxu0 %vm298_vm0, %v436_v38  ;;  %v826_v38 = vld [vmem:[%s1113_s6] ss:$0 sm:$0xff] }
  0x3b   : > { %890 = vmatprep.mubr.msk.bf16.mxu0 %vm951_vm1, %v950_v1  ;;  %889 = vmatpush3.bf16.msra.mxu0 %v598_v41  ;;  %v699_v36 = vrot.slane %v693_v34, 2 }
  0x3c   : > { %894 = vmatprep.subr.bf16.mxu0 %v950_v1 }
  0x3f   : > { %885 = vmatmul.mubr.msk.bf16.vlgmr.msra.gmra.mrb[8].mxu1 %vm298_vm0, %v495_v39 }
  0xe6   : > { %v1062_v42 = vpop.f32.mrb[0].mxu1 }
  0xe7   : > { %v868_v43 = vpop.f32.mrb[1].mxu1  ;;  %v337_v39 = vadd.f32 %v826_v38, %v1062_v42 }
  0xe8   : > { %v1064_v44 = vpop.f32.mrb[2].mxu1 }
  0xe9   : > { %v869_v45 = vpop.f32.mrb[3].mxu1  ;;  %v340_v41 = vadd.f32 %v826_v38, %v1064_v44 }
 0x10a   : > { %v424_v46 = vpop.f32.mrb[4].mxu1 }
 0x10b   : > { %v874_v47 = vpop.f32.mrb[5].mxu1 }
 0x10c   : > { %v427_v48 = vpop.f32.mrb[6].mxu1  ;;  %v910_v47 = vadd.f32 %v845_v40, %v340_v41 }
 0x10d   : > { %v875_v49 = vpop.f32.mrb[7].mxu1  ;;  %v480_v50 = vpop.f32.mrb[0].mxu0 }
 0x10e   : > { %v481_v51 = vadd.f32 %v480_v50, %v424_v46  ;;  %v880_v52 = vpop.f32.mrb[1].mxu0 }
 0x10f   : > { %v483_v53 = vpop.f32.mrb[2].mxu0 }
 0x110   : > { %v484_v54 = vadd.f32 %v483_v53, %v427_v48  ;;  %v881_v55 = vpop.f32.mrb[3].mxu0 }
 0x112   : > { %v539_v57 = vpop.f32.mrb[8].mxu1 }
 0x113   : > { %v546_v58 = vadd.f32 %v539_v57, %v481_v51  ;;  %v886_v59 = vpop.f32.mrb[9].mxu1 }
 0x114   : > { %v542_v60 = vpop.f32.mrb[10].mxu1 }
 0x115   : > { %v554_v61 = vadd.f32 %v839_v56, %v546_v58  ;;  %v547_v62 = vadd.f32 %v542_v60, %v484_v54  ;;  %v887_v63 = vpop.f32.mrb[11].mxu1 }
 0x117   : > { %v562_v0 = vmul.f32 %v554_v61, %v554_v61  ;;  %v555_v2 = vadd.f32 %v839_v56, %v547_v62 }
 0x119   : > { %v564_v3 = vmul.f32 %v562_v0, %v554_v61  ;;  %v563_v4 = vmul.f32 %v555_v2, %v555_v2 }
 0x11b   : > { %v566_v5 = vmul.f32 0.044715, %v564_v3  ;;  %v565_v6 = vmul.f32 %v563_v4, %v555_v2 }
 0x11d   : > { %v568_v7 = vadd.f32 %v566_v5, %v554_v61  ;;  %v567_v8 = vmul.f32 0.044715, %v565_v6 }
 0x11f   : > { %v570_v9 = vmul.f32 0.7978846, %v568_v7  ;;  %v569_v10 = vadd.f32 %v567_v8, %v555_v2 }
 0x121   : > { %938 = vtanh.f32 %v570_v9  ;;  %v571_v11 = vmul.f32 0.7978846, %v569_v10 }
 0x123   : > { %940 = vtanh.f32 %v571_v11 }
 0x12b   : > { %v939_v12 = vpop.eup %938 }
 0x12c   : > { %v574_v13 = vadd.f32 1.0, %v939_v12 }
 0x12d   : > { %v941_v14 = vpop.eup %940 }
 0x12e   : > { %v576_v15 = vmul.f32 0.5, %v574_v13  ;;  %v575_v16 = vadd.f32 1.0, %v941_v14 }
 0x130   : > { %v578_v17 = vmul.f32 %v576_v15, %v554_v61  ;;  %v577_v18 = vmul.f32 0.5, %v575_v16 }
 0x132   : > { %580 = vst.msk [vmem:[#allocation3 + $0x8] sm:$0xff] %vm556_vm4, %v578_v17  ;;  %v579_v19 = vmul.f32 %v577_v18, %v555_v2 }
 0x134   : > { %581 = vst.msk [vmem:[#allocation3 + $0x10] sm:$0xff] %vm556_vm4, %v579_v19 }
 0x139   : > { %v583_v21 = vld [vmem:[#allocation3 + $0x8] sm:$0xff] }
 0x13a   : > { %v587_v27 = vpack.c.bf16 %v583_v21, %v582_v25 }
 0x13b   : > { %v584_v22 = vld [vmem:[#allocation3 + $0x10] sm:$0xff] }
 0x13c   : > { %v590_v23 = vpack.c.bf16 %v584_v22, %v583_v21  ;;  %v588_v26 = vpack.c.bf16 %v584_v22, %v584_v22  ;;  %v643_v30 = vrot.slane %v587_v27, 2 }
 0x13e   : > { %891 = vmatmul.mubr.msk.bf16.vlgmr.msra.gmra.mrb[4].mxu0 %vm556_vm4, %v590_v23  ;;  %v644_v28 = vrot.slane %v588_v26, 2  ;;  %v698_v35 = vrot.slane %v590_v23, 2 }
 0x13f   : > { %895 = vmatpush3.bf16.msra.mxu0 %v650_v24  ;;  %896 = vmatprep.mubr.msk.bf16.mxu0 %vm951_vm1, %v950_v1 }
 0x140   : > { %900 = vmatprep.subr.bf16.mxu0 %v950_v1  ;;  %v645_v32 = vsel %vm433_vm3, %v643_v30, %v644_v28  ;;  %v700_v37 = vsel %vm433_vm3, %v698_v35, %v699_v36 }
 0x14a   : > { %897 = vmatmul.mubr.msk.bf16.vlgmr.msra.gmra.mrb[4].mxu0 %vm556_vm4, %v645_v32 }
 0x14b   : > { %901 = vmatpush3.bf16.msra.mxu0 %v705_v31  ;;  %902 = vmatprep.mubr.msk.bf16.mxu0 %vm951_vm1, %v950_v1  ;;  %v907_v1 = vadd.f32 %v845_v40, %v337_v39 }
 0x156   : > { %903 = vmatmul.mubr.msk.bf16.vlgmr.msra.gmra.mrb[4].mxu0 %vm556_vm4, %v700_v37 }
 0x229   : > { %v741_v43 = vpop.f32.mrb[4].mxu0 }
 0x22a   : > { %v908_v45 = vadd.f32 %v907_v1, %v741_v43  ;;  %v904_v46 = vpop.f32.mrb[5].mxu0 }
 0x22b   : > { %v744_v48 = vpop.f32.mrb[6].mxu0 }
 0x22c   : > { %760 = vst.msk [vmem:[%s278_s9] sm:$0xff] %vm556_vm4, %v908_v45  ;;  %v911_v42 = vadd.f32 %v910_v47, %v744_v48  ;;  %v905_v49 = vpop.f32.mrb[7].mxu0 }
 0x22e   : > { %761 = vst.msk [vmem:[%s278_s9 + $0x8] sm:$0xff] %vm556_vm4, %v911_v42 }
 0x22f PF: > { %s17_s24 = sadd.s32 1, %s948_s24  }
 0x230   : > { %p14_p4 = scmp.ge.s32.totalorder %s17_s24, 4  }
 0x232   :  { %16 = sbr.rel (!%p14_p4) target bundleno = 1 (0x1), region = 82 }

// kernel: cost_tcn_encoder_forward.12
= control target key start
LH: loop header
LB: loop body
LE: loop exit
PB: predicated region body
PF: predicated region fallthrough
CT: control target
= control target key end

     0   :  { %s896_s18 = smov 0   ;;  %s1008_s0 = inlined_call_operand.vmem [shape: f32[2,16,16], index: 0, kind: input, shape index: {}]   ;;  %s1009_s1 = inlined_call_operand.vmem [shape: bf16[3,16,16], index: 1, kind: input, shape index: {}]   ;;  %s1010_s2 = inlined_call_operand.vmem [shape: f32[1,16], index: 2, kind: input, shape index: {}]   ;;  %s1011_s3 = inlined_call_operand.vmem [shape: bf16[3,16,16], index: 3, kind: input, shape index: {}]   ;;  %s1012_s4 = inlined_call_operand.vmem [shape: f32[1,16], index: 4, kind: input, shape index: {}]   ;;  %s1013_s5 = inlined_call_operand.vmem [shape: f32[2,16,16], index: 5, kind: output, shape index: {}]  }
   0x1 LB: > { %s749_s19 = sadd.s32 4294967295, %s862_s18   ;;  %p753_p0 = scmp.ge.s32.totalorder %s862_s18, 1  ;;  %s862_s18 = sphi %s896_s18, %s15_s18  }
   0x2   : > { %p187_p1 = scmp.lt.s32.totalorder %s862_s18, 3 }
   0x4   : > { %p188_p2 = pnand %p753_p0, %p187_p1 }
   0x5   : > { %v842_v0 = vld [vmem:[%s1009_s1 + $0x8] sm:$0xff] (!%p188_p2)   ;;  %v864_v1 = vmov (!%p188_p2), 0.0   ;;  %p215_p3 = scmp.lt.s32.totalorder (!%p188_p2), %s749_s19, 1  ;;  %vm228_vm0 = vcmask (!%p188_p2), 130048   ;;  %vm865_vm1 = vmmov (!%p188_p2), 0   ;;  %v844_v2 = vld [vmem:[%s1009_s1] sm:$0xff] (!%p188_p2)  }
   0x6   : > { %191 = sbr.rel (%p188_p2) target bundleno = 549 (0x225), region = 40  ;;  %796 = vmatprep.subr.bf16.mxu0 (!%p188_p2), %v864_v1  ;;  %802 = vmatprep.subr.bf16.mxu1 (!%p188_p2), %v864_v1  ;;  %229 = vst.msk [vmem:[#allocation2] sm:$0xff] (!%p188_p2), %vm228_vm0, %v864_v1  ;;  %230 = vst.msk [vmem:[#allocation2 + $0x8] sm:$0xff] (!%p188_p2), %vm228_vm0, %v864_v1  ;;  %vm232_vm2 = vcmask (!%p188_p2), 122880   ;;  %v843_v29 = vld [vmem:[%s1009_s1 + $0x10] sm:$0xff] (!%p188_p2)   ;;  %v845_v50 = vld [vmem:[%s1011_s3 + $0x8] sm:$0xff] (!%p188_p2)  }
   0x7   : > { %797 = vmatpush3.bf16.msra.mxu0 (!%p188_p2), %v842_v0  ;;  %798 = vmatprep.mubr.msk.bf16.mxu0 (!%p188_p2), %vm865_vm1, %v864_v1  ;;  %231 = vst.msk [vmem:[#allocation2 + $0x10] sm:$0xff] (!%p188_p2), %vm228_vm0, %v864_v1  ;;  %461 = vst.msk [vmem:[#allocation3] sm:$0xff] (!%p188_p2), %vm228_vm0, %v864_v1  ;;  %vm317_vm3 = vsmask.f32 (!%p188_p2), 4352  ;;  %vm389_vm4 = vsmask.f32 (!%p188_p2), 7424 }
   0x8   : > { %462 = vst.msk [vmem:[#allocation3 + $0x8] sm:$0xff] (!%p188_p2), %vm228_vm0, %v864_v1  ;;  %463 = vst.msk [vmem:[#allocation3 + $0x10] sm:$0xff] (!%p188_p2), %vm228_vm0, %v864_v1  ;;  %808 = vmatprep.subr.bf16.mxu0 (!%p188_p2), %v864_v1  ;;  %804 = vmatprep.mubr.msk.bf16.mxu1 (!%p188_p2), %vm865_vm1, %v864_v1  ;;  %v846_v51 = vld [vmem:[%s1011_s3] sm:$0xff] (!%p188_p2)  }
   0x9   : > { %233 = vst.msk [vmem:[#allocation2 + $0x18] sm:$0x1] (!%p188_p2), %vm232_vm2, %v864_v1  ;;  %464 = vst.msk [vmem:[#allocation3 + $0x18] sm:$0x1] (!%p188_p2), %vm232_vm2, %v864_v1  ;;  %803 = vmatpush3.bf16.msra.mxu1 (!%p188_p2), %v844_v2  ;;  %v768_v60 = vld [vmem:[%s1010_s2] ss:$0 sm:$0xff] (!%p188_p2) }
   0xa   : > { %814 = vmatprep.subr.bf16.mxu1 (!%p188_p2), %v864_v1 }
   0xd   : > { %s1015_s19 = smov (!%p215_p3, %s749_s19), 1  ;;  %v254_v24 = vld [vmem:[#allocation2] sm:$0xff] }
   0xe   : > { %s782_s24 = sshll.u32 %s1015_s19, 4 }
   0xf   : > { %s219_s27 = scalar_lea.vmem %s1008_s0, %s782_s24  ;;  %s224_s17 = scalar_lea.vmem %s1013_s5, %s782_s24 }
  0x10   : > { %v940_v3 = vld [vmem:[%s219_s27] sm:$0xff]  ;;  %v942_v4 = vld [vmem:[%s219_s27 + $0x8] sm:$0xff]  ;;  %v257_v23 = vld [vmem:[#allocation2 + $0x18] sm:$0x1] }
  0x11   : > { %v234_v5 = vmul.f32 %v940_v3, %v940_v3  ;;  %v235_v6 = vmul.f32 %v942_v4, %v942_v4  ;;  %v385_v25 = vpack.c.bf16 %v257_v23, %v257_v23 }
  0x13   : > { %v236_v7 = vmul.f32 %v234_v5, %v940_v3  ;;  %v237_v8 = vmul.f32 %v235_v6, %v942_v4  ;;  %v397_v32 = vshll.u32 %v385_v25, 16 }
  0x15   : > { %v238_v9 = vmul.f32 0.044715, %v236_v7  ;;  %v239_v10 = vmul.f32 0.044715, %v237_v8  ;;  %v399_v44 = vrot.slane %v397_v32, 1 }
  0x17   : > { %v240_v11 = vadd.f32 %v238_v9, %v940_v3  ;;  %v241_v12 = vadd.f32 %v239_v10, %v942_v4 }
  0x19   : > { %v242_v13 = vmul.f32 0.7978846, %v240_v11  ;;  %v243_v14 = vmul.f32 0.7978846, %v241_v12 }
  0x1b   : > { %848 = vtanh.f32 %v242_v13 }
  0x1c   : > { %850 = vtanh.f32 %v243_v14 }
  0x25   : > { %v849_v15 = vpop.eup %848 }
  0x26   : > { %v851_v16 = vpop.eup %850  ;;  %v246_v17 = vadd.f32 1.0, %v849_v15 }
  0x27   : > { %v247_v18 = vadd.f32 1.0, %v851_v16 }
  0x28   : > { %v248_v19 = vmul.f32 0.5, %v246_v17 }
  0x29   : > { %v249_v20 = vmul.f32 0.5, %v247_v18 }
  0x2a   : > { %v250_v21 = vmul.f32 %v248_v19, %v940_v3 }
  0x2b   : > { %v251_v22 = vmul.f32 %v249_v20, %v942_v4 }
  0x2c   : > { %252 = vst.msk [vmem:[#allocation2 + $0x8] sm:$0xff] %vm228_vm0, %v250_v21 }
  0x2d   : > { %253 = vst.msk [vmem:[#allocation2 + $0x10] sm:$0xff] %vm228_vm0, %v251_v22 }
  0x33   : > { %v255_v26 = vld [vmem:[#allocation2 + $0x8] sm:$0xff] }
  0x34   : > { %v256_v27 = vld [vmem:[#allocation2 + $0x10] sm:$0xff]  ;;  %v259_v28 = vpack.c.bf16 %v255_v26, %v254_v24 }
  0x35   : > { %v260_v30 = vpack.c.bf16 %v256_v27, %v256_v27  ;;  %v263_v31 = vpack.c.bf16 %v256_v27, %v255_v26 }
  0x36   : > { %v319_v33 = vshrl.u32 %v259_v28, 16  ;;  %v322_v34 = vshll.u32 %v259_v28, 16  ;;  %v488_v28 = vld [vmem:[#allocation3 + $0x18] sm:$0x1] }
  0x37   : > { %799 = vmatmul.mubr.msk.bf16.vlgmr.msra.gmra.mrb[0].mxu0 %vm228_vm0, %v263_v31  ;;  %v390_v35 = vshrl.u32 %v263_v31, 16  ;;  %v392_v36 = vshll.u32 %v263_v31, 16  ;;  %v327_v37 = vshrl.u32 %v260_v30, 16  ;;  %v330_v38 = vshll.u32 %v260_v30, 16 }
  0x38   : > { %809 = vmatpush3.bf16.msra.mxu0 %v843_v29  ;;  %v321_v39 = vrot.slane %v319_v33, 3  ;;  %v324_v40 = vrot.slane %v322_v34, 4  ;;  %810 = vmatprep.mubr.msk.bf16.mxu0 %vm865_vm1, %v864_v1  ;;  %v485_v29 = vld [vmem:[#allocation3] sm:$0xff]  ;;  %v615_v31 = vpack.c.bf16 %v488_v28, %v488_v28  ;;  %v847_v34 = vld [vmem:[%s1011_s3 + $0x10] sm:$0xff]  }
  0x39   : > { %v329_v41 = vrot.slane %v327_v37, 3  ;;  %v332_v42 = vrot.slane %v330_v38, 4  ;;  %v394_v43 = vrot.slane %v392_v36, 1  ;;  %820 = vmatprep.subr.bf16.mxu0 %v864_v1 }
  0x3a   : > { %v325_v45 = vor.u32 %v324_v40, %v321_v39  ;;  %v626_v39 = vshll.u32 %v615_v31, 16 }
  0x3b   : > { %v333_v46 = vor.u32 %v332_v42, %v329_v41  ;;  %v395_v47 = vor.u32 %v394_v43, %v390_v35 }
  0x3d   : > { %v334_v48 = vsel %vm317_vm3, %v325_v45, %v333_v46  ;;  %v400_v49 = vsel %vm389_vm4, %v395_v47, %v399_v44 }
  0x3e   : > { %805 = vmatmul.mubr.msk.bf16.vlgmr.msra.gmra.mrb[0].mxu1 %vm228_vm0, %v334_v48 }
  0x3f   : > { %811 = vmatmul.mubr.msk.bf16.vlgmr.msra.gmra.mrb[4].mxu0 %vm228_vm0, %v400_v49  ;;  %816 = vmatprep.mubr.msk.bf16.mxu1 %vm865_vm1, %v864_v1  ;;  %v628_v49 = vrot.slane %v626_v39, 1 }
  0x40   : > { %822 = vmatprep.mubr.msk.bf16.mxu0 %vm865_vm1, %v864_v1  ;;  %815 = vmatpush3.bf16.msra.mxu1 %v845_v50 }
  0x41   : > { %821 = vmatpush3.bf16.msra.mxu0 %v846_v51  ;;  %826 = vmatprep.subr.bf16.mxu1 %v864_v1 }
 0x10a   : > { %v310_v52 = vpop.f32.mrb[0].mxu0 }
 0x10b   : > { %v800_v53 = vpop.f32.mrb[1].mxu0 }
 0x10c   : > { %v313_v54 = vpop.f32.mrb[2].mxu0 }
 0x10d   : > { %v801_v55 = vpop.f32.mrb[3].mxu0 }
 0x111   : > { %v378_v56 = vpop.f32.mrb[0].mxu1 }
 0x112   : > { %v379_v57 = vadd.f32 %v378_v56, %v310_v52  ;;  %v806_v58 = vpop.f32.mrb[1].mxu1  ;;  %v444_v59 = vpop.f32.mrb[4].mxu0 }
 0x113   : > { %v381_v61 = vpop.f32.mrb[2].mxu1  ;;  %v812_v62 = vpop.f32.mrb[5].mxu0 }
 0x114   : > { %v451_v63 = vadd.f32 %v444_v59, %v379_v57  ;;  %v382_v0 = vadd.f32 %v381_v61, %v313_v54  ;;  %v807_v2 = vpop.f32.mrb[3].mxu1  ;;  %v447_v5 = vpop.f32.mrb[6].mxu0  ;;  %v779_v62 = vld [vmem:[%s1012_s4] ss:$0 sm:$0xff] }
 0x115   : > { %v813_v6 = vpop.f32.mrb[7].mxu0 }
 0x116   : > { %v459_v7 = vadd.f32 %v768_v60, %v451_v63  ;;  %v452_v8 = vadd.f32 %v447_v5, %v382_v0 }
 0x118   : > { %v465_v9 = vmul.f32 %v459_v7, %v459_v7  ;;  %v460_v10 = vadd.f32 %v768_v60, %v452_v8 }
 0x11a   : > { %v467_v11 = vmul.f32 %v465_v9, %v459_v7  ;;  %v466_v12 = vmul.f32 %v460_v10, %v460_v10 }
 0x11c   : > { %v469_v13 = vmul.f32 0.044715, %v467_v11  ;;  %v468_v14 = vmul.f32 %v466_v12, %v460_v10 }
 0x11e   : > { %v471_v15 = vadd.f32 %v469_v13, %v459_v7  ;;  %v470_v16 = vmul.f32 0.044715, %v468_v14 }
 0x120   : > { %v473_v17 = vmul.f32 0.7978846, %v471_v15  ;;  %v472_v18 = vadd.f32 %v470_v16, %v460_v10 }
 0x122   : > { %852 = vtanh.f32 %v473_v17  ;;  %v474_v19 = vmul.f32 0.7978846, %v472_v18 }
 0x124   : > { %854 = vtanh.f32 %v474_v19 }
 0x12c   : > { %v853_v20 = vpop.eup %852 }
 0x12d   : > { %v477_v21 = vadd.f32 1.0, %v853_v20 }
 0x12e   : > { %v855_v22 = vpop.eup %854 }
 0x12f   : > { %v479_v23 = vmul.f32 0.5, %v477_v21  ;;  %v478_v24 = vadd.f32 1.0, %v855_v22 }
 0x131   : > { %v481_v25 = vmul.f32 %v479_v23, %v459_v7  ;;  %v480_v26 = vmul.f32 0.5, %v478_v24 }
 0x133   : > { %483 = vst.msk [vmem:[#allocation3 + $0x8] sm:$0xff] %vm228_vm0, %v481_v25  ;;  %v482_v27 = vmul.f32 %v480_v26, %v460_v10 }
 0x135   : > { %484 = vst.msk [vmem:[#allocation3 + $0x10] sm:$0xff] %vm228_vm0, %v482_v27 }
 0x13a   : > { %v486_v30 = vld [vmem:[#allocation3 + $0x8] sm:$0xff] }
 0x13b   : > { %v490_v32 = vpack.c.bf16 %v486_v30, %v485_v29 }
 0x13c   : > { %v487_v33 = vld [vmem:[#allocation3 + $0x10] sm:$0xff] }
 0x13d   : > { %v491_v35 = vpack.c.bf16 %v487_v33, %v487_v33  ;;  %v494_v36 = vpack.c.bf16 %v487_v33, %v486_v30  ;;  %v549_v37 = vshrl.u32 %v490_v32, 16  ;;  %v552_v38 = vshll.u32 %v490_v32, 16 }
 0x13f   : > { %817 = vmatmul.mubr.msk.bf16.vlgmr.msra.gmra.mrb[4].mxu1 %vm228_vm0, %v494_v36  ;;  %v551_v40 = vrot.slane %v549_v37, 3  ;;  %v554_v41 = vrot.slane %v552_v38, 4  ;;  %v557_v42 = vshrl.u32 %v491_v35, 16  ;;  %v560_v43 = vshll.u32 %v491_v35, 16 }
 0x140   : > { %827 = vmatpush3.bf16.msra.mxu1 %v847_v34  ;;  %828 = vmatprep.mubr.msk.bf16.mxu1 %vm865_vm1, %v864_v1  ;;  %v621_v44 = vshll.u32 %v494_v36, 16  ;;  %v619_v47 = vshrl.u32 %v494_v36, 16 }
 0x141   : > { %v559_v45 = vrot.slane %v557_v42, 3  ;;  %v562_v46 = vrot.slane %v560_v43, 4  ;;  %v555_v50 = vor.u32 %v554_v41, %v551_v40 }
 0x142   : > { %v623_v48 = vrot.slane %v621_v44, 1 }
 0x143   : > { %v563_v51 = vor.u32 %v562_v46, %v559_v45 }
 0x144   : > { %v624_v52 = vor.u32 %v623_v48, %v619_v47 }
 0x145   : > { %v564_v53 = vsel %vm317_vm3, %v555_v50, %v563_v51 }
 0x146   : > { %823 = vmatmul.mubr.msk.bf16.vlgmr.msra.gmra.mrb[8].mxu0 %vm228_vm0, %v564_v53  ;;  %v629_v54 = vsel %vm389_vm4, %v624_v52, %v628_v49 }
 0x147   : > { %829 = vmatmul.mubr.msk.bf16.vlgmr.msra.gmra.mrb[8].mxu1 %vm228_vm0, %v629_v54 }
 0x212   : > { %v541_v55 = vpop.f32.mrb[4].mxu1 }
 0x213   : > { %v818_v56 = vpop.f32.mrb[5].mxu1 }
 0x214   : > { %v544_v1 = vpop.f32.mrb[6].mxu1 }
 0x215   : > { %v819_v57 = vpop.f32.mrb[7].mxu1 }
 0x219   : > { %v608_v58 = vpop.f32.mrb[8].mxu0 }
 0x21a   : > { %v609_v59 = vadd.f32 %v608_v58, %v541_v55  ;;  %v824_v60 = vpop.f32.mrb[9].mxu0  ;;  %v673_v61 = vpop.f32.mrb[8].mxu1 }
 0x21b   : > { %v611_v63 = vpop.f32.mrb[10].mxu0  ;;  %v830_v0 = vpop.f32.mrb[9].mxu1 }
 0x21c   : > { %v680_v2 = vadd.f32 %v673_v61, %v609_v59  ;;  %v612_v5 = vadd.f32 %v611_v63, %v544_v1  ;;  %v825_v6 = vpop.f32.mrb[11].mxu0  ;;  %v676_v7 = vpop.f32.mrb[10].mxu1 }
 0x21d   : > { %v831_v8 = vpop.f32.mrb[11].mxu1 }
 0x21e   : > { %v688_v9 = vadd.f32 %v779_v62, %v680_v2  ;;  %v681_v10 = vadd.f32 %v676_v7, %v612_v5 }
 0x220   : > { %v690_v11 = vadd.f32 %v688_v9, %v940_v3  ;;  %v689_v12 = vadd.f32 %v779_v62, %v681_v10 }
 0x222   : > { %692 = vst.msk [vmem:[%s224_s17] sm:$0xff] %vm228_vm0, %v690_v11  ;;  %v691_v13 = vadd.f32 %v689_v12, %v942_v4 }
 0x224   : > { %693 = vst.msk [vmem:[%s224_s17 + $0x8] sm:$0xff] %vm228_vm0, %v691_v13 }
 0x225 PF: > { %s15_s18 = sadd.s32 1, %s862_s18  }
 0x226   : > { %p12_p4 = scmp.ge.s32.totalorder %s15_s18, 4  }
 0x228   :  { %14 = sbr.rel (!%p12_p4) target bundleno = 1 (0x1), region = 74 }

// kernel: cost_tcn_encoder_forward.13
= control target key start
LH: loop header
LB: loop body
LE: loop exit
PB: predicated region body
PF: predicated region fallthrough
CT: control target
= control target key end

     0   :  { %s860_s18 = smov 0   ;;  %s972_s0 = inlined_call_operand.vmem [shape: f32[2,16,16], index: 0, kind: input, shape index: {}]   ;;  %s973_s1 = inlined_call_operand.vmem [shape: bf16[3,16,16], index: 1, kind: input, shape index: {}]   ;;  %s974_s2 = inlined_call_operand.vmem [shape: f32[1,16], index: 2, kind: input, shape index: {}]   ;;  %s975_s3 = inlined_call_operand.vmem [shape: bf16[3,16,16], index: 3, kind: input, shape index: {}]   ;;  %s976_s4 = inlined_call_operand.vmem [shape: f32[1,16], index: 4, kind: input, shape index: {}]   ;;  %s977_s5 = inlined_call_operand.vmem [shape: f32[2,16,16], index: 5, kind: output, shape index: {}]  }
   0x1 LB: > { %s713_s19 = sadd.s32 4294967295, %s826_s18   ;;  %p717_p0 = scmp.ge.s32.totalorder %s826_s18, 1  ;;  %s826_s18 = sphi %s860_s18, %s15_s18  }
   0x2   : > { %p187_p1 = scmp.lt.s32.totalorder %s826_s18, 3 }
   0x4   : > { %p188_p2 = pnand %p717_p0, %p187_p1 }
   0x5   : > { %v806_v0 = vld [vmem:[%s973_s1 + $0x8] sm:$0xff] (!%p188_p2)   ;;  %v828_v1 = vmov (!%p188_p2), 0.0   ;;  %p215_p3 = scmp.lt.s32.totalorder (!%p188_p2), %s713_s19, 1  ;;  %vm228_vm0 = vcmask (!%p188_p2), 130048   ;;  %v807_v2 = vld [vmem:[%s973_s1] sm:$0xff] (!%p188_p2)   ;;  %vm829_vm1 = vmmov (!%p188_p2), 0  }
   0x6   : > { %191 = sbr.rel (%p188_p2) target bundleno = 547 (0x223), region = 40  ;;  %760 = vmatprep.subr.bf16.mxu0 (!%p188_p2), %v828_v1  ;;  %766 = vmatprep.subr.bf16.mxu1 (!%p188_p2), %v828_v1  ;;  %230 = vst.msk [vmem:[#allocation2 + $0x8] sm:$0xff] (!%p188_p2), %vm228_vm0, %v828_v1  ;;  %231 = vst.msk [vmem:[#allocation2 + $0x10] sm:$0xff] (!%p188_p2), %vm228_vm0, %v828_v1  ;;  %vm232_vm2 = vcmask (!%p188_p2), 123904   ;;  %v808_v27 = vld [vmem:[%s973_s1 + $0x10] sm:$0xff] (!%p188_p2)   ;;  %vm319_vm3 = vcmask (!%p188_p2), 1044480  }
   0x7   : > { %761 = vmatpush3.bf16.msra.mxu0 (!%p188_p2), %v806_v0  ;;  %762 = vmatprep.mubr.msk.bf16.mxu0 (!%p188_p2), %vm829_vm1, %v828_v1  ;;  %229 = vst.msk [vmem:[#allocation2] sm:$0xff] (!%p188_p2), %vm228_vm0, %v828_v1  ;;  %443 = vst.msk [vmem:[#allocation3] sm:$0xff] (!%p188_p2), %vm228_vm0, %v828_v1  ;;  %vm379_vm4 = vcmask (!%p188_p2), 1046528   ;;  %v809_v38 = vld [vmem:[%s975_s3 + $0x8] sm:$0xff] (!%p188_p2)   ;;  %v810_v39 = vld [vmem:[%s975_s3] sm:$0xff] (!%p188_p2)  }
   0x8   : > { %444 = vst.msk [vmem:[#allocation3 + $0x8] sm:$0xff] (!%p188_p2), %vm228_vm0, %v828_v1  ;;  %445 = vst.msk [vmem:[#allocation3 + $0x10] sm:$0xff] (!%p188_p2), %vm228_vm0, %v828_v1  ;;  %772 = vmatprep.subr.bf16.mxu0 (!%p188_p2), %v828_v1  ;;  %767 = vmatpush3.bf16.msra.mxu1 (!%p188_p2), %v807_v2  ;;  %v732_v50 = vld [vmem:[%s974_s2] ss:$0 sm:$0xff] (!%p188_p2) }
   0x9   : > { %768 = vmatprep.mubr.msk.bf16.mxu1 (!%p188_p2), %vm829_vm1, %v828_v1  ;;  %233 = vst.msk [vmem:[#allocation2 + $0x18] sm:$0x3] (!%p188_p2), %vm232_vm2, %v828_v1  ;;  %446 = vst.msk [vmem:[#allocation3 + $0x18] sm:$0x3] (!%p188_p2), %vm232_vm2, %v828_v1  ;;  %778 = vmatprep.subr.bf16.mxu1 (!%p188_p2), %v828_v1 }
   0xd   : > { %s979_s19 = smov (!%p215_p3, %s713_s19), 1 }
   0xe   : > { %s746_s24 = sshll.u32 %s979_s19, 4  ;;  %v254_v23 = vld [vmem:[#allocation2] sm:$0xff] }
   0xf   : > { %s219_s27 = scalar_lea.vmem %s972_s0, %s746_s24  ;;  %s224_s17 = scalar_lea.vmem %s977_s5, %s746_s24 }
  0x10   : > { %v904_v3 = vld [vmem:[%s219_s27] sm:$0xff]  ;;  %v906_v4 = vld [vmem:[%s219_s27 + $0x8] sm:$0xff]  ;;  %v257_v24 = vld [vmem:[#allocation2 + $0x18] sm:$0x3] }
  0x11   : > { %v234_v5 = vmul.f32 %v904_v3, %v904_v3  ;;  %v235_v6 = vmul.f32 %v906_v4, %v906_v4  ;;  %v373_v29 = vpack.c.bf16 %v257_v24, %v257_v24 }
  0x13   : > { %v236_v7 = vmul.f32 %v234_v5, %v904_v3  ;;  %v237_v8 = vmul.f32 %v235_v6, %v906_v4  ;;  %v381_v35 = vrot.slane %v373_v29, 1 }
  0x15   : > { %v238_v9 = vmul.f32 0.044715, %v236_v7  ;;  %v239_v10 = vmul.f32 0.044715, %v237_v8 }
  0x17   : > { %v240_v11 = vadd.f32 %v238_v9, %v904_v3  ;;  %v241_v12 = vadd.f32 %v239_v10, %v906_v4 }
  0x19   : > { %v242_v13 = vmul.f32 0.7978846, %v240_v11  ;;  %v243_v14 = vmul.f32 0.7978846, %v241_v12 }
  0x1b   : > { %812 = vtanh.f32 %v242_v13 }
  0x1c   : > { %814 = vtanh.f32 %v243_v14 }
  0x25   : > { %v813_v15 = vpop.eup %812 }
  0x26   : > { %v815_v16 = vpop.eup %814  ;;  %v246_v17 = vadd.f32 1.0, %v813_v15 }
  0x27   : > { %v247_v18 = vadd.f32 1.0, %v815_v16  ;;  %v467_v16 = vld [vmem:[#allocation3] sm:$0xff] }
  0x28   : > { %v248_v19 = vmul.f32 0.5, %v246_v17 }
  0x29   : > { %v249_v20 = vmul.f32 0.5, %v247_v18 }
  0x2a   : > { %v250_v21 = vmul.f32 %v248_v19, %v904_v3  ;;  %v470_v19 = vld [vmem:[#allocation3 + $0x18] sm:$0x3] }
  0x2b   : > { %v251_v22 = vmul.f32 %v249_v20, %v906_v4  ;;  %v585_v24 = vpack.c.bf16 %v470_v19, %v470_v19 }
  0x2c   : > { %252 = vst.msk [vmem:[#allocation2 + $0x8] sm:$0xff] %vm228_vm0, %v250_v21  ;;  %v811_v21 = vld [vmem:[%s975_s3 + $0x10] sm:$0xff]  }
  0x2d   : > { %253 = vst.msk [vmem:[#allocation2 + $0x10] sm:$0xff] %vm228_vm0, %v251_v22  ;;  %v592_v29 = vrot.slane %v585_v24, 1 }
  0x33   : > { %v255_v25 = vld [vmem:[#allocation2 + $0x8] sm:$0xff] }
  0x34   : > { %v256_v26 = vld [vmem:[#allocation2 + $0x10] sm:$0xff]  ;;  %v259_v28 = vpack.c.bf16 %v255_v25, %v254_v23 }
  0x35   : > { %v263_v30 = vpack.c.bf16 %v256_v26, %v255_v25  ;;  %v260_v31 = vpack.c.bf16 %v256_v26, %v256_v26 }
  0x36   : > { %v320_v32 = vrot.slane %v259_v28, 3 }
  0x37   : > { %763 = vmatmul.mubr.msk.bf16.vlgmr.msra.gmra.mrb[0].mxu0 %vm228_vm0, %v263_v30  ;;  %v321_v33 = vrot.slane %v260_v31, 3  ;;  %v380_v34 = vrot.slane %v263_v30, 1 }
  0x38   : > { %773 = vmatpush3.bf16.msra.mxu0 %v808_v27  ;;  %774 = vmatprep.mubr.msk.bf16.mxu0 %vm829_vm1, %v828_v1 }
  0x39   : > { %v322_v36 = vsel %vm319_vm3, %v320_v32, %v321_v33  ;;  %784 = vmatprep.subr.bf16.mxu0 %v828_v1  ;;  %v382_v37 = vsel %vm379_vm4, %v380_v34, %v381_v35 }
  0x3a   : > { %769 = vmatmul.mubr.msk.bf16.vlgmr.msra.gmra.mrb[0].mxu1 %vm228_vm0, %v322_v36 }
  0x3b   : > { %780 = vmatprep.mubr.msk.bf16.mxu1 %vm829_vm1, %v828_v1  ;;  %779 = vmatpush3.bf16.msra.mxu1 %v809_v38 }
  0x3c   : > { %790 = vmatprep.subr.bf16.mxu1 %v828_v1 }
  0x3f   : > { %775 = vmatmul.mubr.msk.bf16.vlgmr.msra.gmra.mrb[4].mxu0 %vm228_vm0, %v382_v37 }
  0x40   : > { %786 = vmatprep.mubr.msk.bf16.mxu0 %vm829_vm1, %v828_v1  ;;  %785 = vmatpush3.bf16.msra.mxu0 %v810_v39 }
 0x10a   : > { %v310_v40 = vpop.f32.mrb[0].mxu0 }
 0x10b   : > { %v764_v41 = vpop.f32.mrb[1].mxu0 }
 0x10c   : > { %v313_v42 = vpop.f32.mrb[2].mxu0 }
 0x10d   : > { %v765_v43 = vpop.f32.mrb[3].mxu0  ;;  %v366_v44 = vpop.f32.mrb[0].mxu1 }
 0x10e   : > { %v367_v45 = vadd.f32 %v366_v44, %v310_v40  ;;  %v770_v46 = vpop.f32.mrb[1].mxu1  ;;  %v743_v40 = vld [vmem:[%s976_s4] ss:$0 sm:$0xff] }
 0x10f   : > { %v369_v47 = vpop.f32.mrb[2].mxu1 }
 0x110   : > { %v370_v48 = vadd.f32 %v369_v47, %v313_v42  ;;  %v771_v49 = vpop.f32.mrb[3].mxu1 }
 0x112   : > { %v426_v51 = vpop.f32.mrb[4].mxu0 }
 0x113   : > { %v433_v52 = vadd.f32 %v426_v51, %v367_v45  ;;  %v776_v53 = vpop.f32.mrb[5].mxu0 }
 0x114   : > { %v429_v54 = vpop.f32.mrb[6].mxu0 }
 0x115   : > { %v441_v55 = vadd.f32 %v732_v50, %v433_v52  ;;  %v434_v56 = vadd.f32 %v429_v54, %v370_v48  ;;  %v777_v57 = vpop.f32.mrb[7].mxu0 }
 0x117   : > { %v447_v58 = vmul.f32 %v441_v55, %v441_v55  ;;  %v442_v59 = vadd.f32 %v732_v50, %v434_v56 }
 0x119   : > { %v449_v60 = vmul.f32 %v447_v58, %v441_v55  ;;  %v448_v61 = vmul.f32 %v442_v59, %v442_v59 }
 0x11b   : > { %v451_v62 = vmul.f32 0.044715, %v449_v60  ;;  %v450_v63 = vmul.f32 %v448_v61, %v442_v59 }
 0x11d   : > { %v453_v0 = vadd.f32 %v451_v62, %v441_v55  ;;  %v452_v2 = vmul.f32 0.044715, %v450_v63 }
 0x11f   : > { %v455_v5 = vmul.f32 0.7978846, %v453_v0  ;;  %v454_v6 = vadd.f32 %v452_v2, %v442_v59 }
 0x121   : > { %816 = vtanh.f32 %v455_v5  ;;  %v456_v7 = vmul.f32 0.7978846, %v454_v6 }
 0x123   : > { %818 = vtanh.f32 %v456_v7 }
 0x12b   : > { %v817_v8 = vpop.eup %816 }
 0x12c   : > { %v459_v9 = vadd.f32 1.0, %v817_v8 }
 0x12d   : > { %v819_v10 = vpop.eup %818 }
 0x12e   : > { %v461_v11 = vmul.f32 0.5, %v459_v9  ;;  %v460_v12 = vadd.f32 1.0, %v819_v10 }
 0x130   : > { %v463_v13 = vmul.f32 %v461_v11, %v441_v55  ;;  %v462_v14 = vmul.f32 0.5, %v460_v12 }
 0x132   : > { %465 = vst.msk [vmem:[#allocation3 + $0x8] sm:$0xff] %vm228_vm0, %v463_v13  ;;  %v464_v15 = vmul.f32 %v462_v14, %v442_v59 }
 0x134   : > { %466 = vst.msk [vmem:[#allocation3 + $0x10] sm:$0xff] %vm228_vm0, %v464_v15 }
 0x139   : > { %v468_v17 = vld [vmem:[#allocation3 + $0x8] sm:$0xff] }
 0x13a   : > { %v472_v18 = vpack.c.bf16 %v468_v17, %v467_v16 }
 0x13b   : > { %v469_v20 = vld [vmem:[#allocation3 + $0x10] sm:$0xff] }
 0x13c   : > { %v476_v22 = vpack.c.bf16 %v469_v20, %v468_v17  ;;  %v473_v23 = vpack.c.bf16 %v469_v20, %v469_v20  ;;  %v532_v25 = vrot.slane %v472_v18, 3 }
 0x13e   : > { %781 = vmatmul.mubr.msk.bf16.vlgmr.msra.gmra.mrb[4].mxu1 %vm228_vm0, %v476_v22  ;;  %v533_v26 = vrot.slane %v473_v23, 3  ;;  %v591_v28 = vrot.slane %v476_v22, 1 }
 0x13f   : > { %791 = vmatpush3.bf16.msra.mxu1 %v811_v21  ;;  %792 = vmatprep.mubr.msk.bf16.mxu1 %vm829_vm1, %v828_v1 }
 0x140   : > { %v534_v27 = vsel %vm319_vm3, %v532_v25, %v533_v26  ;;  %v593_v30 = vsel %vm379_vm4, %v591_v28, %v592_v29 }
 0x141   : > { %787 = vmatmul.mubr.msk.bf16.vlgmr.msra.gmra.mrb[8].mxu0 %vm228_vm0, %v534_v27 }
 0x146   : > { %793 = vmatmul.mubr.msk.bf16.vlgmr.msra.gmra.mrb[8].mxu1 %vm228_vm0, %v593_v30 }
 0x211   : > { %v523_v31 = vpop.f32.mrb[4].mxu1 }
 0x212   : > { %v782_v32 = vpop.f32.mrb[5].mxu1 }
 0x213   : > { %v526_v33 = vpop.f32.mrb[6].mxu1 }
 0x214   : > { %v783_v34 = vpop.f32.mrb[7].mxu1  ;;  %v578_v35 = vpop.f32.mrb[8].mxu0 }
 0x215   : > { %v579_v36 = vadd.f32 %v578_v35, %v523_v31  ;;  %v788_v37 = vpop.f32.mrb[9].mxu0 }
 0x216   : > { %v581_v38 = vpop.f32.mrb[10].mxu0 }
 0x217   : > { %v582_v1 = vadd.f32 %v581_v38, %v526_v33  ;;  %v789_v39 = vpop.f32.mrb[11].mxu0 }
 0x219   : > { %v637_v41 = vpop.f32.mrb[8].mxu1 }
 0x21a   : > { %v644_v42 = vadd.f32 %v637_v41, %v579_v36  ;;  %v794_v43 = vpop.f32.mrb[9].mxu1 }
 0x21b   : > { %v640_v44 = vpop.f32.mrb[10].mxu1 }
 0x21c   : > { %v652_v45 = vadd.f32 %v743_v40, %v644_v42  ;;  %v645_v46 = vadd.f32 %v640_v44, %v582_v1  ;;  %v795_v47 = vpop.f32.mrb[11].mxu1 }
 0x21e   : > { %v654_v48 = vadd.f32 %v652_v45, %v904_v3  ;;  %v653_v49 = vadd.f32 %v743_v40, %v645_v46 }
 0x220   : > { %656 = vst.msk [vmem:[%s224_s17] sm:$0xff] %vm228_vm0, %v654_v48  ;;  %v655_v50 = vadd.f32 %v653_v49, %v906_v4 }
 0x222   : > { %657 = vst.msk [vmem:[%s224_s17 + $0x8] sm:$0xff] %vm228_vm0, %v655_v50 }
 0x223 PF: > { %s15_s18 = sadd.s32 1, %s826_s18  }
 0x224   : > { %p12_p4 = scmp.ge.s32.totalorder %s15_s18, 4  }
 0x226   :  { %14 = sbr.rel (!%p12_p4) target bundleno = 1 (0x1), region = 74 }

// kernel: reverse.1
= control target key start
LH: loop header
LB: loop body
LE: loop exit
PB: predicated region body
PF: predicated region fallthrough
CT: control target
= control target key end

     0   :  { %s92_s0 = inlined_call_operand.vmem [shape: f32[2,4,7], index: 0, kind: input, shape index: {}]   ;;  %s93_s1 = inlined_call_operand.vmem [shape: f32[2,4,7], index: 1, kind: output, shape index: {}]  }
   0x1   :  { %v28_v0 = vld [vmem:[%s92_s0 + $0xc] sm:$0x3]  ;;  %v29_v1 = vld [vmem:[%s92_s0 + $0xa] sm:$0x3]  ;;  %v31_v2 = vld [vmem:[%s92_s0 + $0x8] sm:$0x3] }
   0x2   :  { %4 = vst [vmem:[%s93_s1] sm:$0x3] %v28_v0  ;;  %30 = vst [vmem:[%s93_s1 + $0x2] sm:$0x3] %v29_v1  ;;  %v33_v3 = vld [vmem:[%s92_s0 + $0x6] sm:$0x3] }
   0x3   :  { %32 = vst [vmem:[%s93_s1 + $0x4] sm:$0x3] %v31_v2  ;;  %v35_v4 = vld [vmem:[%s92_s0 + $0x4] sm:$0x3]  ;;  %v37_v5 = vld [vmem:[%s92_s0 + $0x2] sm:$0x3] }
   0x4   :  { %34 = vst [vmem:[%s93_s1 + $0x6] sm:$0x3] %v33_v3  ;;  %36 = vst [vmem:[%s93_s1 + $0x8] sm:$0x3] %v35_v4  ;;  %v25_v6 = vld [vmem:[%s92_s0] sm:$0x3] }
   0x5   :  { %38 = vst [vmem:[%s93_s1 + $0xa] sm:$0x3] %v37_v5  ;;  %39 = vst [vmem:[%s93_s1 + $0xc] sm:$0x3] %v25_v6 }

// kernel: cost_tcn_encoder_forward.15
= control target key start
LH: loop header
LB: loop body
LE: loop exit
PB: predicated region body
PF: predicated region fallthrough
CT: control target
= control target key end

     0   :  { %vm96_vm0 = vcmask 1043456   ;;  %v1815_v0 = vmov 0.0   ;;  %vm1816_vm1 = vmmov 0   ;;  %vm92_vm2 = vcmask 64512   ;;  %s2420_s2 = inlined_call_operand.vmem [shape: bf16[9,8,4], index: 2, kind: input, shape index: {}]   ;;  %s2421_s0 = inlined_call_operand.vmem [shape: f32[9,2,8], index: 0, kind: input, shape index: {}]   ;;  %s2422_s3 = inlined_call_operand.vmem [shape: bf16[9,8,4], index: 3, kind: input, shape index: {}]   ;;  %s2423_s1 = inlined_call_operand.vmem [shape: f32[9,2,8], index: 1, kind: input, shape index: {}]   ;;  %s2424_s4 = inlined_call_operand.vmem [shape: bf16[9,8,4], index: 4, kind: input, shape index: {}]   ;;  %s2425_s5 = inlined_call_operand.vmem [shape: f32[9,1,4], index: 5, kind: input, shape index: {}]   ;;  %s2426_s7 = inlined_call_operand.vmem [shape: f32[9,2,4], index: 7, kind: output, shape index: {0}]   ;;  %s2427_s6 = inlined_call_operand.vmem [shape: f32[9,1,4], index: 6, kind: input, shape index: {}]   ;;  %s2428_s8 = inlined_call_operand.vmem [shape: f32[9,2,4], index: 8, kind: output, shape index: {1}]  }
   0x1   :  { %1651 = vmatprep.subr.bf16.mxu0 %v1815_v0  ;;  %1657 = vmatprep.subr.bf16.mxu1 %v1815_v0  ;;  %v83_v1 = vld [vmem:[%s2420_s2] sm:$0xf]  ;;  %v84_v2 = vld [vmem:[%s2420_s2 + $0x4] sm:$0xf]  ;;  %v85_v9 = vld [vmem:[%s2420_s2 + $0x8] sm:$0xf] }
   0x2   :  { %v1873_v3 = vld [vmem:[%s2421_s0] sm:$0x3]  ;;  %v98_v4 = vsel %vm96_vm0, %v83_v1, 0  ;;  %v144_v5 = vsel %vm96_vm0, %v84_v2, 0  ;;  %1653 = vmatprep.mubr.msk.bf16.mxu0 %vm1816_vm1, %v1815_v0  ;;  %1659 = vmatprep.mubr.msk.bf16.mxu1 %vm1816_vm1, %v1815_v0  ;;  %v1886_v7 = vld [vmem:[%s2421_s0 + $0x2] sm:$0x3] }
   0x3   :  { %v65_v6 = vpack.c.bf16 %v1873_v3, %v1873_v3  ;;  %1652 = vmatpush3.bf16.msra.mxu0 %v98_v4  ;;  %1658 = vmatpush3.bf16.msra.mxu1 %v144_v5  ;;  %v66_v8 = vpack.c.bf16 %v1886_v7, %v1886_v7  ;;  %v86_v10 = vld [vmem:[%s2420_s2 + $0xc] sm:$0xf]  ;;  %v190_v11 = vsel %vm96_vm0, %v85_v9, 0  ;;  %v1905_v13 = vld [vmem:[%s2421_s0 + $0x4] sm:$0x3]  ;;  %vm1435_vm3 = vcmask 25600  }
   0x4   :  { %1663 = vmatprep.subr.bf16.mxu0 %v1815_v0  ;;  %1669 = vmatprep.subr.bf16.mxu1 %v1815_v0  ;;  %v236_v12 = vsel %vm96_vm0, %v86_v10, 0  ;;  %v1910_v14 = vld [vmem:[%s2421_s0 + $0x6] sm:$0x3]  ;;  %v87_v15 = vld [vmem:[%s2420_s2 + $0x10] sm:$0xf]  ;;  %v67_v17 = vpack.c.bf16 %v1905_v13, %v1905_v13 }
   0x5   :  { %v88_v16 = vld [vmem:[%s2420_s2 + $0x14] sm:$0xf]  ;;  %v68_v18 = vpack.c.bf16 %v1910_v14, %v1910_v14  ;;  %v282_v19 = vsel %vm96_vm0, %v87_v15, 0  ;;  %v1935_v21 = vld [vmem:[%s2421_s0 + $0x8] sm:$0x3] }
   0x6   :  { %1654 = vmatmul.mubr.msk.bf16.vlgmr.msra.gmra.mrb[0].mxu0 %vm92_vm2, %v65_v6  ;;  %1660 = vmatmul.mubr.msk.bf16.vlgmr.msra.gmra.mrb[0].mxu1 %vm92_vm2, %v66_v8  ;;  %v328_v20 = vsel %vm96_vm0, %v88_v16, 0  ;;  %v1940_v22 = vld [vmem:[%s2421_s0 + $0xa] sm:$0x3]  ;;  %v89_v23 = vld [vmem:[%s2420_s2 + $0x18] sm:$0xf]  ;;  %v69_v25 = vpack.c.bf16 %v1935_v21, %v1935_v21 }
   0x7   :  { %1664 = vmatpush3.bf16.msra.mxu0 %v190_v11  ;;  %1670 = vmatpush3.bf16.msra.mxu1 %v236_v12  ;;  %v90_v24 = vld [vmem:[%s2420_s2 + $0x1c] sm:$0xf]  ;;  %v70_v26 = vpack.c.bf16 %v1940_v22, %v1940_v22  ;;  %v374_v27 = vsel %vm96_vm0, %v89_v23, 0  ;;  %v1965_v29 = vld [vmem:[%s2421_s0 + $0xc] sm:$0x3] }
   0x8   :  { %1665 = vmatprep.mubr.msk.bf16.mxu0 %vm1816_vm1, %v1815_v0  ;;  %1671 = vmatprep.mubr.msk.bf16.mxu1 %vm1816_vm1, %v1815_v0  ;;  %v420_v28 = vsel %vm96_vm0, %v90_v24, 0  ;;  %v1970_v30 = vld [vmem:[%s2421_s0 + $0xe] sm:$0x3]  ;;  %v91_v31 = vld [vmem:[%s2420_s2 + $0x20] sm:$0xf]  ;;  %v71_v33 = vpack.c.bf16 %v1965_v29, %v1965_v29 }
   0x9   :  { %1675 = vmatprep.subr.bf16.mxu0 %v1815_v0  ;;  %1681 = vmatprep.subr.bf16.mxu1 %v1815_v0  ;;  %v508_v32 = vld [vmem:[%s2422_s3] sm:$0xf]  ;;  %v72_v34 = vpack.c.bf16 %v1970_v30, %v1970_v30  ;;  %v466_v35 = vsel %vm96_vm0, %v91_v31, 0  ;;  %v2000_v38 = vld [vmem:[%s2421_s0 + $0x10] sm:$0x3] }
   0xa   :  { %v521_v36 = vsel %vm96_vm0, %v508_v32, 0  ;;  %v1995_v37 = vld [vmem:[%s2423_s1] sm:$0x3]  ;;  %v509_v39 = vld [vmem:[%s2422_s3 + $0x4] sm:$0xf]  ;;  %v73_v42 = vpack.c.bf16 %v2000_v38, %v2000_v38 }
   0xb   :  { %v510_v40 = vld [vmem:[%s2422_s3 + $0x8] sm:$0xf]  ;;  %v74_v41 = vpack.c.bf16 %v1995_v37, %v1995_v37  ;;  %v567_v43 = vsel %vm96_vm0, %v509_v39, 0  ;;  %v2025_v45 = vld [vmem:[%s2423_s1 + $0x2] sm:$0x3] }
   0xc   :  { %v613_v44 = vsel %vm96_vm0, %v510_v40, 0  ;;  %v2030_v46 = vld [vmem:[%s2423_s1 + $0x4] sm:$0x3]  ;;  %v511_v47 = vld [vmem:[%s2422_s3 + $0xc] sm:$0xf]  ;;  %v75_v49 = vpack.c.bf16 %v2025_v45, %v2025_v45 }
   0xd   :  { %v512_v48 = vld [vmem:[%s2422_s3 + $0x10] sm:$0xf]  ;;  %v76_v50 = vpack.c.bf16 %v2030_v46, %v2030_v46  ;;  %v659_v51 = vsel %vm96_vm0, %v511_v47, 0  ;;  %v2055_v53 = vld [vmem:[%s2423_s1 + $0x6] sm:$0x3] }
   0xe   :  { %1666 = vmatmul.mubr.msk.bf16.vlgmr.msra.gmra.mrb[4].mxu0 %vm92_vm2, %v67_v17  ;;  %1672 = vmatmul.mubr.msk.bf16.vlgmr.msra.gmra.mrb[4].mxu1 %vm92_vm2, %v68_v18  ;;  %v705_v52 = vsel %vm96_vm0, %v512_v48, 0  ;;  %v2060_v54 = vld [vmem:[%s2423_s1 + $0x8] sm:$0x3]  ;;  %v513_v55 = vld [vmem:[%s2422_s3 + $0x14] sm:$0xf]  ;;  %v77_v57 = vpack.c.bf16 %v2055_v53, %v2055_v53  ;;  %v47_v18 = vadd.f32 %v1995_v37, %v1873_v3 }
   0xf   :  { %1676 = vmatpush3.bf16.msra.mxu0 %v282_v19  ;;  %1682 = vmatpush3.bf16.msra.mxu1 %v328_v20  ;;  %v514_v56 = vld [vmem:[%s2422_s3 + $0x18] sm:$0xf]  ;;  %v78_v58 = vpack.c.bf16 %v2060_v54, %v2060_v54  ;;  %v751_v59 = vsel %vm96_vm0, %v513_v55, 0  ;;  %v2085_v61 = vld [vmem:[%s2423_s1 + $0xa] sm:$0x3]  ;;  %v48_v19 = vadd.f32 %v2025_v45, %v1886_v7 }
  0x10   :  { %1677 = vmatprep.mubr.msk.bf16.mxu0 %vm1816_vm1, %v1815_v0  ;;  %1683 = vmatprep.mubr.msk.bf16.mxu1 %vm1816_vm1, %v1815_v0  ;;  %v797_v60 = vsel %vm96_vm0, %v514_v56, 0  ;;  %v2090_v62 = vld [vmem:[%s2423_s1 + $0xc] sm:$0x3]  ;;  %v515_v63 = vld [vmem:[%s2422_s3 + $0x1c] sm:$0xf]  ;;  %v79_v2 = vpack.c.bf16 %v2085_v61, %v2085_v61  ;;  %v56_v20 = vpack.c.bf16 %v47_v18, %v47_v18 }
  0x11   :  { %1687 = vmatprep.subr.bf16.mxu0 %v1815_v0  ;;  %1693 = vmatprep.subr.bf16.mxu1 %v1815_v0  ;;  %v516_v1 = vld [vmem:[%s2422_s3 + $0x20] sm:$0xf]  ;;  %v80_v4 = vpack.c.bf16 %v2090_v62, %v2090_v62  ;;  %v843_v5 = vsel %vm96_vm0, %v515_v63, 0  ;;  %v2115_v8 = vld [vmem:[%s2423_s1 + $0xe] sm:$0x3]  ;;  %v57_v23 = vpack.c.bf16 %v48_v19, %v48_v19 }
  0x12   :  { %v889_v6 = vsel %vm96_vm0, %v516_v1, 0  ;;  %v2120_v9 = vld [vmem:[%s2423_s1 + $0x10] sm:$0x3]  ;;  %v931_v10 = vld [vmem:[%s2424_s4] sm:$0xf]  ;;  %v81_v12 = vpack.c.bf16 %v2115_v8, %v2115_v8 }
  0x13   :  { %v932_v11 = vld [vmem:[%s2424_s4 + $0x4] sm:$0xf]  ;;  %v82_v15 = vpack.c.bf16 %v2120_v9, %v2120_v9  ;;  %v944_v16 = vsel %vm96_vm0, %v931_v10, 0  ;;  %v933_v3 = vld [vmem:[%s2424_s4 + $0x8] sm:$0xf] }
  0x14   :  { %v990_v17 = vsel %vm96_vm0, %v932_v11, 0  ;;  %v934_v7 = vld [vmem:[%s2424_s4 + $0xc] sm:$0xf]  ;;  %v1036_v24 = vsel %vm96_vm0, %v933_v3, 0  ;;  %v1579_v3 = vld [vmem:[%s2425_s5] ss:$0 sm:$0xff] }
  0x16   :  { %1678 = vmatmul.mubr.msk.bf16.vlgmr.msra.gmra.mrb[8].mxu0 %vm92_vm2, %v69_v25  ;;  %1684 = vmatmul.mubr.msk.bf16.vlgmr.msra.gmra.mrb[8].mxu1 %vm92_vm2, %v70_v26  ;;  %v1082_v25 = vsel %vm96_vm0, %v934_v7, 0  ;;  %v49_v26 = vadd.f32 %v2030_v46, %v1905_v13  ;;  %v936_v13 = vld [vmem:[%s2424_s4 + $0x14] sm:$0xf] }
  0x17   :  { %1688 = vmatpush3.bf16.msra.mxu0 %v374_v27  ;;  %1694 = vmatpush3.bf16.msra.mxu1 %v420_v28  ;;  %v50_v27 = vadd.f32 %v2055_v53, %v1910_v14  ;;  %v935_v28 = vld [vmem:[%s2424_s4 + $0x10] sm:$0xf] }
  0x18   :  { %1689 = vmatprep.mubr.msk.bf16.mxu0 %vm1816_vm1, %v1815_v0  ;;  %1695 = vmatprep.mubr.msk.bf16.mxu1 %vm1816_vm1, %v1815_v0  ;;  %v58_v14 = vpack.c.bf16 %v49_v26, %v49_v26  ;;  %v1128_v32 = vsel %vm96_vm0, %v935_v28, 0 }
  0x19   :  { %1699 = vmatprep.subr.bf16.mxu0 %v1815_v0  ;;  %1705 = vmatprep.subr.bf16.mxu1 %v1815_v0  ;;  %v59_v31 = vpack.c.bf16 %v50_v27, %v50_v27 }
  0x1e   :  { %1690 = vmatmul.mubr.msk.bf16.vlgmr.msra.gmra.mrb[12].mxu0 %vm92_vm2, %v71_v33  ;;  %1696 = vmatmul.mubr.msk.bf16.vlgmr.msra.gmra.mrb[12].mxu1 %vm92_vm2, %v72_v34  ;;  %v1174_v33 = vsel %vm96_vm0, %v936_v13, 0  ;;  %v51_v34 = vadd.f32 %v2060_v54, %v1935_v21  ;;  %v938_v21 = vld [vmem:[%s2424_s4 + $0x1c] sm:$0xf] }
  0x1f   :  { %1700 = vmatpush3.bf16.msra.mxu0 %v466_v35  ;;  %1706 = vmatpush3.bf16.msra.mxu1 %v521_v36  ;;  %v52_v35 = vadd.f32 %v2085_v61, %v1940_v22  ;;  %v937_v36 = vld [vmem:[%s2424_s4 + $0x18] sm:$0xf]  ;;  %v1266_v40 = vsel %vm96_vm0, %v938_v21, 0 }
  0x20   :  { %1701 = vmatprep.mubr.msk.bf16.mxu0 %vm1816_vm1, %v1815_v0  ;;  %1707 = vmatprep.mubr.msk.bf16.mxu1 %vm1816_vm1, %v1815_v0  ;;  %v60_v22 = vpack.c.bf16 %v51_v34, %v51_v34  ;;  %v1220_v39 = vsel %vm96_vm0, %v937_v36, 0 }
  0x21   :  { %1711 = vmatprep.subr.bf16.mxu0 %v1815_v0  ;;  %1717 = vmatprep.subr.bf16.mxu1 %v1815_v0  ;;  %v61_v37 = vpack.c.bf16 %v52_v35, %v52_v35 }
  0x26   :  { %1702 = vmatmul.mubr.msk.bf16.vlgmr.msra.gmra.mrb[16].mxu0 %vm92_vm2, %v73_v42  ;;  %1708 = vmatmul.mubr.msk.bf16.vlgmr.msra.gmra.mrb[16].mxu1 %vm92_vm2, %v74_v41  ;;  %v53_v41 = vadd.f32 %v2090_v62, %v1965_v29  ;;  %v54_v42 = vadd.f32 %v2115_v8, %v1970_v30  ;;  %v55_v30 = vadd.f32 %v2120_v9, %v2000_v38 }
  0x27   :  { %1712 = vmatpush3.bf16.msra.mxu0 %v567_v43  ;;  %1718 = vmatpush3.bf16.msra.mxu1 %v613_v44  ;;  %v939_v43 = vld [vmem:[%s2424_s4 + $0x20] sm:$0xf] }
  0x28   :  { %1713 = vmatprep.mubr.msk.bf16.mxu0 %vm1816_vm1, %v1815_v0  ;;  %1719 = vmatprep.mubr.msk.bf16.mxu1 %vm1816_vm1, %v1815_v0  ;;  %v62_v44 = vpack.c.bf16 %v53_v41, %v53_v41  ;;  %v63_v45 = vpack.c.bf16 %v54_v42, %v54_v42  ;;  %v1312_v29 = vsel %vm96_vm0, %v939_v43, 0  ;;  %v64_v46 = vpack.c.bf16 %v55_v30, %v55_v30  ;;  %v1582_v43 = vld [vmem:[%s2425_s5 + $0x3] ss:$0 sm:$0xff] }
  0x29   :  { %1723 = vmatprep.subr.bf16.mxu0 %v1815_v0  ;;  %1729 = vmatprep.subr.bf16.mxu1 %v1815_v0 }
  0x2e   :  { %1714 = vmatmul.mubr.msk.bf16.vlgmr.msra.gmra.mrb[20].mxu0 %vm92_vm2, %v75_v49  ;;  %1720 = vmatmul.mubr.msk.bf16.vlgmr.msra.gmra.mrb[20].mxu1 %vm92_vm2, %v76_v50 }
  0x2f   :  { %1724 = vmatpush3.bf16.msra.mxu0 %v659_v51  ;;  %1730 = vmatpush3.bf16.msra.mxu1 %v705_v52 }
  0x30   :  { %1725 = vmatprep.mubr.msk.bf16.mxu0 %vm1816_vm1, %v1815_v0  ;;  %1731 = vmatprep.mubr.msk.bf16.mxu1 %vm1816_vm1, %v1815_v0 }
  0x31   :  { %1735 = vmatprep.subr.bf16.mxu0 %v1815_v0  ;;  %1741 = vmatprep.subr.bf16.mxu1 %v1815_v0 }
  0x36   :  { %1726 = vmatmul.mubr.msk.bf16.vlgmr.msra.gmra.mrb[24].mxu0 %vm92_vm2, %v77_v57  ;;  %1732 = vmatmul.mubr.msk.bf16.vlgmr.msra.gmra.mrb[24].mxu1 %vm92_vm2, %v78_v58 }
  0x37   :  { %1736 = vmatpush3.bf16.msra.mxu0 %v751_v59  ;;  %1742 = vmatpush3.bf16.msra.mxu1 %v797_v60 }
  0x38   :  { %1737 = vmatprep.mubr.msk.bf16.mxu0 %vm1816_vm1, %v1815_v0  ;;  %1743 = vmatprep.mubr.msk.bf16.mxu1 %vm1816_vm1, %v1815_v0 }
  0x39   :  { %1747 = vmatprep.subr.bf16.mxu0 %v1815_v0  ;;  %1753 = vmatprep.subr.bf16.mxu1 %v1815_v0 }
  0x3e   :  { %1738 = vmatmul.mubr.msk.bf16.vlgmr.msra.gmra.mrb[28].mxu0 %vm92_vm2, %v79_v2  ;;  %1744 = vmatmul.mubr.msk.bf16.vlgmr.msra.gmra.mrb[28].mxu1 %vm92_vm2, %v80_v4 }
  0x3f   :  { %1748 = vmatpush3.bf16.msra.mxu0 %v843_v5  ;;  %1754 = vmatpush3.bf16.msra.mxu1 %v889_v6 }
  0x40   :  { %1749 = vmatprep.mubr.msk.bf16.mxu0 %vm1816_vm1, %v1815_v0  ;;  %1755 = vmatprep.mubr.msk.bf16.mxu1 %vm1816_vm1, %v1815_v0 }
  0x41   :  { %1759 = vmatprep.subr.bf16.mxu0 %v1815_v0  ;;  %1765 = vmatprep.subr.bf16.mxu1 %v1815_v0 }
  0x46   :  { %1750 = vmatmul.mubr.msk.bf16.vlgmr.msra.gmra.mrb[32].mxu0 %vm92_vm2, %v81_v12  ;;  %1756 = vmatmul.mubr.msk.bf16.vlgmr.msra.gmra.mrb[32].mxu1 %vm92_vm2, %v82_v15 }
  0x47   :  { %1760 = vmatpush3.bf16.msra.mxu0 %v944_v16  ;;  %1766 = vmatpush3.bf16.msra.mxu1 %v990_v17 }
  0x48   :  { %1761 = vmatprep.mubr.msk.bf16.mxu0 %vm1816_vm1, %v1815_v0  ;;  %1767 = vmatprep.mubr.msk.bf16.mxu1 %vm1816_vm1, %v1815_v0 }
  0x49   :  { %1771 = vmatprep.subr.bf16.mxu0 %v1815_v0  ;;  %1777 = vmatprep.subr.bf16.mxu1 %v1815_v0 }
  0x4e   :  { %1762 = vmatmul.mubr.msk.bf16.vlgmr.msra.gmra.mrb[36].mxu0 %vm92_vm2, %v56_v20  ;;  %1768 = vmatmul.mubr.msk.bf16.vlgmr.msra.gmra.mrb[36].mxu1 %vm92_vm2, %v57_v23 }
  0x4f   :  { %1772 = vmatpush3.bf16.msra.mxu0 %v1036_v24  ;;  %1778 = vmatpush3.bf16.msra.mxu1 %v1082_v25 }
  0x50   :  { %1773 = vmatprep.mubr.msk.bf16.mxu0 %vm1816_vm1, %v1815_v0  ;;  %1779 = vmatprep.mubr.msk.bf16.mxu1 %vm1816_vm1, %v1815_v0 }
  0x51   :  { %1783 = vmatprep.subr.bf16.mxu0 %v1815_v0  ;;  %1789 = vmatprep.subr.bf16.mxu1 %v1815_v0 }
  0x56   :  { %1774 = vmatmul.mubr.msk.bf16.vlgmr.msra.gmra.mrb[40].mxu0 %vm92_vm2, %v58_v14  ;;  %1780 = vmatmul.mubr.msk.bf16.vlgmr.msra.gmra.mrb[40].mxu1 %vm92_vm2, %v59_v31  ;;  %v1580_v14 = vld [vmem:[%s2425_s5 + $0x1] ss:$0 sm:$0xff] }
  0x57   :  { %1784 = vmatpush3.bf16.msra.mxu0 %v1128_v32  ;;  %1790 = vmatpush3.bf16.msra.mxu1 %v1174_v33  ;;  %v1581_v32 = vld [vmem:[%s2425_s5 + $0x2] ss:$0 sm:$0xff] }
  0x58   :  { %1785 = vmatprep.mubr.msk.bf16.mxu0 %vm1816_vm1, %v1815_v0  ;;  %1791 = vmatprep.mubr.msk.bf16.mxu1 %vm1816_vm1, %v1815_v0 }
  0x59   :  { %1795 = vmatprep.subr.bf16.mxu0 %v1815_v0  ;;  %1801 = vmatprep.subr.bf16.mxu1 %v1815_v0 }
  0x5e   :  { %1786 = vmatmul.mubr.msk.bf16.vlgmr.msra.gmra.mrb[44].mxu0 %vm92_vm2, %v60_v22  ;;  %1792 = vmatmul.mubr.msk.bf16.vlgmr.msra.gmra.mrb[44].mxu1 %vm92_vm2, %v61_v37 }
  0x5f   :  { %1796 = vmatpush3.bf16.msra.mxu0 %v1220_v39  ;;  %1802 = vmatpush3.bf16.msra.mxu1 %v1266_v40 }
  0x60   :  { %1797 = vmatprep.mubr.msk.bf16.mxu0 %vm1816_vm1, %v1815_v0  ;;  %1803 = vmatprep.mubr.msk.bf16.mxu1 %vm1816_vm1, %v1815_v0 }
  0x61   :  { %1807 = vmatprep.subr.bf16.mxu0 %v1815_v0 }
  0x66   :  { %1798 = vmatmul.mubr.msk.bf16.vlgmr.msra.gmra.mrb[48].mxu0 %vm92_vm2, %v62_v44  ;;  %1804 = vmatmul.mubr.msk.bf16.vlgmr.msra.gmra.mrb[48].mxu1 %vm92_vm2, %v63_v45  ;;  %v1583_v45 = vld [vmem:[%s2425_s5 + $0x4] ss:$0 sm:$0xff] }
  0x67   :  { %1808 = vmatpush3.bf16.msra.mxu0 %v1312_v29  ;;  %1809 = vmatprep.mubr.msk.bf16.mxu0 %vm1816_vm1, %v1815_v0 }
  0x6e   :  { %1810 = vmatmul.mubr.msk.bf16.vlgmr.msra.gmra.mrb[52].mxu0 %vm92_vm2, %v64_v46 }
  0xd9   :  { %v2222_v47 = vpop.f32.mrb[0].mxu0  ;;  %v2224_v48 = vpop.f32.mrb[0].mxu1 }
  0xda   :  { %v1655_v49 = vpop.f32.mrb[1].mxu0  ;;  %v1661_v50 = vpop.f32.mrb[1].mxu1 }
  0xdb   :  { %v137_v51 = vpop.f32.mrb[2].mxu0  ;;  %v183_v52 = vpop.f32.mrb[2].mxu1 }
  0xdc   :  { %v1656_v53 = vpop.f32.mrb[3].mxu0  ;;  %v1662_v54 = vpop.f32.mrb[3].mxu1 }
  0xe1   :  { %v2226_v55 = vpop.f32.mrb[4].mxu0  ;;  %v2228_v38 = vpop.f32.mrb[4].mxu1 }
  0xe2   :  { %v1667_v56 = vpop.f32.mrb[5].mxu0  ;;  %v1673_v57 = vpop.f32.mrb[5].mxu1 }
  0xe3   :  { %v229_v0 = vpop.f32.mrb[6].mxu0  ;;  %v275_v58 = vpop.f32.mrb[6].mxu1 }
  0xe4   :  { %v1668_v59 = vpop.f32.mrb[7].mxu0  ;;  %v1674_v60 = vpop.f32.mrb[7].mxu1  ;;  %v1584_v0 = vld [vmem:[%s2425_s5 + $0x5] ss:$0 sm:$0xff] }
  0xe5   :  { %v1585_v59 = vld [vmem:[%s2425_s5 + $0x6] ss:$0 sm:$0xff] }
  0xe9   :  { %v2230_v61 = vpop.f32.mrb[8].mxu0  ;;  %v2232_v62 = vpop.f32.mrb[8].mxu1 }
  0xea   :  { %v1679_v63 = vpop.f32.mrb[9].mxu0  ;;  %v1685_v1 = vpop.f32.mrb[9].mxu1 }
  0xeb   :  { %v321_v2 = vpop.f32.mrb[10].mxu0  ;;  %v367_v4 = vpop.f32.mrb[10].mxu1 }
  0xec   :  { %v1680_v5 = vpop.f32.mrb[11].mxu0  ;;  %v1686_v6 = vpop.f32.mrb[11].mxu1 }
  0xf1   :  { %v2234_v8 = vpop.f32.mrb[12].mxu0  ;;  %v2236_v9 = vpop.f32.mrb[12].mxu1 }
  0xf2   :  { %v1691_v10 = vpop.f32.mrb[13].mxu0  ;;  %v1697_v11 = vpop.f32.mrb[13].mxu1 }
  0xf3   :  { %v413_v12 = vpop.f32.mrb[14].mxu0  ;;  %v459_v15 = vpop.f32.mrb[14].mxu1 }
  0xf4   :  { %v1692_v16 = vpop.f32.mrb[15].mxu0  ;;  %v1698_v17 = vpop.f32.mrb[15].mxu1 }
  0xf5   :  { %v1586_v16 = vld [vmem:[%s2425_s5 + $0x7] ss:$0 sm:$0xff] }
  0xf9   :  { %v2238_v18 = vpop.f32.mrb[16].mxu0  ;;  %v2240_v19 = vpop.f32.mrb[16].mxu1 }
  0xfa   :  { %v1354_v7 = vsub.f32 %v2222_v47, %v2240_v19  ;;  %v1703_v20 = vpop.f32.mrb[17].mxu0  ;;  %v1709_v23 = vpop.f32.mrb[17].mxu1 }
  0xfb   :  { %v505_v24 = vpop.f32.mrb[18].mxu0  ;;  %v560_v25 = vpop.f32.mrb[18].mxu1 }
  0xfc   :  { %v1426_v26 = vadd.f32 %v1579_v3, %v1354_v7  ;;  %v1704_v27 = vpop.f32.mrb[19].mxu0  ;;  %v1710_v28 = vpop.f32.mrb[19].mxu1  ;;  %v1587_v3 = vld [vmem:[%s2425_s5 + $0x8] ss:$0 sm:$0xff] }
  0xfe   :  { %1436 = vst.msk [vmem:[%s2426_s7] sm:$0x3] %vm1435_vm3, %v1426_v26 }
 0x101   :  { %v2251_v13 = vpop.f32.mrb[20].mxu0  ;;  %v2256_v31 = vpop.f32.mrb[20].mxu1 }
 0x102   :  { %v1355_v33 = vsub.f32 %v2224_v48, %v2251_v13  ;;  %v1356_v34 = vsub.f32 %v2226_v55, %v2256_v31  ;;  %v1715_v35 = vpop.f32.mrb[21].mxu0  ;;  %v1721_v36 = vpop.f32.mrb[21].mxu1 }
 0x103   :  { %v606_v21 = vpop.f32.mrb[22].mxu0  ;;  %v652_v22 = vpop.f32.mrb[22].mxu1 }
 0x104   :  { %v1427_v37 = vadd.f32 %v1580_v14, %v1355_v33  ;;  %v1428_v39 = vadd.f32 %v1581_v32, %v1356_v34  ;;  %v1716_v40 = vpop.f32.mrb[23].mxu0  ;;  %v1722_v41 = vpop.f32.mrb[23].mxu1 }
 0x106   :  { %1437 = vst.msk [vmem:[%s2426_s7 + $0x2] sm:$0x3] %vm1435_vm3, %v1427_v37  ;;  %1438 = vst.msk [vmem:[%s2426_s7 + $0x4] sm:$0x3] %vm1435_vm3, %v1428_v39  ;;  %v1588_v37 = vld [vmem:[%s2427_s6] ss:$0 sm:$0xff] }
 0x107   :  { %v1589_v39 = vld [vmem:[%s2427_s6 + $0x1] ss:$0 sm:$0xff] }
 0x109   :  { %v2273_v42 = vpop.f32.mrb[24].mxu0  ;;  %v2278_v44 = vpop.f32.mrb[24].mxu1 }
 0x10a   :  { %v1357_v29 = vsub.f32 %v2228_v38, %v2273_v42  ;;  %v1358_v30 = vsub.f32 %v2230_v61, %v2278_v44  ;;  %v1727_v46 = vpop.f32.mrb[25].mxu0  ;;  %v1733_v49 = vpop.f32.mrb[25].mxu1 }
 0x10b   :  { %v698_v50 = vpop.f32.mrb[26].mxu0  ;;  %v744_v51 = vpop.f32.mrb[26].mxu1 }
 0x10c   :  { %v1429_v52 = vadd.f32 %v1582_v43, %v1357_v29  ;;  %v1430_v53 = vadd.f32 %v1583_v45, %v1358_v30  ;;  %v1728_v54 = vpop.f32.mrb[27].mxu0  ;;  %v1734_v56 = vpop.f32.mrb[27].mxu1 }
 0x10e   :  { %1439 = vst.msk [vmem:[%s2426_s7 + $0x6] sm:$0x3] %vm1435_vm3, %v1429_v52  ;;  %1440 = vst.msk [vmem:[%s2426_s7 + $0x8] sm:$0x3] %vm1435_vm3, %v1430_v53  ;;  %v1590_v52 = vld [vmem:[%s2427_s6 + $0x2] ss:$0 sm:$0xff] }
 0x10f   :  { %v1591_v53 = vld [vmem:[%s2427_s6 + $0x3] ss:$0 sm:$0xff] }
 0x111   :  { %v2295_v57 = vpop.f32.mrb[28].mxu0  ;;  %v2300_v58 = vpop.f32.mrb[28].mxu1 }
 0x112   :  { %v1359_v60 = vsub.f32 %v2232_v62, %v2295_v57  ;;  %v1360_v63 = vsub.f32 %v2234_v8, %v2300_v58  ;;  %v1739_v1 = vpop.f32.mrb[29].mxu0  ;;  %v1745_v2 = vpop.f32.mrb[29].mxu1 }
 0x113   :  { %v790_v4 = vpop.f32.mrb[30].mxu0  ;;  %v836_v5 = vpop.f32.mrb[30].mxu1 }
 0x114   :  { %v1431_v6 = vadd.f32 %v1584_v0, %v1359_v60  ;;  %v1432_v10 = vadd.f32 %v1585_v59, %v1360_v63  ;;  %v1740_v11 = vpop.f32.mrb[31].mxu0  ;;  %v1746_v12 = vpop.f32.mrb[31].mxu1 }
 0x116   :  { %1441 = vst.msk [vmem:[%s2426_s7 + $0xa] sm:$0x3] %vm1435_vm3, %v1431_v6  ;;  %1442 = vst.msk [vmem:[%s2426_s7 + $0xc] sm:$0x3] %vm1435_vm3, %v1432_v10  ;;  %v1592_v6 = vld [vmem:[%s2427_s6 + $0x4] ss:$0 sm:$0xff] }
 0x117   :  { %v1593_v10 = vld [vmem:[%s2427_s6 + $0x5] ss:$0 sm:$0xff] }
 0x119   :  { %v2317_v15 = vpop.f32.mrb[32].mxu0  ;;  %v2322_v17 = vpop.f32.mrb[32].mxu1 }
 0x11a   :  { %v1361_v7 = vsub.f32 %v2236_v9, %v2317_v15  ;;  %v1362_v20 = vsub.f32 %v2238_v18, %v2322_v17  ;;  %v1751_v23 = vpop.f32.mrb[33].mxu0  ;;  %v1757_v24 = vpop.f32.mrb[33].mxu1 }
 0x11b   :  { %v882_v25 = vpop.f32.mrb[34].mxu0  ;;  %v928_v26 = vpop.f32.mrb[34].mxu1 }
 0x11c   :  { %v1433_v27 = vadd.f32 %v1586_v16, %v1361_v7  ;;  %v1434_v28 = vadd.f32 %v1587_v3, %v1362_v20  ;;  %v1752_v14 = vpop.f32.mrb[35].mxu0  ;;  %v1758_v32 = vpop.f32.mrb[35].mxu1 }
 0x11e   :  { %1443 = vst.msk [vmem:[%s2426_s7 + $0xe] sm:$0x3] %vm1435_vm3, %v1433_v27  ;;  %1444 = vst.msk [vmem:[%s2426_s7 + $0x10] sm:$0x3] %vm1435_vm3, %v1434_v28  ;;  %v1594_v27 = vld [vmem:[%s2427_s6 + $0x6] ss:$0 sm:$0xff] }
 0x11f   :  { %v1595_v28 = vld [vmem:[%s2427_s6 + $0x7] ss:$0 sm:$0xff] }
 0x121   :  { %v980_v33 = vpop.f32.mrb[36].mxu0  ;;  %v1026_v34 = vpop.f32.mrb[36].mxu1 }
 0x122   :  { %v1445_v35 = vsub.f32 %v980_v33, %v2222_v47  ;;  %v1446_v36 = vsub.f32 %v1026_v34, %v2224_v48  ;;  %v1763_v21 = vpop.f32.mrb[37].mxu0  ;;  %v1769_v22 = vpop.f32.mrb[37].mxu1 }
 0x123   :  { %v983_v40 = vpop.f32.mrb[38].mxu0  ;;  %v1029_v41 = vpop.f32.mrb[38].mxu1 }
 0x124   :  { %v1454_v43 = vsub.f32 %v1445_v35, %v2240_v19  ;;  %v1455_v45 = vsub.f32 %v1446_v36, %v2251_v13  ;;  %v1764_v29 = vpop.f32.mrb[39].mxu0  ;;  %v1770_v47 = vpop.f32.mrb[39].mxu1 }
 0x126   :  { %v1526_v30 = vadd.f32 %v1588_v37, %v1454_v43  ;;  %v1527_v48 = vadd.f32 %v1589_v39, %v1455_v45 }
 0x128   :  { %1535 = vst.msk [vmem:[%s2428_s8] sm:$0x3] %vm1435_vm3, %v1526_v30  ;;  %1536 = vst.msk [vmem:[%s2428_s8 + $0x2] sm:$0x3] %vm1435_vm3, %v1527_v48 }
 0x129   :  { %v1072_v46 = vpop.f32.mrb[40].mxu0  ;;  %v1118_v49 = vpop.f32.mrb[40].mxu1 }
 0x12a   :  { %v1447_v19 = vsub.f32 %v1072_v46, %v2226_v55  ;;  %v1448_v13 = vsub.f32 %v1118_v49, %v2228_v38  ;;  %v1775_v50 = vpop.f32.mrb[41].mxu0  ;;  %v1781_v51 = vpop.f32.mrb[41].mxu1 }
 0x12b   :  { %v1075_v54 = vpop.f32.mrb[42].mxu0  ;;  %v1121_v56 = vpop.f32.mrb[42].mxu1 }
 0x12c   :  { %v1456_v0 = vsub.f32 %v1447_v19, %v2256_v31  ;;  %v1457_v59 = vsub.f32 %v1448_v13, %v2273_v42  ;;  %v1776_v60 = vpop.f32.mrb[43].mxu0  ;;  %v1782_v55 = vpop.f32.mrb[43].mxu1 }
 0x12e   :  { %v1528_v63 = vadd.f32 %v1590_v52, %v1456_v0  ;;  %v1529_v38 = vadd.f32 %v1591_v53, %v1457_v59 }
 0x130   :  { %1537 = vst.msk [vmem:[%s2428_s8 + $0x4] sm:$0x3] %vm1435_vm3, %v1528_v63  ;;  %1538 = vst.msk [vmem:[%s2428_s8 + $0x6] sm:$0x3] %vm1435_vm3, %v1529_v38 }
 0x131   :  { %v1164_v1 = vpop.f32.mrb[44].mxu0  ;;  %v1210_v2 = vpop.f32.mrb[44].mxu1 }
 0x132   :  { %v1449_v31 = vsub.f32 %v1164_v1, %v2230_v61  ;;  %v1450_v42 = vsub.f32 %v1210_v2, %v2232_v62  ;;  %v1787_v4 = vpop.f32.mrb[45].mxu0  ;;  %v1793_v5 = vpop.f32.mrb[45].mxu1 }
 0x133   :  { %v1167_v11 = vpop.f32.mrb[46].mxu0  ;;  %v1213_v12 = vpop.f32.mrb[46].mxu1 }
 0x134   :  { %v1458_v16 = vsub.f32 %v1449_v31, %v2278_v44  ;;  %v1459_v3 = vsub.f32 %v1450_v42, %v2295_v57  ;;  %v1788_v7 = vpop.f32.mrb[47].mxu0  ;;  %v1794_v61 = vpop.f32.mrb[47].mxu1 }
 0x136   :  { %v1530_v20 = vadd.f32 %v1592_v6, %v1458_v16  ;;  %v1531_v62 = vadd.f32 %v1593_v10, %v1459_v3 }
 0x138   :  { %1539 = vst.msk [vmem:[%s2428_s8 + $0x8] sm:$0x3] %vm1435_vm3, %v1530_v20  ;;  %1540 = vst.msk [vmem:[%s2428_s8 + $0xa] sm:$0x3] %vm1435_vm3, %v1531_v62 }
 0x139   :  { %v1256_v23 = vpop.f32.mrb[48].mxu0  ;;  %v1302_v24 = vpop.f32.mrb[48].mxu1 }
 0x13a   :  { %v1451_v44 = vsub.f32 %v1256_v23, %v2234_v8  ;;  %v1452_v57 = vsub.f32 %v1302_v24, %v2236_v9  ;;  %v1799_v25 = vpop.f32.mrb[49].mxu0  ;;  %v1805_v26 = vpop.f32.mrb[49].mxu1 }
 0x13b   :  { %v1259_v14 = vpop.f32.mrb[50].mxu0  ;;  %v1305_v32 = vpop.f32.mrb[50].mxu1 }
 0x13c   :  { %v1460_v33 = vsub.f32 %v1451_v44, %v2300_v58  ;;  %v1461_v34 = vsub.f32 %v1452_v57, %v2317_v15  ;;  %v1800_v35 = vpop.f32.mrb[51].mxu0  ;;  %v1806_v8 = vpop.f32.mrb[51].mxu1  ;;  %v1596_v15 = vld [vmem:[%s2427_s6 + $0x8] ss:$0 sm:$0xff] }
 0x13e   :  { %v1532_v36 = vadd.f32 %v1594_v27, %v1460_v33  ;;  %v1533_v9 = vadd.f32 %v1595_v28, %v1461_v34 }
 0x140   :  { %1541 = vst.msk [vmem:[%s2428_s8 + $0xc] sm:$0x3] %vm1435_vm3, %v1532_v36  ;;  %1542 = vst.msk [vmem:[%s2428_s8 + $0xe] sm:$0x3] %vm1435_vm3, %v1533_v9 }
 0x141   :  { %v1348_v21 = vpop.f32.mrb[52].mxu0 }
 0x142   :  { %v1453_v22 = vsub.f32 %v1348_v21, %v2238_v18  ;;  %v1811_v58 = vpop.f32.mrb[53].mxu0 }
 0x143   :  { %v1351_v37 = vpop.f32.mrb[54].mxu0 }
 0x144   :  { %v1462_v39 = vsub.f32 %v1453_v22, %v2322_v17  ;;  %v1812_v40 = vpop.f32.mrb[55].mxu0 }
 0x146   :  { %v1534_v41 = vadd.f32 %v1596_v15, %v1462_v39 }
 0x148   :  { %1543 = vst.msk [vmem:[%s2428_s8 + $0x10] sm:$0x3] %vm1435_vm3, %v1534_v41 }

</bundles_post_ra>
